<compile_context>
chip_gen: v7x
topology: tpu7x:2x2x1
jax: 0.10.0
libtpu: 0.0.40
codegen_flags: <defaults>
</compile_context>

<pallas_src>
import functools

import jax
import jax.numpy as jnp
import numpy as np
from jax import lax
from jax.experimental import pallas as pl
from jax.experimental.pallas import tpu as pltpu

FEATURES = 4            # ['Price', 'Open', 'High', 'Low']
HIDDEN = 128
MATMUL_DTYPE = jnp.bfloat16   # MXU operand dtype; state/gates/activations stay f32


def _device_kind() -> str:
    try:
        return jax.devices()[0].device_kind.lower()
    except Exception:
        return ""


_KIND = _device_kind()
_SPLIT_K = "v5" in _KIND      # v5e/v5p: 128-deep MXU -> skip the zero block's K-pass
_IS_V7X = "v7" in _KIND       # 2 TensorCores/chip -> batch-parallel grid pays off


def _make_lstm2_kernel(split_k: bool):
    """Kernel factory: 2-layer LSTM recurrence + last-step Linear(128 -> 1)."""

    def body(g0x_ref, w_refs, b1_ref, wfc_ref, bfc_ref, out_ref):
        T, B, G = g0x_ref.shape
        H = G // 4

        # Hoisted loop invariants (no per-step broadcast_in_dim / bias reload).
        b1b = jnp.broadcast_to(b1_ref[...], (B, G))
        wfc = wfc_ref[...]

        if split_k:
            wtop = w_refs[0][...]          # (H, 8H) = [W_hh0 | W_ih1]   (bf16)
            wbot = w_refs[1][...]          # (H, 4H) = W_hh1             (bf16)

            def rec_matmul(h0, h1):
                gt = jnp.dot(h0.astype(wtop.dtype), wtop,
                             preferred_element_type=jnp.float32)        # (B, 8H)
                gb = jnp.dot(h1.astype(wbot.dtype), wbot,
                             preferred_element_type=jnp.float32)        # (B, 4H)
                return gt[:, :G], gt[:, G:] + gb

            def rec_matmul_layer1(h0, h1):
                g1 = jnp.dot(h0.astype(wtop.dtype), wtop[:, G:],
                             preferred_element_type=jnp.float32)
                return g1 + jnp.dot(h1.astype(wbot.dtype), wbot,
                                    preferred_element_type=jnp.float32)
        else:
            wblk = w_refs[0][...]          # (2H, 8H) = [[W_hh0, W_ih1],[0, W_hh1]]

            def rec_matmul(h0, h1):
                hh = jnp.concatenate([h0, h1], axis=1).astype(wblk.dtype)
                gg = jnp.dot(hh, wblk, preferred_element_type=jnp.float32)
                return gg[:, :G], gg[:, G:]

            def rec_matmul_layer1(h0, h1):
                hh = jnp.concatenate([h0, h1], axis=1).astype(wblk.dtype)
                return jnp.dot(hh, wblk[:, G:],
                               preferred_element_type=jnp.float32)

        def gates_to_hc(gates, c):
            # PyTorch gate order along the 4H axis: [i | f | g | o]
            i = jax.nn.sigmoid(gates[:, 0 * H:1 * H])
            f = jax.nn.sigmoid(gates[:, 1 * H:2 * H])
            g = jnp.tanh(gates[:, 2 * H:3 * H])
            o = jax.nn.sigmoid(gates[:, 3 * H:4 * H])
            c_new = f * c + i * g
            return o * jnp.tanh(c_new), c_new

        z = jnp.zeros((B, H), jnp.float32)

        # Prologue: layer-0 step 0 (h0_{-1}=0, so gates are just the pre-gates).
        h0, c0 = gates_to_hc(g0x_ref[0], z)

        # Pipelined steps: layer0(t) fused with layer1(t-1) -- they only share
        # h0_{t-1}.  Carry entering step t:
        #   h0 = h0_{t-1}, c0 = c0_{t-1}, h1 = h1_{t-2}, c1 = c1_{t-2}
        def step(t, carry):
            h0, c0, h1, c1 = carry
            g0_rec, g1_rec = rec_matmul(h0, h1)
            gates0 = g0_rec + g0x_ref[t]          # + (x_t @ W_ih0 + b0)
            gates1 = g1_rec + b1b
            h0n, c0n = gates_to_hc(gates0, c0)    # layer 0, step t
            h1n, c1n = gates_to_hc(gates1, c1)    # layer 1, step t-1
            return (h0n, c0n, h1n, c1n)

        h0, c0, h1, c1 = lax.fori_loop(1, T, step, (h0, c0, z, z), unroll=True)

        # Epilogue: layer-1 step T-1.
        gates1 = rec_matmul_layer1(h0, h1) + b1b
        h1, _ = gates_to_hc(gates1, c1)

        # fc: Linear(128 -> 1) as VPU multiply + lane reduction (no N=1 MXU push).
        out_ref[...] = (jnp.sum(h1 * wfc, axis=-1, keepdims=True) + bfc_ref[...])

    if split_k:
        def kernel(g0x_ref, wtop_ref, wbot_ref, b1_ref, wfc_ref, bfc_ref, out_ref):
            body(g0x_ref, (wtop_ref, wbot_ref), b1_ref, wfc_ref, bfc_ref, out_ref)
    else:
        def kernel(g0x_ref, wblk_ref, b1_ref, wfc_ref, bfc_ref, out_ref):
            body(g0x_ref, (wblk_ref,), b1_ref, wfc_ref, bfc_ref, out_ref)
    return kernel


def init_params(key, input_size=FEATURES, hidden=HIDDEN):
    """Deterministic PyTorch-style uniform(-1/sqrt(H), 1/sqrt(H)) init."""
    k = 1.0 / np.sqrt(hidden)
    keys = jax.random.split(key, 12)
    u = lambda kk, shape: jax.random.uniform(kk, shape, jnp.float32, -k, k)
    return {
        # layer 0 (pre-transposed for x @ W form)
        "wih0": u(keys[0], (input_size, 4 * hidden)),
        "whh0": u(keys[1], (hidden, 4 * hidden)),
        "b0":   u(keys[2], (1, 4 * hidden)) + u(keys[3], (1, 4 * hidden)),  # b_ih + b_hh
        # layer 1
        "wih1": u(keys[4], (hidden, 4 * hidden)),
        "whh1": u(keys[5], (hidden, 4 * hidden)),
        "b1":   u(keys[6], (1, 4 * hidden)) + u(keys[7], (1, 4 * hidden)),
        # fc
        "wfc":  u(keys[8], (hidden, 1)),
        "bfc":  u(keys[9], (1, 1)),
    }


def prepare_params(params, *, split_k=_SPLIT_K, matmul_dtype=MATMUL_DTYPE):
    """One-time weight layout/dtype prep (not rebuilt per forward call)."""
    H = HIDDEN
    wtop = jnp.concatenate([params["whh0"], params["wih1"]], axis=1)        # (H, 8H)
    if split_k:
        w_rec = (wtop.astype(matmul_dtype), params["whh1"].astype(matmul_dtype))
    else:
        wbot_row = jnp.concatenate(
            [jnp.zeros((H, 4 * H), jnp.float32), params["whh1"]], axis=1)   # (H, 8H)
        w_rec = (jnp.concatenate([wtop, wbot_row], axis=0).astype(matmul_dtype),)
    return {
        "wih0": params["wih0"].astype(jnp.float32),       # (F, 4H)
        "b0":   params["b0"].astype(jnp.float32),         # (1, 4H)
        "b1":   params["b1"].astype(jnp.float32),         # (1, 4H)
        "w_rec": w_rec,                                   # fused / split recurrent block
        "wfc_row": params["wfc"].T.astype(jnp.float32),   # (1, H)
        "bfc":  params["bfc"].astype(jnp.float32),        # (1, 1)
    }


@functools.partial(jax.jit, static_argnames=("num_batch_tiles",))
def _forward_impl(x, prepped, *, num_batch_tiles=1):
    B, T, F = x.shape                         # static under jit
    H = HIDDEN
    G = 4 * H
    w_rec = prepped["w_rec"]
    split_k = (len(w_rec) == 2)               # static: inferred from pytree structure

    bq = 8 * num_batch_tiles                  # batch padded to 8 sublanes per tile
    Bp = ((B + bq - 1) // bq) * bq
    bt = Bp // num_batch_tiles                # batch rows per grid step
    x_p = jnp.zeros((Bp, T, F), jnp.float32).at[:B].set(x)
    x_tm = jnp.transpose(x_p, (1, 0, 2))      # time-major (T, Bp, F)

    # Hoisted layer-0 input projection: one batched matmul over all timesteps.
    g0x = jnp.einsum("tbf,fg->tbg", x_tm, prepped["wih0"]) + prepped["b0"]  # (T,Bp,4H)

    kernel = _make_lstm2_kernel(split_k)
    const = lambda shape: pl.BlockSpec(shape, lambda i: (0,) * len(shape))
    in_specs = ([pl.BlockSpec((T, bt, G), lambda i: (0, i, 0))]
                + [const(w.shape) for w in w_rec]
                + [const((1, G)), const((1, H)), const((1, 1))])

    out_p = pl.pallas_call(
        kernel,
        out_shape=jax.ShapeDtypeStruct((Bp, 1), jnp.float32),
        grid=(num_batch_tiles,),
        in_specs=in_specs,
        out_specs=pl.BlockSpec((bt, 1), lambda i: (i, 0)),
        compiler_params=pltpu.CompilerParams(
            dimension_semantics=("parallel",)),   # v7x: one batch tile per TensorCore
    )(g0x, *w_rec, prepped["b1"], prepped["wfc_row"], prepped["bfc"])
    return out_p[:B]


def base_model_forward(x, prepped):
    """x: (B, T, F) batch-first float32, like the PyTorch module. Returns (B, 1)."""
    B = x.shape[0]
    # The batch grid only pays off on v7x's two TensorCores with >=8 rows per
    # core; a single invocation with all rows is strictly better elsewhere.
    nb = 2 if (_IS_V7X and B >= 16) else 1
    return _forward_impl(x, prepped, num_batch_tiles=nb)


def reference_forward(x, params):
    """Pure-JAX f32 reference of the PyTorch forward (eval mode)."""
    B, T, _ = x.shape
    H = HIDDEN

    def cell(x_t, h, c, wih, whh, b):
        g = x_t @ wih + h @ whh + b
        i = jax.nn.sigmoid(g[:, 0 * H:1 * H])
        f = jax.nn.sigmoid(g[:, 1 * H:2 * H])
        gg = jnp.tanh(g[:, 2 * H:3 * H])
        o = jax.nn.sigmoid(g[:, 3 * H:4 * H])
        c = f * c + i * gg
        h = o * jnp.tanh(c)
        return h, c

    h0 = c0 = h1 = c1 = jnp.zeros((B, H), jnp.float32)
    for t in range(T):
        x_t = x[:, t, :]
        h0, c0 = cell(x_t, h0, c0, params["wih0"], params["whh0"], params["b0"])
        h1, c1 = cell(h0, h1, c1, params["wih1"], params["whh1"], params["b1"])
    return h1 @ params["wfc"] + params["bfc"]


if __name__ == "__main__":
    key = jax.random.PRNGKey(0)
    k_x, k_p = jax.random.split(key)

    B, T, F = 2, 8, FEATURES          # small shapes (module uses window_width=30)
    x = jax.random.normal(k_x, (B, T, F), jnp.float32)
    params = init_params(k_p)
    prepped = prepare_params(params)

    out = base_model_forward(x, prepped)
    out = jax.block_until_ready(out)

    ref = reference_forward(x, params)
    # bf16 MXU operands over the T-step recurrence -> relaxed tolerance vs. the
    # f32 reference (per performance review); state/accumulation stay f32.
    np.testing.assert_allclose(np.asarray(out), np.asarray(ref), rtol=2e-2, atol=2e-2)

    assert out.shape == (B, 1)
    print("KERNEL_OK")
</pallas_src>

<mosaic_0001>
module attributes {stable_mosaic.version = 11 : i64} {
  func.func @kernel(%arg0: i32, %arg1: memref<8x8x512xf32, #tpu.memory_space<vmem>>, %arg2: memref<256x1024xbf16, #tpu.memory_space<vmem>>, %arg3: memref<1x512xf32, #tpu.memory_space<vmem>>, %arg4: memref<1x128xf32, #tpu.memory_space<vmem>>, %arg5: memref<1x1xf32, #tpu.memory_space<vmem>>, %arg6: memref<8x1xf32, #tpu.memory_space<vmem>>) attributes {dimension_semantics = [#tpu.dimension_semantics<parallel>], iteration_bounds = array<i64: 1>, scalar_prefetch = 0 : i64, scratch_operands = 0 : i64, tpu.core_type = #tpu.core_type<tc>, window_params = [{transform_indices = @transform_0, window_bounds = array<i64: 8, 8, 512>}, {pipeline_mode = #tpu.pipeline_mode<synchronous>, transform_indices = @transform_1, window_bounds = array<i64: 256, 1024>}, {pipeline_mode = #tpu.pipeline_mode<synchronous>, transform_indices = @transform_2, window_bounds = array<i64: 1, 512>}, {pipeline_mode = #tpu.pipeline_mode<synchronous>, transform_indices = @transform_3, window_bounds = array<i64: 1, 128>}, {pipeline_mode = #tpu.pipeline_mode<synchronous>, transform_indices = @transform_4, window_bounds = array<i64: 1, 1>}, {transform_indices = @transform_5, window_bounds = array<i64: 8, 1>}]} {
    %c0 = arith.constant 0 : index
    %c0_0 = arith.constant 0 : index
    %0 = vector.load %arg3[%c0, %c0_0] : memref<1x512xf32, #tpu.memory_space<vmem>>, vector<1x512xf32>
    %1 = vector.shape_cast %0 : vector<1x512xf32> to vector<1x512xf32>
    %2 = vector.broadcast %1 : vector<1x512xf32> to vector<8x512xf32>
    %c0_1 = arith.constant 0 : index
    %c0_2 = arith.constant 0 : index
    %3 = vector.load %arg4[%c0_1, %c0_2] : memref<1x128xf32, #tpu.memory_space<vmem>>, vector<1x128xf32>
    %c0_3 = arith.constant 0 : index
    %c0_4 = arith.constant 0 : index
    %4 = vector.load %arg2[%c0_3, %c0_4] : memref<256x1024xbf16, #tpu.memory_space<vmem>>, vector<256x1024xbf16>
    %cst = arith.constant 0.000000e+00 : f32
    %5 = vector.broadcast %cst : f32 to vector<8x128xf32>
    %c0_5 = arith.constant 0 : index
    %c0_6 = arith.constant 0 : index
    %c0_7 = arith.constant 0 : index
    %6 = vector.load %arg1[%c0_5, %c0_6, %c0_7] : memref<8x8x512xf32, #tpu.memory_space<vmem>>, vector<1x8x512xf32>
    %7 = vector.shape_cast %6 : vector<1x8x512xf32> to vector<8x512xf32>
    %8 = vector.extract_strided_slice %7 {offsets = [0, 0], sizes = [8, 128], strides = [1, 1]} : vector<8x512xf32> to vector<8x128xf32>
    %9 = arith.negf %8 : vector<8x128xf32>
    %10 = math.exp %9 : vector<8x128xf32>
    %cst_8 = arith.constant 1.000000e+00 : f32
    %11 = vector.broadcast %cst_8 : f32 to vector<8x128xf32>
    %12 = arith.addf %11, %10 : vector<8x128xf32>
    %13 = arith.divf %11, %12 : vector<8x128xf32>
    %14 = vector.extract_strided_slice %7 {offsets = [0, 128], sizes = [8, 128], strides = [1, 1]} : vector<8x512xf32> to vector<8x128xf32>
    %15 = arith.negf %14 : vector<8x128xf32>
    %16 = math.exp %15 : vector<8x128xf32>
    %cst_9 = arith.constant 1.000000e+00 : f32
    %17 = vector.broadcast %cst_9 : f32 to vector<8x128xf32>
    %18 = arith.addf %17, %16 : vector<8x128xf32>
    %19 = arith.divf %17, %18 : vector<8x128xf32>
    %20 = vector.extract_strided_slice %7 {offsets = [0, 256], sizes = [8, 128], strides = [1, 1]} : vector<8x512xf32> to vector<8x128xf32>
    %21 = math.tanh %20 : vector<8x128xf32>
    %22 = vector.extract_strided_slice %7 {offsets = [0, 384], sizes = [8, 128], strides = [1, 1]} : vector<8x512xf32> to vector<8x128xf32>
    %23 = arith.negf %22 : vector<8x128xf32>
    %24 = math.exp %23 : vector<8x128xf32>
    %cst_10 = arith.constant 1.000000e+00 : f32
    %25 = vector.broadcast %cst_10 : f32 to vector<8x128xf32>
    %26 = arith.addf %25, %24 : vector<8x128xf32>
    %27 = arith.divf %25, %26 : vector<8x128xf32>
    %28 = arith.mulf %19, %5 : vector<8x128xf32>
    %29 = arith.mulf %13, %21 : vector<8x128xf32>
    %30 = arith.addf %28, %29 : vector<8x128xf32>
    %31 = math.tanh %30 : vector<8x128xf32>
    %32 = arith.mulf %27, %31 : vector<8x128xf32>
    %c1_i32 = arith.constant 1 : i32
    %33 = tpu.concatenate %32, %5 in 1 : vector<8x128xf32>, vector<8x128xf32> -> vector<8x256xf32>
    %34 = arith.truncf %33 : vector<8x256xf32> to vector<8x256xbf16>
    %cst_11 = arith.constant dense<0.000000e+00> : vector<8x1024xf32>
    %35 = tpu.matmul %34, %4, %cst_11 {dimension_numbers = #tpu.dot_dimension_numbers<[1], [0], [0], [1], [0, 0, 1, 1], [], []>} : vector<8x256xbf16>, vector<256x1024xbf16>, vector<8x1024xf32> -> vector<8x1024xf32>
    %36 = vector.extract_strided_slice %35 {offsets = [0, 0], sizes = [8, 512], strides = [1, 1]} : vector<8x1024xf32> to vector<8x512xf32>
    %37 = vector.extract_strided_slice %35 {offsets = [0, 512], sizes = [8, 512], strides = [1, 1]} : vector<8x1024xf32> to vector<8x512xf32>
    %38 = arith.index_cast %c1_i32 : i32 to index
    %c0_12 = arith.constant 0 : index
    %c0_13 = arith.constant 0 : index
    %39 = vector.load %arg1[%38, %c0_12, %c0_13] : memref<8x8x512xf32, #tpu.memory_space<vmem>>, vector<1x8x512xf32>
    %40 = vector.shape_cast %39 : vector<1x8x512xf32> to vector<8x512xf32>
    %41 = arith.addf %36, %40 : vector<8x512xf32>
    %42 = arith.addf %37, %2 : vector<8x512xf32>
    %43 = vector.extract_strided_slice %41 {offsets = [0, 0], sizes = [8, 128], strides = [1, 1]} : vector<8x512xf32> to vector<8x128xf32>
    %44 = arith.negf %43 : vector<8x128xf32>
    %45 = math.exp %44 : vector<8x128xf32>
    %cst_14 = arith.constant 1.000000e+00 : f32
    %46 = vector.broadcast %cst_14 : f32 to vector<8x128xf32>
    %47 = arith.addf %46, %45 : vector<8x128xf32>
    %48 = arith.divf %46, %47 : vector<8x128xf32>
    %49 = vector.extract_strided_slice %41 {offsets = [0, 128], sizes = [8, 128], strides = [1, 1]} : vector<8x512xf32> to vector<8x128xf32>
    %50 = arith.negf %49 : vector<8x128xf32>
    %51 = math.exp %50 : vector<8x128xf32>
    %cst_15 = arith.constant 1.000000e+00 : f32
    %52 = vector.broadcast %cst_15 : f32 to vector<8x128xf32>
    %53 = arith.addf %52, %51 : vector<8x128xf32>
    %54 = arith.divf %52, %53 : vector<8x128xf32>
    %55 = vector.extract_strided_slice %41 {offsets = [0, 256], sizes = [8, 128], strides = [1, 1]} : vector<8x512xf32> to vector<8x128xf32>
    %56 = math.tanh %55 : vector<8x128xf32>
    %57 = vector.extract_strided_slice %41 {offsets = [0, 384], sizes = [8, 128], strides = [1, 1]} : vector<8x512xf32> to vector<8x128xf32>
    %58 = arith.negf %57 : vector<8x128xf32>
    %59 = math.exp %58 : vector<8x128xf32>
    %cst_16 = arith.constant 1.000000e+00 : f32
    %60 = vector.broadcast %cst_16 : f32 to vector<8x128xf32>
    %61 = arith.addf %60, %59 : vector<8x128xf32>
    %62 = arith.divf %60, %61 : vector<8x128xf32>
    %63 = arith.mulf %54, %30 : vector<8x128xf32>
    %64 = arith.mulf %48, %56 : vector<8x128xf32>
    %65 = arith.addf %63, %64 : vector<8x128xf32>
    %66 = math.tanh %65 : vector<8x128xf32>
    %67 = arith.mulf %62, %66 : vector<8x128xf32>
    %68 = vector.extract_strided_slice %42 {offsets = [0, 0], sizes = [8, 128], strides = [1, 1]} : vector<8x512xf32> to vector<8x128xf32>
    %69 = arith.negf %68 : vector<8x128xf32>
    %70 = math.exp %69 : vector<8x128xf32>
    %cst_17 = arith.constant 1.000000e+00 : f32
    %71 = vector.broadcast %cst_17 : f32 to vector<8x128xf32>
    %72 = arith.addf %71, %70 : vector<8x128xf32>
    %73 = arith.divf %71, %72 : vector<8x128xf32>
    %74 = vector.extract_strided_slice %42 {offsets = [0, 128], sizes = [8, 128], strides = [1, 1]} : vector<8x512xf32> to vector<8x128xf32>
    %75 = arith.negf %74 : vector<8x128xf32>
    %76 = math.exp %75 : vector<8x128xf32>
    %cst_18 = arith.constant 1.000000e+00 : f32
    %77 = vector.broadcast %cst_18 : f32 to vector<8x128xf32>
    %78 = arith.addf %77, %76 : vector<8x128xf32>
    %79 = arith.divf %77, %78 : vector<8x128xf32>
    %80 = vector.extract_strided_slice %42 {offsets = [0, 256], sizes = [8, 128], strides = [1, 1]} : vector<8x512xf32> to vector<8x128xf32>
    %81 = math.tanh %80 : vector<8x128xf32>
    %82 = vector.extract_strided_slice %42 {offsets = [0, 384], sizes = [8, 128], strides = [1, 1]} : vector<8x512xf32> to vector<8x128xf32>
    %83 = arith.negf %82 : vector<8x128xf32>
    %84 = math.exp %83 : vector<8x128xf32>
    %cst_19 = arith.constant 1.000000e+00 : f32
    %85 = vector.broadcast %cst_19 : f32 to vector<8x128xf32>
    %86 = arith.addf %85, %84 : vector<8x128xf32>
    %87 = arith.divf %85, %86 : vector<8x128xf32>
    %88 = arith.mulf %79, %5 : vector<8x128xf32>
    %89 = arith.mulf %73, %81 : vector<8x128xf32>
    %90 = arith.addf %88, %89 : vector<8x128xf32>
    %91 = math.tanh %90 : vector<8x128xf32>
    %92 = arith.mulf %87, %91 : vector<8x128xf32>
    %c2_i32 = arith.constant 2 : i32
    %93 = tpu.concatenate %67, %92 in 1 : vector<8x128xf32>, vector<8x128xf32> -> vector<8x256xf32>
    %94 = arith.truncf %93 : vector<8x256xf32> to vector<8x256xbf16>
    %cst_20 = arith.constant dense<0.000000e+00> : vector<8x1024xf32>
    %95 = tpu.matmul %94, %4, %cst_20 {dimension_numbers = #tpu.dot_dimension_numbers<[1], [0], [0], [1], [0, 0, 1, 1], [], []>} : vector<8x256xbf16>, vector<256x1024xbf16>, vector<8x1024xf32> -> vector<8x1024xf32>
    %96 = vector.extract_strided_slice %95 {offsets = [0, 0], sizes = [8, 512], strides = [1, 1]} : vector<8x1024xf32> to vector<8x512xf32>
    %97 = vector.extract_strided_slice %95 {offsets = [0, 512], sizes = [8, 512], strides = [1, 1]} : vector<8x1024xf32> to vector<8x512xf32>
    %98 = arith.index_cast %c2_i32 : i32 to index
    %c0_21 = arith.constant 0 : index
    %c0_22 = arith.constant 0 : index
    %99 = vector.load %arg1[%98, %c0_21, %c0_22] : memref<8x8x512xf32, #tpu.memory_space<vmem>>, vector<1x8x512xf32>
    %100 = vector.shape_cast %99 : vector<1x8x512xf32> to vector<8x512xf32>
    %101 = arith.addf %96, %100 : vector<8x512xf32>
    %102 = arith.addf %97, %2 : vector<8x512xf32>
    %103 = vector.extract_strided_slice %101 {offsets = [0, 0], sizes = [8, 128], strides = [1, 1]} : vector<8x512xf32> to vector<8x128xf32>
    %104 = arith.negf %103 : vector<8x128xf32>
    %105 = math.exp %104 : vector<8x128xf32>
    %cst_23 = arith.constant 1.000000e+00 : f32
    %106 = vector.broadcast %cst_23 : f32 to vector<8x128xf32>
    %107 = arith.addf %106, %105 : vector<8x128xf32>
    %108 = arith.divf %106, %107 : vector<8x128xf32>
    %109 = vector.extract_strided_slice %101 {offsets = [0, 128], sizes = [8, 128], strides = [1, 1]} : vector<8x512xf32> to vector<8x128xf32>
    %110 = arith.negf %109 : vector<8x128xf32>
    %111 = math.exp %110 : vector<8x128xf32>
    %cst_24 = arith.constant 1.000000e+00 : f32
    %112 = vector.broadcast %cst_24 : f32 to vector<8x128xf32>
    %113 = arith.addf %112, %111 : vector<8x128xf32>
    %114 = arith.divf %112, %113 : vector<8x128xf32>
    %115 = vector.extract_strided_slice %101 {offsets = [0, 256], sizes = [8, 128], strides = [1, 1]} : vector<8x512xf32> to vector<8x128xf32>
    %116 = math.tanh %115 : vector<8x128xf32>
    %117 = vector.extract_strided_slice %101 {offsets = [0, 384], sizes = [8, 128], strides = [1, 1]} : vector<8x512xf32> to vector<8x128xf32>
    %118 = arith.negf %117 : vector<8x128xf32>
    %119 = math.exp %118 : vector<8x128xf32>
    %cst_25 = arith.constant 1.000000e+00 : f32
    %120 = vector.broadcast %cst_25 : f32 to vector<8x128xf32>
    %121 = arith.addf %120, %119 : vector<8x128xf32>
    %122 = arith.divf %120, %121 : vector<8x128xf32>
    %123 = arith.mulf %114, %65 : vector<8x128xf32>
    %124 = arith.mulf %108, %116 : vector<8x128xf32>
    %125 = arith.addf %123, %124 : vector<8x128xf32>
    %126 = math.tanh %125 : vector<8x128xf32>
    %127 = arith.mulf %122, %126 : vector<8x128xf32>
    %128 = vector.extract_strided_slice %102 {offsets = [0, 0], sizes = [8, 128], strides = [1, 1]} : vector<8x512xf32> to vector<8x128xf32>
    %129 = arith.negf %128 : vector<8x128xf32>
    %130 = math.exp %129 : vector<8x128xf32>
    %cst_26 = arith.constant 1.000000e+00 : f32
    %131 = vector.broadcast %cst_26 : f32 to vector<8x128xf32>
    %132 = arith.addf %131, %130 : vector<8x128xf32>
    %133 = arith.divf %131, %132 : vector<8x128xf32>
    %134 = vector.extract_strided_slice %102 {offsets = [0, 128], sizes = [8, 128], strides = [1, 1]} : vector<8x512xf32> to vector<8x128xf32>
    %135 = arith.negf %134 : vector<8x128xf32>
    %136 = math.exp %135 : vector<8x128xf32>
    %cst_27 = arith.constant 1.000000e+00 : f32
    %137 = vector.broadcast %cst_27 : f32 to vector<8x128xf32>
    %138 = arith.addf %137, %136 : vector<8x128xf32>
    %139 = arith.divf %137, %138 : vector<8x128xf32>
    %140 = vector.extract_strided_slice %102 {offsets = [0, 256], sizes = [8, 128], strides = [1, 1]} : vector<8x512xf32> to vector<8x128xf32>
    %141 = math.tanh %140 : vector<8x128xf32>
    %142 = vector.extract_strided_slice %102 {offsets = [0, 384], sizes = [8, 128], strides = [1, 1]} : vector<8x512xf32> to vector<8x128xf32>
    %143 = arith.negf %142 : vector<8x128xf32>
    %144 = math.exp %143 : vector<8x128xf32>
    %cst_28 = arith.constant 1.000000e+00 : f32
    %145 = vector.broadcast %cst_28 : f32 to vector<8x128xf32>
    %146 = arith.addf %145, %144 : vector<8x128xf32>
    %147 = arith.divf %145, %146 : vector<8x128xf32>
    %148 = arith.mulf %139, %90 : vector<8x128xf32>
    %149 = arith.mulf %133, %141 : vector<8x128xf32>
    %150 = arith.addf %148, %149 : vector<8x128xf32>
    %151 = math.tanh %150 : vector<8x128xf32>
    %152 = arith.mulf %147, %151 : vector<8x128xf32>
    %c3_i32 = arith.constant 3 : i32
    %153 = tpu.concatenate %127, %152 in 1 : vector<8x128xf32>, vector<8x128xf32> -> vector<8x256xf32>
    %154 = arith.truncf %153 : vector<8x256xf32> to vector<8x256xbf16>
    %cst_29 = arith.constant dense<0.000000e+00> : vector<8x1024xf32>
    %155 = tpu.matmul %154, %4, %cst_29 {dimension_numbers = #tpu.dot_dimension_numbers<[1], [0], [0], [1], [0, 0, 1, 1], [], []>} : vector<8x256xbf16>, vector<256x1024xbf16>, vector<8x1024xf32> -> vector<8x1024xf32>
    %156 = vector.extract_strided_slice %155 {offsets = [0, 0], sizes = [8, 512], strides = [1, 1]} : vector<8x1024xf32> to vector<8x512xf32>
    %157 = vector.extract_strided_slice %155 {offsets = [0, 512], sizes = [8, 512], strides = [1, 1]} : vector<8x1024xf32> to vector<8x512xf32>
    %158 = arith.index_cast %c3_i32 : i32 to index
    %c0_30 = arith.constant 0 : index
    %c0_31 = arith.constant 0 : index
    %159 = vector.load %arg1[%158, %c0_30, %c0_31] : memref<8x8x512xf32, #tpu.memory_space<vmem>>, vector<1x8x512xf32>
    %160 = vector.shape_cast %159 : vector<1x8x512xf32> to vector<8x512xf32>
    %161 = arith.addf %156, %160 : vector<8x512xf32>
    %162 = arith.addf %157, %2 : vector<8x512xf32>
    %163 = vector.extract_strided_slice %161 {offsets = [0, 0], sizes = [8, 128], strides = [1, 1]} : vector<8x512xf32> to vector<8x128xf32>
    %164 = arith.negf %163 : vector<8x128xf32>
    %165 = math.exp %164 : vector<8x128xf32>
    %cst_32 = arith.constant 1.000000e+00 : f32
    %166 = vector.broadcast %cst_32 : f32 to vector<8x128xf32>
    %167 = arith.addf %166, %165 : vector<8x128xf32>
    %168 = arith.divf %166, %167 : vector<8x128xf32>
    %169 = vector.extract_strided_slice %161 {offsets = [0, 128], sizes = [8, 128], strides = [1, 1]} : vector<8x512xf32> to vector<8x128xf32>
    %170 = arith.negf %169 : vector<8x128xf32>
    %171 = math.exp %170 : vector<8x128xf32>
    %cst_33 = arith.constant 1.000000e+00 : f32
    %172 = vector.broadcast %cst_33 : f32 to vector<8x128xf32>
    %173 = arith.addf %172, %171 : vector<8x128xf32>
    %174 = arith.divf %172, %173 : vector<8x128xf32>
    %175 = vector.extract_strided_slice %161 {offsets = [0, 256], sizes = [8, 128], strides = [1, 1]} : vector<8x512xf32> to vector<8x128xf32>
    %176 = math.tanh %175 : vector<8x128xf32>
    %177 = vector.extract_strided_slice %161 {offsets = [0, 384], sizes = [8, 128], strides = [1, 1]} : vector<8x512xf32> to vector<8x128xf32>
    %178 = arith.negf %177 : vector<8x128xf32>
    %179 = math.exp %178 : vector<8x128xf32>
    %cst_34 = arith.constant 1.000000e+00 : f32
    %180 = vector.broadcast %cst_34 : f32 to vector<8x128xf32>
    %181 = arith.addf %180, %179 : vector<8x128xf32>
    %182 = arith.divf %180, %181 : vector<8x128xf32>
    %183 = arith.mulf %174, %125 : vector<8x128xf32>
    %184 = arith.mulf %168, %176 : vector<8x128xf32>
    %185 = arith.addf %183, %184 : vector<8x128xf32>
    %186 = math.tanh %185 : vector<8x128xf32>
    %187 = arith.mulf %182, %186 : vector<8x128xf32>
    %188 = vector.extract_strided_slice %162 {offsets = [0, 0], sizes = [8, 128], strides = [1, 1]} : vector<8x512xf32> to vector<8x128xf32>
    %189 = arith.negf %188 : vector<8x128xf32>
    %190 = math.exp %189 : vector<8x128xf32>
    %cst_35 = arith.constant 1.000000e+00 : f32
    %191 = vector.broadcast %cst_35 : f32 to vector<8x128xf32>
    %192 = arith.addf %191, %190 : vector<8x128xf32>
    %193 = arith.divf %191, %192 : vector<8x128xf32>
    %194 = vector.extract_strided_slice %162 {offsets = [0, 128], sizes = [8, 128], strides = [1, 1]} : vector<8x512xf32> to vector<8x128xf32>
    %195 = arith.negf %194 : vector<8x128xf32>
    %196 = math.exp %195 : vector<8x128xf32>
    %cst_36 = arith.constant 1.000000e+00 : f32
    %197 = vector.broadcast %cst_36 : f32 to vector<8x128xf32>
    %198 = arith.addf %197, %196 : vector<8x128xf32>
    %199 = arith.divf %197, %198 : vector<8x128xf32>
    %200 = vector.extract_strided_slice %162 {offsets = [0, 256], sizes = [8, 128], strides = [1, 1]} : vector<8x512xf32> to vector<8x128xf32>
    %201 = math.tanh %200 : vector<8x128xf32>
    %202 = vector.extract_strided_slice %162 {offsets = [0, 384], sizes = [8, 128], strides = [1, 1]} : vector<8x512xf32> to vector<8x128xf32>
    %203 = arith.negf %202 : vector<8x128xf32>
    %204 = math.exp %203 : vector<8x128xf32>
    %cst_37 = arith.constant 1.000000e+00 : f32
    %205 = vector.broadcast %cst_37 : f32 to vector<8x128xf32>
    %206 = arith.addf %205, %204 : vector<8x128xf32>
    %207 = arith.divf %205, %206 : vector<8x128xf32>
    %208 = arith.mulf %199, %150 : vector<8x128xf32>
    %209 = arith.mulf %193, %201 : vector<8x128xf32>
    %210 = arith.addf %208, %209 : vector<8x128xf32>
    %211 = math.tanh %210 : vector<8x128xf32>
    %212 = arith.mulf %207, %211 : vector<8x128xf32>
    %c4_i32 = arith.constant 4 : i32
    %213 = tpu.concatenate %187, %212 in 1 : vector<8x128xf32>, vector<8x128xf32> -> vector<8x256xf32>
    %214 = arith.truncf %213 : vector<8x256xf32> to vector<8x256xbf16>
    %cst_38 = arith.constant dense<0.000000e+00> : vector<8x1024xf32>
    %215 = tpu.matmul %214, %4, %cst_38 {dimension_numbers = #tpu.dot_dimension_numbers<[1], [0], [0], [1], [0, 0, 1, 1], [], []>} : vector<8x256xbf16>, vector<256x1024xbf16>, vector<8x1024xf32> -> vector<8x1024xf32>
    %216 = vector.extract_strided_slice %215 {offsets = [0, 0], sizes = [8, 512], strides = [1, 1]} : vector<8x1024xf32> to vector<8x512xf32>
    %217 = vector.extract_strided_slice %215 {offsets = [0, 512], sizes = [8, 512], strides = [1, 1]} : vector<8x1024xf32> to vector<8x512xf32>
    %218 = arith.index_cast %c4_i32 : i32 to index
    %c0_39 = arith.constant 0 : index
    %c0_40 = arith.constant 0 : index
    %219 = vector.load %arg1[%218, %c0_39, %c0_40] : memref<8x8x512xf32, #tpu.memory_space<vmem>>, vector<1x8x512xf32>
    %220 = vector.shape_cast %219 : vector<1x8x512xf32> to vector<8x512xf32>
    %221 = arith.addf %216, %220 : vector<8x512xf32>
    %222 = arith.addf %217, %2 : vector<8x512xf32>
    %223 = vector.extract_strided_slice %221 {offsets = [0, 0], sizes = [8, 128], strides = [1, 1]} : vector<8x512xf32> to vector<8x128xf32>
    %224 = arith.negf %223 : vector<8x128xf32>
    %225 = math.exp %224 : vector<8x128xf32>
    %cst_41 = arith.constant 1.000000e+00 : f32
    %226 = vector.broadcast %cst_41 : f32 to vector<8x128xf32>
    %227 = arith.addf %226, %225 : vector<8x128xf32>
    %228 = arith.divf %226, %227 : vector<8x128xf32>
    %229 = vector.extract_strided_slice %221 {offsets = [0, 128], sizes = [8, 128], strides = [1, 1]} : vector<8x512xf32> to vector<8x128xf32>
    %230 = arith.negf %229 : vector<8x128xf32>
    %231 = math.exp %230 : vector<8x128xf32>
    %cst_42 = arith.constant 1.000000e+00 : f32
    %232 = vector.broadcast %cst_42 : f32 to vector<8x128xf32>
    %233 = arith.addf %232, %231 : vector<8x128xf32>
    %234 = arith.divf %232, %233 : vector<8x128xf32>
    %235 = vector.extract_strided_slice %221 {offsets = [0, 256], sizes = [8, 128], strides = [1, 1]} : vector<8x512xf32> to vector<8x128xf32>
    %236 = math.tanh %235 : vector<8x128xf32>
    %237 = vector.extract_strided_slice %221 {offsets = [0, 384], sizes = [8, 128], strides = [1, 1]} : vector<8x512xf32> to vector<8x128xf32>
    %238 = arith.negf %237 : vector<8x128xf32>
    %239 = math.exp %238 : vector<8x128xf32>
    %cst_43 = arith.constant 1.000000e+00 : f32
    %240 = vector.broadcast %cst_43 : f32 to vector<8x128xf32>
    %241 = arith.addf %240, %239 : vector<8x128xf32>
    %242 = arith.divf %240, %241 : vector<8x128xf32>
    %243 = arith.mulf %234, %185 : vector<8x128xf32>
    %244 = arith.mulf %228, %236 : vector<8x128xf32>
    %245 = arith.addf %243, %244 : vector<8x128xf32>
    %246 = math.tanh %245 : vector<8x128xf32>
    %247 = arith.mulf %242, %246 : vector<8x128xf32>
    %248 = vector.extract_strided_slice %222 {offsets = [0, 0], sizes = [8, 128], strides = [1, 1]} : vector<8x512xf32> to vector<8x128xf32>
    %249 = arith.negf %248 : vector<8x128xf32>
    %250 = math.exp %249 : vector<8x128xf32>
    %cst_44 = arith.constant 1.000000e+00 : f32
    %251 = vector.broadcast %cst_44 : f32 to vector<8x128xf32>
    %252 = arith.addf %251, %250 : vector<8x128xf32>
    %253 = arith.divf %251, %252 : vector<8x128xf32>
    %254 = vector.extract_strided_slice %222 {offsets = [0, 128], sizes = [8, 128], strides = [1, 1]} : vector<8x512xf32> to vector<8x128xf32>
    %255 = arith.negf %254 : vector<8x128xf32>
    %256 = math.exp %255 : vector<8x128xf32>
    %cst_45 = arith.constant 1.000000e+00 : f32
    %257 = vector.broadcast %cst_45 : f32 to vector<8x128xf32>
    %258 = arith.addf %257, %256 : vector<8x128xf32>
    %259 = arith.divf %257, %258 : vector<8x128xf32>
    %260 = vector.extract_strided_slice %222 {offsets = [0, 256], sizes = [8, 128], strides = [1, 1]} : vector<8x512xf32> to vector<8x128xf32>
    %261 = math.tanh %260 : vector<8x128xf32>
    %262 = vector.extract_strided_slice %222 {offsets = [0, 384], sizes = [8, 128], strides = [1, 1]} : vector<8x512xf32> to vector<8x128xf32>
    %263 = arith.negf %262 : vector<8x128xf32>
    %264 = math.exp %263 : vector<8x128xf32>
    %cst_46 = arith.constant 1.000000e+00 : f32
    %265 = vector.broadcast %cst_46 : f32 to vector<8x128xf32>
    %266 = arith.addf %265, %264 : vector<8x128xf32>
    %267 = arith.divf %265, %266 : vector<8x128xf32>
    %268 = arith.mulf %259, %210 : vector<8x128xf32>
    %269 = arith.mulf %253, %261 : vector<8x128xf32>
    %270 = arith.addf %268, %269 : vector<8x128xf32>
    %271 = math.tanh %270 : vector<8x128xf32>
    %272 = arith.mulf %267, %271 : vector<8x128xf32>
    %c5_i32 = arith.constant 5 : i32
    %273 = tpu.concatenate %247, %272 in 1 : vector<8x128xf32>, vector<8x128xf32> -> vector<8x256xf32>
    %274 = arith.truncf %273 : vector<8x256xf32> to vector<8x256xbf16>
    %cst_47 = arith.constant dense<0.000000e+00> : vector<8x1024xf32>
    %275 = tpu.matmul %274, %4, %cst_47 {dimension_numbers = #tpu.dot_dimension_numbers<[1], [0], [0], [1], [0, 0, 1, 1], [], []>} : vector<8x256xbf16>, vector<256x1024xbf16>, vector<8x1024xf32> -> vector<8x1024xf32>
    %276 = vector.extract_strided_slice %275 {offsets = [0, 0], sizes = [8, 512], strides = [1, 1]} : vector<8x1024xf32> to vector<8x512xf32>
    %277 = vector.extract_strided_slice %275 {offsets = [0, 512], sizes = [8, 512], strides = [1, 1]} : vector<8x1024xf32> to vector<8x512xf32>
    %278 = arith.index_cast %c5_i32 : i32 to index
    %c0_48 = arith.constant 0 : index
    %c0_49 = arith.constant 0 : index
    %279 = vector.load %arg1[%278, %c0_48, %c0_49] : memref<8x8x512xf32, #tpu.memory_space<vmem>>, vector<1x8x512xf32>
    %280 = vector.shape_cast %279 : vector<1x8x512xf32> to vector<8x512xf32>
    %281 = arith.addf %276, %280 : vector<8x512xf32>
    %282 = arith.addf %277, %2 : vector<8x512xf32>
    %283 = vector.extract_strided_slice %281 {offsets = [0, 0], sizes = [8, 128], strides = [1, 1]} : vector<8x512xf32> to vector<8x128xf32>
    %284 = arith.negf %283 : vector<8x128xf32>
    %285 = math.exp %284 : vector<8x128xf32>
    %cst_50 = arith.constant 1.000000e+00 : f32
    %286 = vector.broadcast %cst_50 : f32 to vector<8x128xf32>
    %287 = arith.addf %286, %285 : vector<8x128xf32>
    %288 = arith.divf %286, %287 : vector<8x128xf32>
    %289 = vector.extract_strided_slice %281 {offsets = [0, 128], sizes = [8, 128], strides = [1, 1]} : vector<8x512xf32> to vector<8x128xf32>
    %290 = arith.negf %289 : vector<8x128xf32>
    %291 = math.exp %290 : vector<8x128xf32>
    %cst_51 = arith.constant 1.000000e+00 : f32
    %292 = vector.broadcast %cst_51 : f32 to vector<8x128xf32>
    %293 = arith.addf %292, %291 : vector<8x128xf32>
    %294 = arith.divf %292, %293 : vector<8x128xf32>
    %295 = vector.extract_strided_slice %281 {offsets = [0, 256], sizes = [8, 128], strides = [1, 1]} : vector<8x512xf32> to vector<8x128xf32>
    %296 = math.tanh %295 : vector<8x128xf32>
    %297 = vector.extract_strided_slice %281 {offsets = [0, 384], sizes = [8, 128], strides = [1, 1]} : vector<8x512xf32> to vector<8x128xf32>
    %298 = arith.negf %297 : vector<8x128xf32>
    %299 = math.exp %298 : vector<8x128xf32>
    %cst_52 = arith.constant 1.000000e+00 : f32
    %300 = vector.broadcast %cst_52 : f32 to vector<8x128xf32>
    %301 = arith.addf %300, %299 : vector<8x128xf32>
    %302 = arith.divf %300, %301 : vector<8x128xf32>
    %303 = arith.mulf %294, %245 : vector<8x128xf32>
    %304 = arith.mulf %288, %296 : vector<8x128xf32>
    %305 = arith.addf %303, %304 : vector<8x128xf32>
    %306 = math.tanh %305 : vector<8x128xf32>
    %307 = arith.mulf %302, %306 : vector<8x128xf32>
    %308 = vector.extract_strided_slice %282 {offsets = [0, 0], sizes = [8, 128], strides = [1, 1]} : vector<8x512xf32> to vector<8x128xf32>
    %309 = arith.negf %308 : vector<8x128xf32>
    %310 = math.exp %309 : vector<8x128xf32>
    %cst_53 = arith.constant 1.000000e+00 : f32
    %311 = vector.broadcast %cst_53 : f32 to vector<8x128xf32>
    %312 = arith.addf %311, %310 : vector<8x128xf32>
    %313 = arith.divf %311, %312 : vector<8x128xf32>
    %314 = vector.extract_strided_slice %282 {offsets = [0, 128], sizes = [8, 128], strides = [1, 1]} : vector<8x512xf32> to vector<8x128xf32>
    %315 = arith.negf %314 : vector<8x128xf32>
    %316 = math.exp %315 : vector<8x128xf32>
    %cst_54 = arith.constant 1.000000e+00 : f32
    %317 = vector.broadcast %cst_54 : f32 to vector<8x128xf32>
    %318 = arith.addf %317, %316 : vector<8x128xf32>
    %319 = arith.divf %317, %318 : vector<8x128xf32>
    %320 = vector.extract_strided_slice %282 {offsets = [0, 256], sizes = [8, 128], strides = [1, 1]} : vector<8x512xf32> to vector<8x128xf32>
    %321 = math.tanh %320 : vector<8x128xf32>
    %322 = vector.extract_strided_slice %282 {offsets = [0, 384], sizes = [8, 128], strides = [1, 1]} : vector<8x512xf32> to vector<8x128xf32>
    %323 = arith.negf %322 : vector<8x128xf32>
    %324 = math.exp %323 : vector<8x128xf32>
    %cst_55 = arith.constant 1.000000e+00 : f32
    %325 = vector.broadcast %cst_55 : f32 to vector<8x128xf32>
    %326 = arith.addf %325, %324 : vector<8x128xf32>
    %327 = arith.divf %325, %326 : vector<8x128xf32>
    %328 = arith.mulf %319, %270 : vector<8x128xf32>
    %329 = arith.mulf %313, %321 : vector<8x128xf32>
    %330 = arith.addf %328, %329 : vector<8x128xf32>
    %331 = math.tanh %330 : vector<8x128xf32>
    %332 = arith.mulf %327, %331 : vector<8x128xf32>
    %c6_i32 = arith.constant 6 : i32
    %333 = tpu.concatenate %307, %332 in 1 : vector<8x128xf32>, vector<8x128xf32> -> vector<8x256xf32>
    %334 = arith.truncf %333 : vector<8x256xf32> to vector<8x256xbf16>
    %cst_56 = arith.constant dense<0.000000e+00> : vector<8x1024xf32>
    %335 = tpu.matmul %334, %4, %cst_56 {dimension_numbers = #tpu.dot_dimension_numbers<[1], [0], [0], [1], [0, 0, 1, 1], [], []>} : vector<8x256xbf16>, vector<256x1024xbf16>, vector<8x1024xf32> -> vector<8x1024xf32>
    %336 = vector.extract_strided_slice %335 {offsets = [0, 0], sizes = [8, 512], strides = [1, 1]} : vector<8x1024xf32> to vector<8x512xf32>
    %337 = vector.extract_strided_slice %335 {offsets = [0, 512], sizes = [8, 512], strides = [1, 1]} : vector<8x1024xf32> to vector<8x512xf32>
    %338 = arith.index_cast %c6_i32 : i32 to index
    %c0_57 = arith.constant 0 : index
    %c0_58 = arith.constant 0 : index
    %339 = vector.load %arg1[%338, %c0_57, %c0_58] : memref<8x8x512xf32, #tpu.memory_space<vmem>>, vector<1x8x512xf32>
    %340 = vector.shape_cast %339 : vector<1x8x512xf32> to vector<8x512xf32>
    %341 = arith.addf %336, %340 : vector<8x512xf32>
    %342 = arith.addf %337, %2 : vector<8x512xf32>
    %343 = vector.extract_strided_slice %341 {offsets = [0, 0], sizes = [8, 128], strides = [1, 1]} : vector<8x512xf32> to vector<8x128xf32>
    %344 = arith.negf %343 : vector<8x128xf32>
    %345 = math.exp %344 : vector<8x128xf32>
    %cst_59 = arith.constant 1.000000e+00 : f32
    %346 = vector.broadcast %cst_59 : f32 to vector<8x128xf32>
    %347 = arith.addf %346, %345 : vector<8x128xf32>
    %348 = arith.divf %346, %347 : vector<8x128xf32>
    %349 = vector.extract_strided_slice %341 {offsets = [0, 128], sizes = [8, 128], strides = [1, 1]} : vector<8x512xf32> to vector<8x128xf32>
    %350 = arith.negf %349 : vector<8x128xf32>
    %351 = math.exp %350 : vector<8x128xf32>
    %cst_60 = arith.constant 1.000000e+00 : f32
    %352 = vector.broadcast %cst_60 : f32 to vector<8x128xf32>
    %353 = arith.addf %352, %351 : vector<8x128xf32>
    %354 = arith.divf %352, %353 : vector<8x128xf32>
    %355 = vector.extract_strided_slice %341 {offsets = [0, 256], sizes = [8, 128], strides = [1, 1]} : vector<8x512xf32> to vector<8x128xf32>
    %356 = math.tanh %355 : vector<8x128xf32>
    %357 = vector.extract_strided_slice %341 {offsets = [0, 384], sizes = [8, 128], strides = [1, 1]} : vector<8x512xf32> to vector<8x128xf32>
    %358 = arith.negf %357 : vector<8x128xf32>
    %359 = math.exp %358 : vector<8x128xf32>
    %cst_61 = arith.constant 1.000000e+00 : f32
    %360 = vector.broadcast %cst_61 : f32 to vector<8x128xf32>
    %361 = arith.addf %360, %359 : vector<8x128xf32>
    %362 = arith.divf %360, %361 : vector<8x128xf32>
    %363 = arith.mulf %354, %305 : vector<8x128xf32>
    %364 = arith.mulf %348, %356 : vector<8x128xf32>
    %365 = arith.addf %363, %364 : vector<8x128xf32>
    %366 = math.tanh %365 : vector<8x128xf32>
    %367 = arith.mulf %362, %366 : vector<8x128xf32>
    %368 = vector.extract_strided_slice %342 {offsets = [0, 0], sizes = [8, 128], strides = [1, 1]} : vector<8x512xf32> to vector<8x128xf32>
    %369 = arith.negf %368 : vector<8x128xf32>
    %370 = math.exp %369 : vector<8x128xf32>
    %cst_62 = arith.constant 1.000000e+00 : f32
    %371 = vector.broadcast %cst_62 : f32 to vector<8x128xf32>
    %372 = arith.addf %371, %370 : vector<8x128xf32>
    %373 = arith.divf %371, %372 : vector<8x128xf32>
    %374 = vector.extract_strided_slice %342 {offsets = [0, 128], sizes = [8, 128], strides = [1, 1]} : vector<8x512xf32> to vector<8x128xf32>
    %375 = arith.negf %374 : vector<8x128xf32>
    %376 = math.exp %375 : vector<8x128xf32>
    %cst_63 = arith.constant 1.000000e+00 : f32
    %377 = vector.broadcast %cst_63 : f32 to vector<8x128xf32>
    %378 = arith.addf %377, %376 : vector<8x128xf32>
    %379 = arith.divf %377, %378 : vector<8x128xf32>
    %380 = vector.extract_strided_slice %342 {offsets = [0, 256], sizes = [8, 128], strides = [1, 1]} : vector<8x512xf32> to vector<8x128xf32>
    %381 = math.tanh %380 : vector<8x128xf32>
    %382 = vector.extract_strided_slice %342 {offsets = [0, 384], sizes = [8, 128], strides = [1, 1]} : vector<8x512xf32> to vector<8x128xf32>
    %383 = arith.negf %382 : vector<8x128xf32>
    %384 = math.exp %383 : vector<8x128xf32>
    %cst_64 = arith.constant 1.000000e+00 : f32
    %385 = vector.broadcast %cst_64 : f32 to vector<8x128xf32>
    %386 = arith.addf %385, %384 : vector<8x128xf32>
    %387 = arith.divf %385, %386 : vector<8x128xf32>
    %388 = arith.mulf %379, %330 : vector<8x128xf32>
    %389 = arith.mulf %373, %381 : vector<8x128xf32>
    %390 = arith.addf %388, %389 : vector<8x128xf32>
    %391 = math.tanh %390 : vector<8x128xf32>
    %392 = arith.mulf %387, %391 : vector<8x128xf32>
    %c7_i32 = arith.constant 7 : i32
    %393 = tpu.concatenate %367, %392 in 1 : vector<8x128xf32>, vector<8x128xf32> -> vector<8x256xf32>
    %394 = arith.truncf %393 : vector<8x256xf32> to vector<8x256xbf16>
    %cst_65 = arith.constant dense<0.000000e+00> : vector<8x1024xf32>
    %395 = tpu.matmul %394, %4, %cst_65 {dimension_numbers = #tpu.dot_dimension_numbers<[1], [0], [0], [1], [0, 0, 1, 1], [], []>} : vector<8x256xbf16>, vector<256x1024xbf16>, vector<8x1024xf32> -> vector<8x1024xf32>
    %396 = vector.extract_strided_slice %395 {offsets = [0, 0], sizes = [8, 512], strides = [1, 1]} : vector<8x1024xf32> to vector<8x512xf32>
    %397 = vector.extract_strided_slice %395 {offsets = [0, 512], sizes = [8, 512], strides = [1, 1]} : vector<8x1024xf32> to vector<8x512xf32>
    %398 = arith.index_cast %c7_i32 : i32 to index
    %c0_66 = arith.constant 0 : index
    %c0_67 = arith.constant 0 : index
    %399 = vector.load %arg1[%398, %c0_66, %c0_67] : memref<8x8x512xf32, #tpu.memory_space<vmem>>, vector<1x8x512xf32>
    %400 = vector.shape_cast %399 : vector<1x8x512xf32> to vector<8x512xf32>
    %401 = arith.addf %396, %400 : vector<8x512xf32>
    %402 = arith.addf %397, %2 : vector<8x512xf32>
    %403 = vector.extract_strided_slice %401 {offsets = [0, 0], sizes = [8, 128], strides = [1, 1]} : vector<8x512xf32> to vector<8x128xf32>
    %404 = arith.negf %403 : vector<8x128xf32>
    %405 = math.exp %404 : vector<8x128xf32>
    %cst_68 = arith.constant 1.000000e+00 : f32
    %406 = vector.broadcast %cst_68 : f32 to vector<8x128xf32>
    %407 = arith.addf %406, %405 : vector<8x128xf32>
    %408 = arith.divf %406, %407 : vector<8x128xf32>
    %409 = vector.extract_strided_slice %401 {offsets = [0, 128], sizes = [8, 128], strides = [1, 1]} : vector<8x512xf32> to vector<8x128xf32>
    %410 = arith.negf %409 : vector<8x128xf32>
    %411 = math.exp %410 : vector<8x128xf32>
    %cst_69 = arith.constant 1.000000e+00 : f32
    %412 = vector.broadcast %cst_69 : f32 to vector<8x128xf32>
    %413 = arith.addf %412, %411 : vector<8x128xf32>
    %414 = arith.divf %412, %413 : vector<8x128xf32>
    %415 = vector.extract_strided_slice %401 {offsets = [0, 256], sizes = [8, 128], strides = [1, 1]} : vector<8x512xf32> to vector<8x128xf32>
    %416 = math.tanh %415 : vector<8x128xf32>
    %417 = vector.extract_strided_slice %401 {offsets = [0, 384], sizes = [8, 128], strides = [1, 1]} : vector<8x512xf32> to vector<8x128xf32>
    %418 = arith.negf %417 : vector<8x128xf32>
    %419 = math.exp %418 : vector<8x128xf32>
    %cst_70 = arith.constant 1.000000e+00 : f32
    %420 = vector.broadcast %cst_70 : f32 to vector<8x128xf32>
    %421 = arith.addf %420, %419 : vector<8x128xf32>
    %422 = arith.divf %420, %421 : vector<8x128xf32>
    %423 = arith.mulf %414, %365 : vector<8x128xf32>
    %424 = arith.mulf %408, %416 : vector<8x128xf32>
    %425 = arith.addf %423, %424 : vector<8x128xf32>
    %426 = math.tanh %425 : vector<8x128xf32>
    %427 = arith.mulf %422, %426 : vector<8x128xf32>
    %428 = vector.extract_strided_slice %402 {offsets = [0, 0], sizes = [8, 128], strides = [1, 1]} : vector<8x512xf32> to vector<8x128xf32>
    %429 = arith.negf %428 : vector<8x128xf32>
    %430 = math.exp %429 : vector<8x128xf32>
    %cst_71 = arith.constant 1.000000e+00 : f32
    %431 = vector.broadcast %cst_71 : f32 to vector<8x128xf32>
    %432 = arith.addf %431, %430 : vector<8x128xf32>
    %433 = arith.divf %431, %432 : vector<8x128xf32>
    %434 = vector.extract_strided_slice %402 {offsets = [0, 128], sizes = [8, 128], strides = [1, 1]} : vector<8x512xf32> to vector<8x128xf32>
    %435 = arith.negf %434 : vector<8x128xf32>
    %436 = math.exp %435 : vector<8x128xf32>
    %cst_72 = arith.constant 1.000000e+00 : f32
    %437 = vector.broadcast %cst_72 : f32 to vector<8x128xf32>
    %438 = arith.addf %437, %436 : vector<8x128xf32>
    %439 = arith.divf %437, %438 : vector<8x128xf32>
    %440 = vector.extract_strided_slice %402 {offsets = [0, 256], sizes = [8, 128], strides = [1, 1]} : vector<8x512xf32> to vector<8x128xf32>
    %441 = math.tanh %440 : vector<8x128xf32>
    %442 = vector.extract_strided_slice %402 {offsets = [0, 384], sizes = [8, 128], strides = [1, 1]} : vector<8x512xf32> to vector<8x128xf32>
    %443 = arith.negf %442 : vector<8x128xf32>
    %444 = math.exp %443 : vector<8x128xf32>
    %cst_73 = arith.constant 1.000000e+00 : f32
    %445 = vector.broadcast %cst_73 : f32 to vector<8x128xf32>
    %446 = arith.addf %445, %444 : vector<8x128xf32>
    %447 = arith.divf %445, %446 : vector<8x128xf32>
    %448 = arith.mulf %439, %390 : vector<8x128xf32>
    %449 = arith.mulf %433, %441 : vector<8x128xf32>
    %450 = arith.addf %448, %449 : vector<8x128xf32>
    %451 = math.tanh %450 : vector<8x128xf32>
    %452 = arith.mulf %447, %451 : vector<8x128xf32>
    %c7_i32_74 = arith.constant 7 : i32
    %453 = tpu.concatenate %427, %452 in 1 : vector<8x128xf32>, vector<8x128xf32> -> vector<8x256xf32>
    %454 = arith.truncf %453 : vector<8x256xf32> to vector<8x256xbf16>
    %455 = vector.extract_strided_slice %4 {offsets = [0, 512], sizes = [256, 512], strides = [1, 1]} : vector<256x1024xbf16> to vector<256x512xbf16>
    %cst_75 = arith.constant dense<0.000000e+00> : vector<8x512xf32>
    %456 = tpu.matmul %454, %455, %cst_75 {dimension_numbers = #tpu.dot_dimension_numbers<[1], [0], [0], [1], [0, 0, 1, 1], [], []>} : vector<8x256xbf16>, vector<256x512xbf16>, vector<8x512xf32> -> vector<8x512xf32>
    %457 = arith.addf %456, %2 : vector<8x512xf32>
    %458 = vector.extract_strided_slice %457 {offsets = [0, 0], sizes = [8, 128], strides = [1, 1]} : vector<8x512xf32> to vector<8x128xf32>
    %459 = arith.negf %458 : vector<8x128xf32>
    %460 = math.exp %459 : vector<8x128xf32>
    %cst_76 = arith.constant 1.000000e+00 : f32
    %461 = vector.broadcast %cst_76 : f32 to vector<8x128xf32>
    %462 = arith.addf %461, %460 : vector<8x128xf32>
    %463 = arith.divf %461, %462 : vector<8x128xf32>
    %464 = vector.extract_strided_slice %457 {offsets = [0, 128], sizes = [8, 128], strides = [1, 1]} : vector<8x512xf32> to vector<8x128xf32>
    %465 = arith.negf %464 : vector<8x128xf32>
    %466 = math.exp %465 : vector<8x128xf32>
    %cst_77 = arith.constant 1.000000e+00 : f32
    %467 = vector.broadcast %cst_77 : f32 to vector<8x128xf32>
    %468 = arith.addf %467, %466 : vector<8x128xf32>
    %469 = arith.divf %467, %468 : vector<8x128xf32>
    %470 = vector.extract_strided_slice %457 {offsets = [0, 256], sizes = [8, 128], strides = [1, 1]} : vector<8x512xf32> to vector<8x128xf32>
    %471 = math.tanh %470 : vector<8x128xf32>
    %472 = vector.extract_strided_slice %457 {offsets = [0, 384], sizes = [8, 128], strides = [1, 1]} : vector<8x512xf32> to vector<8x128xf32>
    %473 = arith.negf %472 : vector<8x128xf32>
    %474 = math.exp %473 : vector<8x128xf32>
    %cst_78 = arith.constant 1.000000e+00 : f32
    %475 = vector.broadcast %cst_78 : f32 to vector<8x128xf32>
    %476 = arith.addf %475, %474 : vector<8x128xf32>
    %477 = arith.divf %475, %476 : vector<8x128xf32>
    %478 = arith.mulf %469, %450 : vector<8x128xf32>
    %479 = arith.mulf %463, %471 : vector<8x128xf32>
    %480 = arith.addf %478, %479 : vector<8x128xf32>
    %481 = math.tanh %480 : vector<8x128xf32>
    %482 = arith.mulf %477, %481 : vector<8x128xf32>
    %483 = vector.broadcast %3 : vector<1x128xf32> to vector<8x128xf32>
    %484 = arith.mulf %482, %483 : vector<8x128xf32>
    %cst_79 = arith.constant dense<0.000000e+00> : vector<8xf32>
    %485 = vector.multi_reduction <add>, %484, %cst_79 [1] : vector<8x128xf32> to vector<8xf32>
    %486 = vector.shape_cast %485 : vector<8xf32> to vector<8x1xf32>
    %c0_80 = arith.constant 0 : index
    %c0_81 = arith.constant 0 : index
    %487 = vector.load %arg5[%c0_80, %c0_81] : memref<1x1xf32, #tpu.memory_space<vmem>>, vector<1x1xf32>
    %488 = vector.broadcast %487 : vector<1x1xf32> to vector<8x1xf32>
    %489 = arith.addf %486, %488 : vector<8x1xf32>
    %c0_82 = arith.constant 0 : index
    %c0_83 = arith.constant 0 : index
    %490 = vector.load %arg6[%c0_82, %c0_83] : memref<8x1xf32, #tpu.memory_space<vmem>>, vector<8x1xf32>
    tpu.vector_store %arg6[%c0_82, %c0_83], %489 {strides = array<i32>} : memref<8x1xf32, #tpu.memory_space<vmem>>, vector<8x1xf32>,
    return
  }
  func.func @transform_0(%arg0: i32) -> (i32, i32, i32) {
    %c0_i32 = arith.constant 0 : i32
    %c0_i32_0 = arith.constant 0 : i32
    %c0_i32_1 = arith.constant 0 : i32
    return %c0_i32, %arg0, %c0_i32_0 : i32, i32, i32
  }
  func.func @transform_1(%arg0: i32) -> (i32, i32) {
    %c0_i32 = arith.constant 0 : i32
    %c0_i32_0 = arith.constant 0 : i32
    %c0_i32_1 = arith.constant 0 : i32
    return %c0_i32, %c0_i32_0 : i32, i32
  }
  func.func @transform_2(%arg0: i32) -> (i32, i32) {
    %c0_i32 = arith.constant 0 : i32
    %c0_i32_0 = arith.constant 0 : i32
    %c0_i32_1 = arith.constant 0 : i32
    return %c0_i32, %c0_i32_0 : i32, i32
  }
  func.func @transform_3(%arg0: i32) -> (i32, i32) {
    %c0_i32 = arith.constant 0 : i32
    %c0_i32_0 = arith.constant 0 : i32
    %c0_i32_1 = arith.constant 0 : i32
    return %c0_i32, %c0_i32_0 : i32, i32
  }
  func.func @transform_4(%arg0: i32) -> (i32, i32) {
    %c0_i32 = arith.constant 0 : i32
    %c0_i32_0 = arith.constant 0 : i32
    %c0_i32_1 = arith.constant 0 : i32
    return %c0_i32, %c0_i32_0 : i32, i32
  }
  func.func @transform_5(%arg0: i32) -> (i32, i32) {
    %c0_i32 = arith.constant 0 : i32
    %c0_i32_0 = arith.constant 0 : i32
    return %arg0, %c0_i32 : i32, i32
  }
}

</mosaic_0001>

<bundles_post_ra>
// kernel: _forward_impl.1
= control target key start
LH: loop header
LB: loop body
LE: loop exit
PB: predicated region body
PF: predicated region fallthrough
CT: control target
= control target key end

     0   :  { %s4574_s0 = inlined_call_operand.vmem [shape: f32[8,8,512], index: 0, kind: input, shape index: {}]   ;;  %s4575_s1 = inlined_call_operand.hbm [shape: bf16[256,1024], index: 1, kind: input, shape index: {}]   ;;  %s4576_s2 = inlined_call_operand.vmem [shape: f32[1,512], index: 2, kind: input, shape index: {}]   ;;  %s4577_s3 = inlined_call_operand.vmem [shape: f32[1,128], index: 3, kind: input, shape index: {}]   ;;  %s4578_s4 = inlined_call_operand.<no memory space> [shape: f32[1,1], index: 4, kind: input, shape index: {}]   ;;  %s4579_s5 = inlined_call_operand.vmem [shape: f32[8,1], index: 5, kind: output, shape index: {}]  }
   0x1   :  { %v10_v0 = vstv %s4578_s4 }
   0x2   :  { %11 = vst [vmem:[#allocation2] sm:$0x1] %v10_v0 }
   0x3   :  { %12 = vsyncpa [#allocation4], 0  ;;  %s3066_s20 = smov [#allocation3]   ;;  %s3042_s24 = scalar_lea.hbm %s4575_s1, 16384 }
   0x4   :  { %s20_s21 = sshll.u32 %s3066_s20, 4  ;;  %p3043_p0 = scmp.ne.s32.totalorder %s4575_s1, %s3042_s24  ;;  %s21_s21 = int_to_ptr.vmem [resolvable:$true] %s20_s21 }
   0x5   :  { %p3046_p1 = scmp.lt.u32.totalorder %s3042_s24, %s4575_s1 }
   0x7   :  { %p3048_p2 = pnand %p3046_p1, %p3043_p0 }
   0x9   :  { %3051 = shalt.err (!%p3048_p2)
}
   0xa   :  { %s3052_s4 = scalar_lea.vmem %s21_s21, 16384  ;;  %p3057_p4 = scmp.lt.s32.totalorder %s21_s21, %s21_s21 }
   0xb   :  { %p3053_p3 = scmp.ne.s32.totalorder %s21_s21, %s3052_s4  ;;  %p3058_p5 = scmp.lt.s32.totalorder %s3052_s4, %s3052_s4 }
   0xd   :  { %p3059_p6 = por %p3058_p5, %p3057_p4 }
   0xf   :  { %p3060_p7 = pnand %p3059_p6, %p3053_p3 }
  0x11   :  { %3063 = shalt.err (!%p3060_p7)
}
  0x12   :  { %s3067_s29 = smov 512   ;;  %s3068_s30 = smov 32  }
  0x13   :  { %26 = dma.hbm_to_vmem [thread:$0]  %s4575_s1, 16384, %s21_s21, [#allocation4], %s3067_s29, %s3067_s29, %s3068_s30  }
  0x14   :  { %3064 = dma.done.wait [#allocation4], 16384  }
  0x15   :  { %3065 = vsyncadd [#allocation4], 4294950912  ;;  %v4580_v1 = vmov 0.0|0.0   ;;  %v59_v2 = vld [vmem:[#allocation3] sm:$0xff]  ;;  %v60_v11 = vld [vmem:[#allocation3 + $0x8] sm:$0xff]  ;;  %vm2569_vm0 = vcmask 7168  }
  0x16   :  { %889 = vmatprep.mubr.bf16.mxu0 %v4580_v1  ;;  %930 = vmatprep.mubr.bf16.mxu1 %v4580_v1  ;;  %v63_v3 = vld [vmem:[#allocation3 + $0x20] sm:$0xff]  ;;  %v64_v12 = vld [vmem:[#allocation3 + $0x28] sm:$0xff] }
  0x17   :  { %v67_v4 = vld [vmem:[#allocation3 + $0x40] sm:$0xff]  ;;  %v3117_v5 = vcombine.high %v59_v2, %v63_v3  ;;  %v3119_v6 = vcombine.low %v59_v2, %v63_v3  ;;  %v3127_v14 = vcombine.high %v60_v11, %v64_v12  ;;  %v3129_v15 = vcombine.low %v60_v11, %v64_v12  ;;  %v68_v16 = vld [vmem:[#allocation3 + $0x48] sm:$0xff]  ;;  %v190_v3 = vld [vmem:[%s4574_s0 + $0x18] sm:$0xff] }
  0x18   :  { %v71_v7 = vld [vmem:[#allocation3 + $0x60] sm:$0xff]  ;;  %v72_v17 = vld [vmem:[#allocation3 + $0x68] sm:$0xff]  ;;  %v2578_v12 = vmul.f32 -1.442695, %v190_v3 }
  0x19   :  { %4860 = vst [vmem:[#allocation6_spill] sm:$0xff] %v3117_v5  ;;  %4861 = vst [vmem:[#allocation7_spill] sm:$0xff] %v3119_v6  ;;  %v3121_v8 = vcombine.high %v67_v4, %v71_v7  ;;  %v75_v9 = vld [vmem:[#allocation3 + $0x80] sm:$0xff]  ;;  %857 = vmatprep.subr.bf16.mxu0 %v3117_v5  ;;  %v3125_v13 = vcombine.low %v67_v4, %v71_v7  ;;  %v3134_v19 = vcombine.high %v68_v16, %v72_v17  ;;  %v76_v20 = vld [vmem:[#allocation3 + $0x88] sm:$0xff] }
  0x1a   :  { %v79_v10 = vld [vmem:[#allocation3 + $0xa0] sm:$0xff]  ;;  %858 = vmatpush1.bf16.msra.mxu0 %v3119_v6  ;;  %4864 = vst [vmem:[#allocation10_spill] sm:$0xff] %v3127_v14  ;;  %4865 = vst [vmem:[#allocation11_spill] sm:$0xff] %v3129_v15  ;;  %v80_v21 = vld [vmem:[#allocation3 + $0xa8] sm:$0xff]  ;;  %898 = vmatprep.subr.bf16.mxu1 %v3127_v14  ;;  %v3138_v24 = vcombine.low %v68_v16, %v72_v17 }
  0x1b   :  { %4862 = vst [vmem:[#allocation8_spill] sm:$0xff] %v3121_v8  ;;  %4863 = vst [vmem:[#allocation9_spill] sm:$0xff] %v3125_v13  ;;  %859 = vmatprep.subr.bf16.mxu0 %v3121_v8  ;;  %v3132_v18 = vcombine.high %v75_v9, %v79_v10  ;;  %v83_v22 = vld [vmem:[#allocation3 + $0xc0] sm:$0xff]  ;;  %899 = vmatpush1.bf16.msra.mxu1 %v3129_v15  ;;  %v3141_v25 = vcombine.low %v75_v9, %v79_v10  ;;  %v84_v28 = vld [vmem:[#allocation3 + $0xc8] sm:$0xff] }
  0x1c   :  { %4867 = vst [vmem:[#allocation13_spill] sm:$0xff] %v3134_v19  ;;  %v87_v23 = vld [vmem:[#allocation3 + $0xe0] sm:$0xff]  ;;  %4868 = vst [vmem:[#allocation14_spill] sm:$0xff] %v3138_v24  ;;  %900 = vmatprep.subr.bf16.mxu1 %v3134_v19  ;;  %v3144_v26 = vcombine.high %v76_v20, %v80_v21  ;;  %v88_v29 = vld [vmem:[#allocation3 + $0xe8] sm:$0xff]  ;;  %v3150_v32 = vcombine.low %v76_v20, %v80_v21 }
  0x1d   :  { %4866 = vst [vmem:[#allocation12_spill] sm:$0xff] %v3132_v18  ;;  %4869 = vst [vmem:[#allocation15_spill] sm:$0xff] %v3141_v25  ;;  %v3147_v27 = vcombine.high %v83_v22, %v87_v23  ;;  %v91_v30 = vld [vmem:[#allocation3 + $0x100] sm:$0xff]  ;;  %v3153_v33 = vcombine.low %v83_v22, %v87_v23  ;;  %v3156_v34 = vcombine.high %v84_v28, %v88_v29  ;;  %v92_v36 = vld [vmem:[#allocation3 + $0x108] sm:$0xff] }
  0x1e   :  { %860 = vmatpush1.bf16.msra.mxu0 %v3125_v13  ;;  %4870 = vst [vmem:[#allocation16_spill] sm:$0xff] %v3144_v26  ;;  %v95_v31 = vld [vmem:[#allocation3 + $0x120] sm:$0xff]  ;;  %4872 = vst [vmem:[#allocation18_spill] sm:$0xff] %v3150_v32  ;;  %v96_v37 = vld [vmem:[#allocation3 + $0x128] sm:$0xff]  ;;  %v3162_v40 = vcombine.low %v84_v28, %v88_v29 }
  0x1f   :  { %861 = vmatprep.subr.bf16.mxu0 %v3132_v18  ;;  %4871 = vst [vmem:[#allocation17_spill] sm:$0xff] %v3147_v27  ;;  %901 = vmatpush1.bf16.msra.mxu1 %v3138_v24  ;;  %4873 = vst [vmem:[#allocation19_spill] sm:$0xff] %v3153_v33  ;;  %v3159_v35 = vcombine.high %v91_v30, %v95_v31  ;;  %v99_v38 = vld [vmem:[#allocation3 + $0x140] sm:$0xff]  ;;  %v3165_v41 = vcombine.low %v91_v30, %v95_v31  ;;  %v100_v44 = vld [vmem:[#allocation3 + $0x148] sm:$0xff] }
  0x20   :  { %902 = vmatprep.subr.bf16.mxu1 %v3144_v26  ;;  %4874 = vst [vmem:[#allocation20_spill] sm:$0xff] %v3156_v34  ;;  %v103_v39 = vld [vmem:[#allocation3 + $0x160] sm:$0xff]  ;;  %4876 = vst [vmem:[#allocation22_spill] sm:$0xff] %v3162_v40  ;;  %v3168_v42 = vcombine.high %v92_v36, %v96_v37  ;;  %v104_v45 = vld [vmem:[#allocation3 + $0x168] sm:$0xff]  ;;  %v3174_v48 = vcombine.low %v92_v36, %v96_v37 }
  0x21   :  { %4875 = vst [vmem:[#allocation21_spill] sm:$0xff] %v3159_v35  ;;  %4877 = vst [vmem:[#allocation23_spill] sm:$0xff] %v3165_v41  ;;  %v3171_v43 = vcombine.high %v99_v38, %v103_v39  ;;  %v107_v46 = vld [vmem:[#allocation3 + $0x180] sm:$0xff]  ;;  %v3183_v51 = vcombine.low %v99_v38, %v103_v39  ;;  %v3186_v52 = vcombine.high %v100_v44, %v104_v45  ;;  %v108_v56 = vld [vmem:[#allocation3 + $0x188] sm:$0xff] }
  0x22   :  { %862 = vmatpush1.bf16.msra.mxu0 %v3141_v25  ;;  %4878 = vst [vmem:[#allocation24_spill] sm:$0xff] %v3168_v42  ;;  %v111_v47 = vld [vmem:[#allocation3 + $0x1a0] sm:$0xff]  ;;  %4880 = vst [vmem:[#allocation26_spill] sm:$0xff] %v3174_v48  ;;  %v112_v57 = vld [vmem:[#allocation3 + $0x1a8] sm:$0xff]  ;;  %v3192_v60 = vcombine.low %v100_v44, %v104_v45 }
  0x23   :  { %863 = vmatprep.subr.bf16.mxu0 %v3147_v27  ;;  %903 = vmatpush1.bf16.msra.mxu1 %v3150_v32  ;;  %4879 = vst [vmem:[#allocation25_spill] sm:$0xff] %v3171_v43  ;;  %v187_v49 = vld [vmem:[%s4574_s0] sm:$0xff]  ;;  %v188_v50 = vld [vmem:[%s4574_s0 + $0x8] sm:$0xff]  ;;  %4881 = vst [vmem:[#allocation27_spill] sm:$0xff] %v3183_v51  ;;  %v3189_v55 = vcombine.high %v107_v46, %v111_v47  ;;  %v3195_v61 = vcombine.low %v107_v46, %v111_v47 }
  0x24   :  { %904 = vmatprep.subr.bf16.mxu1 %v3156_v34  ;;  %4882 = vst [vmem:[#allocation28_spill] sm:$0xff] %v3186_v52  ;;  %v2576_v53 = vmul.f32 -1.442695, %v187_v49  ;;  %v2577_v54 = vmul.f32 -1.442695, %v188_v50  ;;  %v115_v58 = vld [vmem:[#allocation3 + $0x1c0] sm:$0xff]  ;;  %v3198_v62 = vcombine.high %v108_v56, %v112_v57  ;;  %v3207_v9 = vcombine.low %v108_v56, %v112_v57 }
  0x25   :  { %4883 = vst [vmem:[#allocation29_spill] sm:$0xff] %v3189_v55  ;;  %v119_v59 = vld [vmem:[#allocation3 + $0x1e0] sm:$0xff]  ;;  %4884 = vst [vmem:[#allocation30_spill] sm:$0xff] %v3192_v60  ;;  %v116_v0 = vld [vmem:[#allocation3 + $0x1c8] sm:$0xff] }
  0x26   :  { %864 = vmatpush1.bf16.msra.mxu0 %v3153_v33  ;;  %2786 = vpow2.f32 %v2576_v53  ;;  %4885 = vst [vmem:[#allocation31_spill] sm:$0xff] %v3195_v61  ;;  %4886 = vst [vmem:[#allocation32_spill] sm:$0xff] %v3198_v62  ;;  %v3201_v63 = vcombine.high %v115_v58, %v119_v59  ;;  %v120_v2 = vld [vmem:[#allocation3 + $0x1e8] sm:$0xff]  ;;  %v123_v4 = vld [vmem:[#allocation3 + $0x200] sm:$0xff]  ;;  %v3210_v10 = vcombine.low %v115_v58, %v119_v59 }
  0x27   :  { %865 = vmatprep.subr.bf16.mxu0 %v3159_v35  ;;  %905 = vmatpush1.bf16.msra.mxu1 %v3162_v40  ;;  %2788 = vpow2.f32 %v2577_v54  ;;  %v127_v7 = vld [vmem:[#allocation3 + $0x220] sm:$0xff]  ;;  %4888 = vst [vmem:[#allocation34_spill] sm:$0xff] %v3207_v9  ;;  %v3213_v11 = vcombine.high %v116_v0, %v120_v2  ;;  %v124_v17 = vld [vmem:[#allocation3 + $0x208] sm:$0xff]  ;;  %v3222_v28 = vcombine.low %v116_v0, %v120_v2 }
  0x28   :  { %906 = vmatprep.subr.bf16.mxu1 %v3168_v42  ;;  %4887 = vst [vmem:[#allocation33_spill] sm:$0xff] %v3201_v63  ;;  %4889 = vst [vmem:[#allocation35_spill] sm:$0xff] %v3210_v10  ;;  %v3216_v16 = vcombine.high %v123_v4, %v127_v7  ;;  %v128_v20 = vld [vmem:[#allocation3 + $0x228] sm:$0xff]  ;;  %v131_v21 = vld [vmem:[#allocation3 + $0x240] sm:$0xff]  ;;  %v3225_v30 = vcombine.low %v123_v4, %v127_v7  ;;  %2790 = vpow2.f32 %v2578_v12 }
  0x29   :  { %4890 = vst [vmem:[#allocation36_spill] sm:$0xff] %v3213_v11  ;;  %v135_v22 = vld [vmem:[#allocation3 + $0x260] sm:$0xff]  ;;  %v189_v23 = vld [vmem:[%s4574_s0 + $0x10] sm:$0xff]  ;;  %4892 = vst [vmem:[#allocation38_spill] sm:$0xff] %v3222_v28  ;;  %v3228_v31 = vcombine.high %v124_v17, %v128_v20  ;;  %v3234_v49 = vcombine.low %v124_v17, %v128_v20 }
  0x2a   :  { %866 = vmatpush1.bf16.msra.mxu0 %v3165_v41  ;;  %4891 = vst [vmem:[#allocation37_spill] sm:$0xff] %v3216_v16  ;;  %4893 = vst [vmem:[#allocation39_spill] sm:$0xff] %v3225_v30  ;;  %v3231_v37 = vcombine.high %v131_v21, %v135_v22  ;;  %v132_v38 = vld [vmem:[#allocation3 + $0x248] sm:$0xff]  ;;  %2792 = vtanh.f32 %v189_v23  ;;  %v139_v45 = vld [vmem:[#allocation3 + $0x280] sm:$0xff]  ;;  %v3237_v50 = vcombine.low %v131_v21, %v135_v22 }
  0x2b   :  { %867 = vmatprep.subr.bf16.mxu0 %v3171_v43  ;;  %907 = vmatpush1.bf16.msra.mxu1 %v3174_v48  ;;  %4894 = vst [vmem:[#allocation40_spill] sm:$0xff] %v3228_v31  ;;  %v136_v39 = vld [vmem:[#allocation3 + $0x268] sm:$0xff]  ;;  %v143_v46 = vld [vmem:[#allocation3 + $0x2a0] sm:$0xff]  ;;  %4896 = vst [vmem:[#allocation42_spill] sm:$0xff] %v3234_v49 }
  0x2c   :  { %908 = vmatprep.subr.bf16.mxu1 %v3186_v52  ;;  %4895 = vst [vmem:[#allocation41_spill] sm:$0xff] %v3231_v37  ;;  %4897 = vst [vmem:[#allocation43_spill] sm:$0xff] %v3237_v50  ;;  %v3240_v53 = vcombine.high %v132_v38, %v136_v39  ;;  %v3243_v54 = vcombine.high %v139_v45, %v143_v46  ;;  %v140_v56 = vld [vmem:[#allocation3 + $0x288] sm:$0xff]  ;;  %v147_v58 = vld [vmem:[#allocation3 + $0x2c0] sm:$0xff]  ;;  %v3246_v0 = vcombine.low %v132_v38, %v136_v39 }
  0x2d   :  { %v144_v57 = vld [vmem:[#allocation3 + $0x2a8] sm:$0xff]  ;;  %v151_v59 = vld [vmem:[#allocation3 + $0x2e0] sm:$0xff]  ;;  %v3249_v2 = vcombine.low %v139_v45, %v143_v46 }
  0x2e   :  { %868 = vmatpush1.bf16.msra.mxu0 %v3183_v51  ;;  %4898 = vst [vmem:[#allocation44_spill] sm:$0xff] %v3240_v53  ;;  %4899 = vst [vmem:[#allocation45_spill] sm:$0xff] %v3243_v54  ;;  %v3252_v3 = vcombine.high %v140_v56, %v144_v57  ;;  %v3255_v4 = vcombine.high %v147_v58, %v151_v59  ;;  %v148_v7 = vld [vmem:[#allocation3 + $0x2c8] sm:$0xff]  ;;  %v155_v20 = vld [vmem:[#allocation3 + $0x300] sm:$0xff]  ;;  %v3258_v23 = vcombine.low %v140_v56, %v144_v57 }
  0x2f   :  { %869 = vmatprep.subr.bf16.mxu0 %v3189_v55  ;;  %909 = vmatpush1.bf16.msra.mxu1 %v3192_v60  ;;  %4900 = vst [vmem:[#allocation46_spill] sm:$0xff] %v3246_v0  ;;  %4901 = vst [vmem:[#allocation47_spill] sm:$0xff] %v3249_v2  ;;  %v152_v12 = vld [vmem:[#allocation3 + $0x2e8] sm:$0xff]  ;;  %v159_v21 = vld [vmem:[#allocation3 + $0x320] sm:$0xff] }
  0x30   :  { %910 = vmatprep.subr.bf16.mxu1 %v3198_v62  ;;  %v2787_v29 = vpop.eup %2786  ;;  %4902 = vst [vmem:[#allocation48_spill] sm:$0xff] %v3252_v3  ;;  %4903 = vst [vmem:[#allocation49_spill] sm:$0xff] %v3255_v4  ;;  %v3267_v39 = vcombine.high %v155_v20, %v159_v21  ;;  %v160_v45 = vld [vmem:[#allocation3 + $0x328] sm:$0xff]  ;;  %v163_v1 = vld [vmem:[#allocation3 + $0x340] sm:$0xff] }
  0x31   :  { %v2789_v36 = vpop.eup %2788  ;;  %v194_v44 = vadd.f32 1.0, %v2787_v29  ;;  %4904 = vst [vmem:[#allocation50_spill] sm:$0xff] %v3258_v23  ;;  %v3261_v29 = vcombine.low %v147_v58, %v151_v59  ;;  %v167_v56 = vld [vmem:[#allocation3 + $0x360] sm:$0xff]  ;;  %v3270_v58 = vcombine.low %v148_v7, %v152_v12 }
  0x32   :  { %870 = vmatpush1.bf16.msra.mxu0 %v3195_v61  ;;  %v200_v47 = vadd.f32 1.0, %v2789_v36  ;;  %v2791_v17 = vpop.eup %2790  ;;  %v3264_v36 = vcombine.high %v148_v7, %v152_v12  ;;  %4907 = vst [vmem:[#allocation53_spill] sm:$0xff] %v3267_v39  ;;  %v171_v7 = vld [vmem:[#allocation3 + $0x380] sm:$0xff] }
  0x33   :  { %871 = vmatprep.subr.bf16.mxu0 %v3201_v63  ;;  %911 = vmatpush1.bf16.msra.mxu1 %v3207_v9  ;;  %2794 = vrcp.f32 %v194_v44  ;;  %4905 = vst [vmem:[#allocation51_spill] sm:$0xff] %v3261_v29  ;;  %v156_v44 = vld [vmem:[#allocation3 + $0x308] sm:$0xff]  ;;  %v207_v46 = vadd.f32 1.0, %v2791_v17  ;;  %4908 = vst [vmem:[#allocation54_spill] sm:$0xff] %v3270_v58  ;;  %v3279_v17 = vcombine.high %v163_v1, %v167_v56  ;;  %v175_v12 = vld [vmem:[#allocation3 + $0x3a0] sm:$0xff] }
  0x34   :  { %912 = vmatprep.subr.bf16.mxu1 %v3213_v11  ;;  %2796 = vrcp.f32 %v200_v47  ;;  %v2793_v22 = vpop.eup %2792  ;;  %4906 = vst [vmem:[#allocation52_spill] sm:$0xff] %v3264_v36 }
  0x35   :  { %4911 = vst [vmem:[#allocation57_spill] sm:$0xff] %v3279_v17  ;;  %2798 = vrcp.f32 %v207_v46  ;;  %v3294_v46 = vcombine.high %v171_v7, %v175_v12 }
  0x36   :  { %872 = vmatpush1.bf16.msra.mxu0 %v3210_v10 }
  0x37   :  { %873 = vmatprep.subr.bf16.mxu0 %v3216_v16  ;;  %913 = vmatpush1.bf16.msra.mxu1 %v3222_v28  ;;  %4916 = vst [vmem:[#allocation62_spill] sm:$0xff] %v3294_v46 }
  0x38   :  { %914 = vmatprep.subr.bf16.mxu1 %v3228_v31 }
  0x3a   :  { %874 = vmatpush1.bf16.msra.mxu0 %v3225_v30 }
  0x3b   :  { %875 = vmatprep.subr.bf16.mxu0 %v3231_v37  ;;  %915 = vmatpush1.bf16.msra.mxu1 %v3234_v49 }
  0x3c   :  { %916 = vmatprep.subr.bf16.mxu1 %v3240_v53 }
  0x3d   :  { %v2795_v38 = vpop.eup %2794 }
  0x3e   :  { %876 = vmatpush1.bf16.msra.mxu0 %v3237_v50  ;;  %v2797_v47 = vpop.eup %2796  ;;  %v211_v57 = vmul.f32 %v2795_v38, %v2793_v22  ;;  %v164_v22 = vld [vmem:[#allocation3 + $0x348] sm:$0xff] }
  0x3f   :  { %877 = vmatprep.subr.bf16.mxu0 %v3243_v54  ;;  %917 = vmatpush1.bf16.msra.mxu1 %v3246_v0  ;;  %v210_v59 = vmul.f32 0.0, %v2797_v47  ;;  %v168_v38 = vld [vmem:[#allocation3 + $0x368] sm:$0xff]  ;;  %v3284_v47 = vcombine.low %v156_v44, %v160_v45 }
  0x40   :  { %918 = vmatprep.subr.bf16.mxu1 %v3252_v3 }
  0x41   :  { %v3281_v3 = vadd.f32 %v211_v57, %v210_v59  ;;  %4913 = vst [vmem:[#allocation59_spill] sm:$0xff] %v3284_v47  ;;  %v172_v57 = vld [vmem:[#allocation3 + $0x388] sm:$0xff] }
  0x42   :  { %878 = vmatpush1.bf16.msra.mxu0 %v3249_v2  ;;  %v3273_v2 = vcombine.low %v155_v20, %v159_v21  ;;  %v3288_v20 = vcombine.low %v163_v1, %v167_v56  ;;  %v3291_v21 = vcombine.high %v164_v22, %v168_v38  ;;  %v176_v59 = vld [vmem:[#allocation3 + $0x3a8] sm:$0xff]  ;;  %v3300_v1 = vcombine.low %v171_v7, %v175_v12 }
  0x43   :  { %879 = vmatprep.subr.bf16.mxu0 %v3255_v4  ;;  %919 = vmatpush1.bf16.msra.mxu1 %v3258_v23  ;;  %v3276_v4 = vcombine.high %v156_v44, %v160_v45  ;;  %4912 = vst [vmem:[#allocation58_spill] sm:$0xff] %v3281_v3  ;;  %2800 = vtanh.f32 %v3281_v3  ;;  %v3297_v44 = vcombine.low %v164_v22, %v168_v38  ;;  %v180_v3 = vld [vmem:[#allocation3 + $0x3c8] sm:$0xff] }
  0x44   :  { %4909 = vst [vmem:[#allocation55_spill] sm:$0xff] %v3273_v2  ;;  %920 = vmatprep.subr.bf16.mxu1 %v3264_v36  ;;  %4914 = vst [vmem:[#allocation60_spill] sm:$0xff] %v3288_v20  ;;  %v3303_v45 = vcombine.high %v172_v57, %v176_v59  ;;  %v3309_v22 = vcombine.low %v172_v57, %v176_v59  ;;  %v69_v36 = vld [vmem:[#allocation3 + $0x50] sm:$0xff] }
  0x45   :  { %4910 = vst [vmem:[#allocation56_spill] sm:$0xff] %v3276_v4  ;;  %4915 = vst [vmem:[#allocation61_spill] sm:$0xff] %v3291_v21 }
  0x46   :  { %880 = vmatpush1.bf16.msra.mxu0 %v3261_v29  ;;  %4917 = vst [vmem:[#allocation63_spill] sm:$0xff] %v3297_v44  ;;  %4918 = vst [vmem:[#allocation64_spill] sm:$0xff] %v3300_v1  ;;  %v2799_v29 = vpop.eup %2798 }
  0x47   :  { %881 = vmatprep.subr.bf16.mxu0 %v3267_v39  ;;  %921 = vmatpush1.bf16.msra.mxu1 %v3270_v58  ;;  %v179_v39 = vld [vmem:[#allocation3 + $0x3c0] sm:$0xff]  ;;  %4919 = vst [vmem:[#allocation65_spill] sm:$0xff] %v3303_v45  ;;  %4921 = vst [vmem:[#allocation67_spill] sm:$0xff] %v3309_v22 }
  0x48   :  { %922 = vmatprep.subr.bf16.mxu1 %v3276_v4  ;;  %v183_v58 = vld [vmem:[#allocation3 + $0x3e0] sm:$0xff]  ;;  %v65_v4 = vld [vmem:[#allocation3 + $0x30] sm:$0xff] }
  0x49   :  { %v3306_v56 = vcombine.high %v179_v39, %v183_v58  ;;  %v3312_v38 = vcombine.low %v179_v39, %v183_v58 }
  0x4a   :  { %882 = vmatpush1.bf16.msra.mxu0 %v3273_v2  ;;  %v61_v2 = vld [vmem:[#allocation3 + $0x10] sm:$0xff] }
  0x4b   :  { %883 = vmatprep.subr.bf16.mxu0 %v3279_v17  ;;  %923 = vmatpush1.bf16.msra.mxu1 %v3284_v47  ;;  %4920 = vst [vmem:[#allocation66_spill] sm:$0xff] %v3306_v56  ;;  %v184_v17 = vld [vmem:[#allocation3 + $0x3e8] sm:$0xff]  ;;  %4922 = vst [vmem:[#allocation68_spill] sm:$0xff] %v3312_v38  ;;  %v3326_v58 = vcombine.low %v61_v2, %v65_v4 }
  0x4c   :  { %924 = vmatprep.subr.bf16.mxu1 %v3291_v21  ;;  %v3315_v7 = vcombine.high %v180_v3, %v184_v17  ;;  %v66_v21 = vld [vmem:[#allocation3 + $0x38] sm:$0xff]  ;;  %v3321_v57 = vcombine.low %v180_v3, %v184_v17 }
  0x4d   :  { %v2801_v12 = vpop.eup %2800  ;;  %4926 = vst [vmem:[#allocation72_spill] sm:$0xff] %v3326_v58 }
  0x4e   :  { %884 = vmatpush1.bf16.msra.mxu0 %v3288_v20  ;;  %4923 = vst [vmem:[#allocation69_spill] sm:$0xff] %v3315_v7  ;;  %v62_v20 = vld [vmem:[#allocation3 + $0x18] sm:$0xff]  ;;  %v214_v47 = vmul.f32 %v2801_v12, %v2799_v29  ;;  %4925 = vst [vmem:[#allocation71_spill] sm:$0xff] %v3321_v57 }
  0x4f   :  { %885 = vmatprep.subr.bf16.mxu0 %v3294_v46  ;;  %925 = vmatpush1.bf16.msra.mxu1 %v3297_v44  ;;  %v3318_v46 = vcombine.high %v61_v2, %v65_v4  ;;  %v73_v44 = vld [vmem:[#allocation3 + $0x70] sm:$0xff]  ;;  %v3329_v59 = vcombine.high %v62_v20, %v66_v21  ;;  %v70_v29 = vld [vmem:[#allocation3 + $0x58] sm:$0xff]  ;;  %v3336_v3 = vcombine.low %v62_v20, %v66_v21 }
  0x50   :  { %926 = vmatprep.subr.bf16.mxu1 %v3303_v45  ;;  %v3324_v39 = vpack.c.bf16 %v214_v47, %v214_v47  ;;  %v74_v12 = vld [vmem:[#allocation3 + $0x78] sm:$0xff]  ;;  %v3339_v2 = vcombine.low %v69_v36, %v73_v44 }
  0x51   :  { %4924 = vst [vmem:[#allocation70_spill] sm:$0xff] %v3318_v46  ;;  %4927 = vst [vmem:[#allocation73_spill] sm:$0xff] %v3329_v59  ;;  %v3342_v4 = vcombine.high %v70_v29, %v74_v12  ;;  %v78_v47 = vld [vmem:[#allocation3 + $0x98] sm:$0xff] }
  0x52   :  { %886 = vmatpush1.bf16.msra.mxu0 %v3300_v1  ;;  %v77_v1 = vld [vmem:[#allocation3 + $0x90] sm:$0xff]  ;;  %4929 = vst [vmem:[#allocation75_spill] sm:$0xff] %v3336_v3  ;;  %4930 = vst [vmem:[#allocation76_spill] sm:$0xff] %v3339_v2 }
  0x53   :  { %887 = vmatprep.subr.bf16.mxu0 %v3306_v56  ;;  %927 = vmatpush1.bf16.msra.mxu1 %v3309_v22  ;;  %v3332_v56 = vcombine.high %v69_v36, %v73_v44  ;;  %v81_v22 = vld [vmem:[#allocation3 + $0xb0] sm:$0xff]  ;;  %4931 = vst [vmem:[#allocation77_spill] sm:$0xff] %v3342_v4  ;;  %v3350_v36 = vcombine.low %v70_v29, %v74_v12  ;;  %v94_v12 = vld [vmem:[#allocation3 + $0x118] sm:$0xff] }
  0x54   :  { %928 = vmatprep.subr.bf16.mxu1 %v3315_v7  ;;  %v3345_v17 = vcombine.high %v77_v1, %v81_v22  ;;  %v85_v7 = vld [vmem:[#allocation3 + $0xd0] sm:$0xff]  ;;  %v3354_v20 = vcombine.low %v77_v1, %v81_v22 }
  0x55   :  { %4928 = vst [vmem:[#allocation74_spill] sm:$0xff] %v3332_v56  ;;  %4934 = vst [vmem:[#allocation79_spill] sm:$0xff] %v3350_v36 }
  0x56   :  { %888 = vmatpush1.bf16.msra.mxu0 %v3312_v38  ;;  %4932 = vst [vmem:[#allocation78_spill] sm:$0xff] %v3345_v17  ;;  %v4933_v38 = vmov 0.0|0.0   ;;  %4935 = vst [vmem:[#allocation80_spill] sm:$0xff] %v3354_v20 }
  0x57   :  { %939 = vmatprep.subr.bf16.mxu0 %v3318_v46  ;;  %929 = vmatpush1.bf16.msra.mxu1 %v3321_v57  ;;  %v82_v46 = vld [vmem:[#allocation3 + $0xb8] sm:$0xff]  ;;  %v89_v57 = vld [vmem:[#allocation3 + $0xf0] sm:$0xff] }
  0x58   :  { %980 = vmatprep.subr.bf16.mxu1 %v3329_v59  ;;  %v3357_v21 = vcombine.high %v78_v47, %v82_v46  ;;  %v3360_v44 = vcombine.high %v85_v7, %v89_v57  ;;  %v93_v59 = vld [vmem:[#allocation3 + $0x110] sm:$0xff]  ;;  %v3363_v29 = vcombine.low %v78_v47, %v82_v46  ;;  %v3366_v1 = vcombine.low %v85_v7, %v89_v57 }
  0x59   :  { %890 = vmatmul.mubr.bf16.vlgmr.msra.gmra.mrb[0].mxu0 %v3324_v39 }
  0x5a   :  { %940 = vmatpush1.bf16.msra.mxu0 %v3326_v58  ;;  %971 = vmatprep.mubr.bf16.mxu0 %v4933_v38  ;;  %4936 = vst [vmem:[#allocation81_spill] sm:$0xff] %v3357_v21  ;;  %4937 = vst [vmem:[#allocation82_spill] sm:$0xff] %v3360_v44  ;;  %v90_v58 = vld [vmem:[#allocation3 + $0xf8] sm:$0xff] }
  0x5b   :  { %941 = vmatprep.subr.bf16.mxu0 %v3332_v56  ;;  %931 = vmatmul.mubr.bf16.vlgmr.msra.gmra.mrb[0].mxu1 %v3324_v39  ;;  %v86_v56 = vld [vmem:[#allocation3 + $0xd8] sm:$0xff]  ;;  %4938 = vst [vmem:[#allocation83_spill] sm:$0xff] %v3363_v29  ;;  %4939 = vst [vmem:[#allocation84_spill] sm:$0xff] %v3366_v1 }
  0x5c   :  { %981 = vmatpush1.bf16.msra.mxu1 %v3336_v3  ;;  %1012 = vmatprep.mubr.bf16.mxu1 %v4933_v38  ;;  %v97_v3 = vld [vmem:[#allocation3 + $0x130] sm:$0xff]  ;;  %v3369_v22 = vcombine.high %v86_v56, %v90_v58  ;;  %v3375_v46 = vcombine.low %v86_v56, %v90_v58 }
  0x5d   :  { %982 = vmatprep.subr.bf16.mxu1 %v3342_v4  ;;  %v3372_v38 = vcombine.high %v93_v59, %v97_v3  ;;  %v105_v4 = vld [vmem:[#allocation3 + $0x170] sm:$0xff]  ;;  %v3378_v7 = vcombine.low %v93_v59, %v97_v3 }
  0x5e   :  { %942 = vmatpush1.bf16.msra.mxu0 %v3339_v2  ;;  %4940 = vst [vmem:[#allocation85_spill] sm:$0xff] %v3369_v22  ;;  %v101_v2 = vld [vmem:[#allocation3 + $0x150] sm:$0xff]  ;;  %4942 = vst [vmem:[#allocation87_spill] sm:$0xff] %v3375_v46 }
  0x5f   :  { %943 = vmatprep.subr.bf16.mxu0 %v3345_v17  ;;  %4941 = vst [vmem:[#allocation86_spill] sm:$0xff] %v3372_v38  ;;  %v98_v17 = vld [vmem:[#allocation3 + $0x138] sm:$0xff]  ;;  %4943 = vst [vmem:[#allocation88_spill] sm:$0xff] %v3378_v7  ;;  %v3384_v47 = vcombine.high %v101_v2, %v105_v4  ;;  %v3390_v58 = vcombine.low %v101_v2, %v105_v4 }
  0x60   :  { %983 = vmatpush1.bf16.msra.mxu1 %v3350_v36  ;;  %v3381_v57 = vcombine.high %v94_v12, %v98_v17  ;;  %v113_v36 = vld [vmem:[#allocation3 + $0x1b0] sm:$0xff]  ;;  %v3387_v56 = vcombine.low %v94_v12, %v98_v17 }
  0x61   :  { %984 = vmatprep.subr.bf16.mxu1 %v3357_v21  ;;  %4945 = vst [vmem:[#allocation90_spill] sm:$0xff] %v3384_v47  ;;  %v109_v21 = vld [vmem:[#allocation3 + $0x190] sm:$0xff]  ;;  %4947 = vst [vmem:[#allocation92_spill] sm:$0xff] %v3390_v58 }
  0x62   :  { %944 = vmatpush1.bf16.msra.mxu0 %v3354_v20  ;;  %4944 = vst [vmem:[#allocation89_spill] sm:$0xff] %v3381_v57  ;;  %v106_v20 = vld [vmem:[#allocation3 + $0x178] sm:$0xff]  ;;  %4946 = vst [vmem:[#allocation91_spill] sm:$0xff] %v3387_v56  ;;  %v3396_v3 = vcombine.high %v109_v21, %v113_v36  ;;  %v3402_v2 = vcombine.low %v109_v21, %v113_v36 }
  0x63   :  { %945 = vmatprep.subr.bf16.mxu0 %v3360_v44  ;;  %v102_v44 = vld [vmem:[#allocation3 + $0x158] sm:$0xff] }
  0x64   :  { %985 = vmatpush1.bf16.msra.mxu1 %v3363_v29  ;;  %v3393_v59 = vcombine.high %v102_v44, %v106_v20  ;;  %4949 = vst [vmem:[#allocation94_spill] sm:$0xff] %v3396_v3  ;;  %v121_v29 = vld [vmem:[#allocation3 + $0x1f0] sm:$0xff]  ;;  %v3399_v17 = vcombine.low %v102_v44, %v106_v20  ;;  %4951 = vst [vmem:[#allocation96_spill] sm:$0xff] %v3402_v2 }
  0x65   :  { %986 = vmatprep.subr.bf16.mxu1 %v3369_v22  ;;  %v117_v22 = vld [vmem:[#allocation3 + $0x1d0] sm:$0xff] }
  0x66   :  { %946 = vmatpush1.bf16.msra.mxu0 %v3366_v1  ;;  %4948 = vst [vmem:[#allocation93_spill] sm:$0xff] %v3393_v59  ;;  %v114_v1 = vld [vmem:[#allocation3 + $0x1b8] sm:$0xff]  ;;  %4950 = vst [vmem:[#allocation95_spill] sm:$0xff] %v3399_v17  ;;  %v3408_v12 = vcombine.high %v117_v22, %v121_v29  ;;  %v3414_v36 = vcombine.low %v117_v22, %v121_v29 }
  0x67   :  { %947 = vmatprep.subr.bf16.mxu0 %v3372_v38  ;;  %v110_v38 = vld [vmem:[#allocation3 + $0x198] sm:$0xff] }
  0x68   :  { %987 = vmatpush1.bf16.msra.mxu1 %v3375_v46  ;;  %v3405_v4 = vcombine.high %v110_v38, %v114_v1  ;;  %4953 = vst [vmem:[#allocation98_spill] sm:$0xff] %v3408_v12  ;;  %v129_v46 = vld [vmem:[#allocation3 + $0x230] sm:$0xff]  ;;  %v3411_v20 = vcombine.low %v110_v38, %v114_v1  ;;  %4955 = vst [vmem:[#allocation100_spill] sm:$0xff] %v3414_v36 }
  0x69   :  { %988 = vmatprep.subr.bf16.mxu1 %v3381_v57  ;;  %v125_v57 = vld [vmem:[#allocation3 + $0x210] sm:$0xff] }
  0x6a   :  { %948 = vmatpush1.bf16.msra.mxu0 %v3378_v7  ;;  %4952 = vst [vmem:[#allocation97_spill] sm:$0xff] %v3405_v4  ;;  %v122_v7 = vld [vmem:[#allocation3 + $0x1f8] sm:$0xff]  ;;  %4954 = vst [vmem:[#allocation99_spill] sm:$0xff] %v3411_v20  ;;  %v3420_v44 = vcombine.high %v125_v57, %v129_v46  ;;  %v3426_v29 = vcombine.low %v125_v57, %v129_v46 }
  0x6b   :  { %949 = vmatprep.subr.bf16.mxu0 %v3384_v47  ;;  %v118_v47 = vld [vmem:[#allocation3 + $0x1d8] sm:$0xff] }
  0x6c   :  { %989 = vmatpush1.bf16.msra.mxu1 %v3387_v56  ;;  %v3417_v21 = vcombine.high %v118_v47, %v122_v7  ;;  %4957 = vst [vmem:[#allocation102_spill] sm:$0xff] %v3420_v44  ;;  %v137_v56 = vld [vmem:[#allocation3 + $0x270] sm:$0xff]  ;;  %v3423_v1 = vcombine.low %v118_v47, %v122_v7  ;;  %4959 = vst [vmem:[#allocation104_spill] sm:$0xff] %v3426_v29 }
  0x6d   :  { %990 = vmatprep.subr.bf16.mxu1 %v3393_v59  ;;  %v133_v59 = vld [vmem:[#allocation3 + $0x250] sm:$0xff] }
  0x6e   :  { %950 = vmatpush1.bf16.msra.mxu0 %v3390_v58  ;;  %4956 = vst [vmem:[#allocation101_spill] sm:$0xff] %v3417_v21  ;;  %v130_v58 = vld [vmem:[#allocation3 + $0x238] sm:$0xff]  ;;  %4958 = vst [vmem:[#allocation103_spill] sm:$0xff] %v3423_v1  ;;  %v3432_v38 = vcombine.high %v133_v59, %v137_v56  ;;  %v3438_v46 = vcombine.low %v133_v59, %v137_v56 }
  0x6f   :  { %951 = vmatprep.subr.bf16.mxu0 %v3396_v3  ;;  %v126_v3 = vld [vmem:[#allocation3 + $0x218] sm:$0xff] }
  0x70   :  { %991 = vmatpush1.bf16.msra.mxu1 %v3399_v17  ;;  %v3429_v22 = vcombine.high %v126_v3, %v130_v58  ;;  %4961 = vst [vmem:[#allocation106_spill] sm:$0xff] %v3432_v38  ;;  %v145_v17 = vld [vmem:[#allocation3 + $0x2b0] sm:$0xff]  ;;  %v3435_v7 = vcombine.low %v126_v3, %v130_v58  ;;  %4963 = vst [vmem:[#allocation108_spill] sm:$0xff] %v3438_v46 }
  0x71   :  { %992 = vmatprep.subr.bf16.mxu1 %v3405_v4  ;;  %v141_v4 = vld [vmem:[#allocation3 + $0x290] sm:$0xff] }
  0x72   :  { %952 = vmatpush1.bf16.msra.mxu0 %v3402_v2  ;;  %4960 = vst [vmem:[#allocation105_spill] sm:$0xff] %v3429_v22  ;;  %v138_v2 = vld [vmem:[#allocation3 + $0x278] sm:$0xff]  ;;  %4962 = vst [vmem:[#allocation107_spill] sm:$0xff] %v3435_v7  ;;  %v3444_v47 = vcombine.high %v141_v4, %v145_v17  ;;  %v3450_v56 = vcombine.low %v141_v4, %v145_v17 }
  0x73   :  { %953 = vmatprep.subr.bf16.mxu0 %v3408_v12  ;;  %v134_v12 = vld [vmem:[#allocation3 + $0x258] sm:$0xff] }
  0x74   :  { %993 = vmatpush1.bf16.msra.mxu1 %v3411_v20  ;;  %v3441_v57 = vcombine.high %v134_v12, %v138_v2  ;;  %4965 = vst [vmem:[#allocation110_spill] sm:$0xff] %v3444_v47  ;;  %v153_v20 = vld [vmem:[#allocation3 + $0x2f0] sm:$0xff]  ;;  %v3447_v58 = vcombine.low %v134_v12, %v138_v2  ;;  %4967 = vst [vmem:[#allocation112_spill] sm:$0xff] %v3450_v56 }
  0x75   :  { %994 = vmatprep.subr.bf16.mxu1 %v3417_v21  ;;  %v149_v21 = vld [vmem:[#allocation3 + $0x2d0] sm:$0xff] }
  0x76   :  { %954 = vmatpush1.bf16.msra.mxu0 %v3414_v36  ;;  %4964 = vst [vmem:[#allocation109_spill] sm:$0xff] %v3441_v57  ;;  %v146_v36 = vld [vmem:[#allocation3 + $0x2b8] sm:$0xff]  ;;  %4966 = vst [vmem:[#allocation111_spill] sm:$0xff] %v3447_v58  ;;  %v3456_v3 = vcombine.high %v149_v21, %v153_v20  ;;  %v3462_v17 = vcombine.low %v149_v21, %v153_v20 }
  0x77   :  { %955 = vmatprep.subr.bf16.mxu0 %v3420_v44  ;;  %v142_v44 = vld [vmem:[#allocation3 + $0x298] sm:$0xff] }
  0x78   :  { %995 = vmatpush1.bf16.msra.mxu1 %v3423_v1  ;;  %v3453_v59 = vcombine.high %v142_v44, %v146_v36  ;;  %4969 = vst [vmem:[#allocation114_spill] sm:$0xff] %v3456_v3  ;;  %v161_v1 = vld [vmem:[#allocation3 + $0x330] sm:$0xff]  ;;  %v3459_v2 = vcombine.low %v142_v44, %v146_v36  ;;  %4971 = vst [vmem:[#allocation116_spill] sm:$0xff] %v3462_v17 }
  0x79   :  { %996 = vmatprep.subr.bf16.mxu1 %v3429_v22  ;;  %v157_v22 = vld [vmem:[#allocation3 + $0x310] sm:$0xff] }
  0x7a   :  { %956 = vmatpush1.bf16.msra.mxu0 %v3426_v29  ;;  %4968 = vst [vmem:[#allocation113_spill] sm:$0xff] %v3453_v59  ;;  %v154_v29 = vld [vmem:[#allocation3 + $0x2f8] sm:$0xff]  ;;  %4970 = vst [vmem:[#allocation115_spill] sm:$0xff] %v3459_v2  ;;  %v3468_v12 = vcombine.high %v157_v22, %v161_v1  ;;  %v3474_v20 = vcombine.low %v157_v22, %v161_v1 }
  0x7b   :  { %957 = vmatprep.subr.bf16.mxu0 %v3432_v38  ;;  %v150_v38 = vld [vmem:[#allocation3 + $0x2d8] sm:$0xff] }
  0x7c   :  { %997 = vmatpush1.bf16.msra.mxu1 %v3435_v7  ;;  %v3465_v4 = vcombine.high %v150_v38, %v154_v29  ;;  %4973 = vst [vmem:[#allocation118_spill] sm:$0xff] %v3468_v12  ;;  %v169_v7 = vld [vmem:[#allocation3 + $0x370] sm:$0xff]  ;;  %v3471_v36 = vcombine.low %v150_v38, %v154_v29  ;;  %4975 = vst [vmem:[#allocation120_spill] sm:$0xff] %v3474_v20 }
  0x7d   :  { %998 = vmatprep.subr.bf16.mxu1 %v3441_v57  ;;  %v165_v57 = vld [vmem:[#allocation3 + $0x350] sm:$0xff] }
  0x7e   :  { %958 = vmatpush1.bf16.msra.mxu0 %v3438_v46  ;;  %4972 = vst [vmem:[#allocation117_spill] sm:$0xff] %v3465_v4  ;;  %v162_v46 = vld [vmem:[#allocation3 + $0x338] sm:$0xff]  ;;  %4974 = vst [vmem:[#allocation119_spill] sm:$0xff] %v3471_v36  ;;  %v3480_v44 = vcombine.high %v165_v57, %v169_v7  ;;  %v3486_v1 = vcombine.low %v165_v57, %v169_v7 }
  0x7f   :  { %959 = vmatprep.subr.bf16.mxu0 %v3444_v47  ;;  %v158_v47 = vld [vmem:[#allocation3 + $0x318] sm:$0xff] }
  0x80   :  { %999 = vmatpush1.bf16.msra.mxu1 %v3447_v58  ;;  %v3477_v21 = vcombine.high %v158_v47, %v162_v46  ;;  %4977 = vst [vmem:[#allocation122_spill] sm:$0xff] %v3480_v44  ;;  %v177_v58 = vld [vmem:[#allocation3 + $0x3b0] sm:$0xff]  ;;  %v3483_v29 = vcombine.low %v158_v47, %v162_v46  ;;  %4979 = vst [vmem:[#allocation124_spill] sm:$0xff] %v3486_v1 }
  0x81   :  { %1000 = vmatprep.subr.bf16.mxu1 %v3453_v59  ;;  %v173_v59 = vld [vmem:[#allocation3 + $0x390] sm:$0xff] }
  0x82   :  { %960 = vmatpush1.bf16.msra.mxu0 %v3450_v56  ;;  %4976 = vst [vmem:[#allocation121_spill] sm:$0xff] %v3477_v21  ;;  %v170_v56 = vld [vmem:[#allocation3 + $0x378] sm:$0xff]  ;;  %4978 = vst [vmem:[#allocation123_spill] sm:$0xff] %v3483_v29  ;;  %v3492_v38 = vcombine.high %v173_v59, %v177_v58  ;;  %v3498_v7 = vcombine.low %v173_v59, %v177_v58 }
  0x83   :  { %961 = vmatprep.subr.bf16.mxu0 %v3456_v3  ;;  %v166_v3 = vld [vmem:[#allocation3 + $0x358] sm:$0xff] }
  0x84   :  { %1001 = vmatpush1.bf16.msra.mxu1 %v3459_v2  ;;  %v3489_v22 = vcombine.high %v166_v3, %v170_v56  ;;  %4981 = vst [vmem:[#allocation126_spill] sm:$0xff] %v3492_v38  ;;  %v185_v2 = vld [vmem:[#allocation3 + $0x3f0] sm:$0xff]  ;;  %v3495_v46 = vcombine.low %v166_v3, %v170_v56  ;;  %4983 = vst [vmem:[#allocation128_spill] sm:$0xff] %v3498_v7  ;;  %v4991_v3 = vld [vmem:[#allocation47_spill] sm:$0xff] }
  0x85   :  { %1002 = vmatprep.subr.bf16.mxu1 %v3465_v4  ;;  %v181_v4 = vld [vmem:[#allocation3 + $0x3d0] sm:$0xff] }
  0x86   :  { %962 = vmatpush1.bf16.msra.mxu0 %v3462_v17  ;;  %4980 = vst [vmem:[#allocation125_spill] sm:$0xff] %v3489_v22  ;;  %v178_v17 = vld [vmem:[#allocation3 + $0x3b8] sm:$0xff]  ;;  %4982 = vst [vmem:[#allocation127_spill] sm:$0xff] %v3495_v46  ;;  %v3504_v47 = vcombine.high %v181_v4, %v185_v2  ;;  %v3510_v56 = vcombine.low %v181_v4, %v185_v2  ;;  %v4994_v4 = vld [vmem:[#allocation51_spill] sm:$0xff] }
  0x87   :  { %963 = vmatprep.subr.bf16.mxu0 %v3468_v12  ;;  %v174_v12 = vld [vmem:[#allocation3 + $0x398] sm:$0xff] }
  0x88   :  { %1003 = vmatpush1.bf16.msra.mxu1 %v3471_v36  ;;  %v3501_v57 = vcombine.high %v174_v12, %v178_v17  ;;  %4985 = vst [vmem:[#allocation130_spill] sm:$0xff] %v3504_v47  ;;  %4987 = vst [vmem:[#allocation132_spill] sm:$0xff] %v3510_v56  ;;  %v4992_v2 = vld [vmem:[#allocation49_spill] sm:$0xff] }
  0x89   :  { %1004 = vmatprep.subr.bf16.mxu1 %v3477_v21  ;;  %v3507_v21 = vcombine.low %v174_v12, %v178_v17  ;;  %v4993_v17 = vld [vmem:[#allocation52_spill] sm:$0xff]  ;;  %v4995_v12 = vld [vmem:[#allocation53_spill] sm:$0xff] }
  0x8a   :  { %964 = vmatpush1.bf16.msra.mxu0 %v3474_v20  ;;  %4984 = vst [vmem:[#allocation129_spill] sm:$0xff] %v3501_v57  ;;  %v186_v20 = vld [vmem:[#allocation3 + $0x3f8] sm:$0xff] }
  0x8b   :  { %965 = vmatprep.subr.bf16.mxu0 %v3480_v44  ;;  %v182_v44 = vld [vmem:[#allocation3 + $0x3d8] sm:$0xff]  ;;  %4986 = vst [vmem:[#allocation131_spill] sm:$0xff] %v3507_v21 }
  0x8c   :  { %1005 = vmatpush1.bf16.msra.mxu1 %v3483_v29  ;;  %v3513_v58 = vcombine.high %v182_v44, %v186_v20  ;;  %v3517_v59 = vcombine.low %v182_v44, %v186_v20  ;;  %v4996_v20 = vld [vmem:[#allocation54_spill] sm:$0xff]  ;;  %v4997_v44 = vld [vmem:[#allocation56_spill] sm:$0xff] }
  0x8d   :  { %1006 = vmatprep.subr.bf16.mxu1 %v3489_v22 }
  0x8e   :  { %966 = vmatpush1.bf16.msra.mxu0 %v3486_v1  ;;  %4988 = vst [vmem:[#allocation133_spill] sm:$0xff] %v3513_v58  ;;  %4989 = vst [vmem:[#allocation134_spill] sm:$0xff] %v3517_v59 }
  0x8f   :  { %967 = vmatprep.subr.bf16.mxu0 %v3492_v38 }
  0x90   :  { %1007 = vmatpush1.bf16.msra.mxu1 %v3495_v46 }
  0x91   :  { %1008 = vmatprep.subr.bf16.mxu1 %v3501_v57 }
  0x92   :  { %968 = vmatpush1.bf16.msra.mxu0 %v3498_v7 }
  0x93   :  { %969 = vmatprep.subr.bf16.mxu0 %v3504_v47 }
  0x94   :  { %1009 = vmatpush1.bf16.msra.mxu1 %v3507_v21 }
  0x95   :  { %1010 = vmatprep.subr.bf16.mxu1 %v3513_v58 }
  0x96   :  { %970 = vmatpush1.bf16.msra.mxu0 %v3510_v56 }
  0x97   :  { %1084 = vmatprep.subr.bf16.mxu0 %v3117_v5 }
  0x98   :  { %1011 = vmatpush1.bf16.msra.mxu1 %v3517_v59 }
  0x99   :  { %972 = vmatmul.mubr.bf16.vlgmr.msra.gmra.mrb[4].mxu0 %v3324_v39  ;;  %1125 = vmatprep.subr.bf16.mxu1 %v3127_v14 }
  0x9a   :  { %1085 = vmatpush1.bf16.msra.mxu0 %v3119_v6 }
  0x9b   :  { %1086 = vmatprep.subr.bf16.mxu0 %v3121_v8  ;;  %1013 = vmatmul.mubr.bf16.vlgmr.msra.gmra.mrb[4].mxu1 %v3324_v39  ;;  %v4990_v39 = vld [vmem:[#allocation48_spill] sm:$0xff] }
  0x9c   :  { %1126 = vmatpush1.bf16.msra.mxu1 %v3129_v15 }
  0x9d   :  { %1127 = vmatprep.subr.bf16.mxu1 %v3134_v19 }
  0x9e   :  { %1087 = vmatpush1.bf16.msra.mxu0 %v3125_v13 }
  0x9f   :  { %1088 = vmatprep.subr.bf16.mxu0 %v3132_v18 }
  0xa0   :  { %1128 = vmatpush1.bf16.msra.mxu1 %v3138_v24 }
  0xa1   :  { %1129 = vmatprep.subr.bf16.mxu1 %v3144_v26 }
  0xa2   :  { %1089 = vmatpush1.bf16.msra.mxu0 %v3141_v25 }
  0xa3   :  { %1090 = vmatprep.subr.bf16.mxu0 %v3147_v27 }
  0xa4   :  { %1130 = vmatpush1.bf16.msra.mxu1 %v3150_v32 }
  0xa5   :  { %1131 = vmatprep.subr.bf16.mxu1 %v3156_v34 }
  0xa6   :  { %1091 = vmatpush1.bf16.msra.mxu0 %v3153_v33 }
  0xa7   :  { %1092 = vmatprep.subr.bf16.mxu0 %v3159_v35 }
  0xa8   :  { %1132 = vmatpush1.bf16.msra.mxu1 %v3162_v40 }
  0xa9   :  { %1133 = vmatprep.subr.bf16.mxu1 %v3168_v42 }
  0xaa   :  { %1093 = vmatpush1.bf16.msra.mxu0 %v3165_v41 }
  0xab   :  { %1094 = vmatprep.subr.bf16.mxu0 %v3171_v43 }
  0xac   :  { %1134 = vmatpush1.bf16.msra.mxu1 %v3174_v48 }
  0xad   :  { %1135 = vmatprep.subr.bf16.mxu1 %v3186_v52 }
  0xae   :  { %1095 = vmatpush1.bf16.msra.mxu0 %v3183_v51 }
  0xaf   :  { %1096 = vmatprep.subr.bf16.mxu0 %v3189_v55 }
  0xb0   :  { %1136 = vmatpush1.bf16.msra.mxu1 %v3192_v60 }
  0xb1   :  { %1137 = vmatprep.subr.bf16.mxu1 %v3198_v62 }
  0xb2   :  { %1097 = vmatpush1.bf16.msra.mxu0 %v3195_v61 }
  0xb3   :  { %1098 = vmatprep.subr.bf16.mxu0 %v3201_v63 }
  0xb4   :  { %1138 = vmatpush1.bf16.msra.mxu1 %v3207_v9 }
  0xb5   :  { %1139 = vmatprep.subr.bf16.mxu1 %v3213_v11 }
  0xb6   :  { %1099 = vmatpush1.bf16.msra.mxu0 %v3210_v10 }
  0xb7   :  { %1100 = vmatprep.subr.bf16.mxu0 %v3216_v16 }
  0xb8   :  { %1140 = vmatpush1.bf16.msra.mxu1 %v3222_v28 }
  0xb9   :  { %1141 = vmatprep.subr.bf16.mxu1 %v3228_v31 }
  0xba   :  { %1101 = vmatpush1.bf16.msra.mxu0 %v3225_v30 }
  0xbb   :  { %1102 = vmatprep.subr.bf16.mxu0 %v3231_v37  ;;  %v2709_v37 = vld [vmem:[%s4574_s0 + $0x30] sm:$0xff] }
  0xbc   :  { %1142 = vmatpush1.bf16.msra.mxu1 %v3234_v49 }
  0xbd   :  { %1143 = vmatprep.subr.bf16.mxu1 %v3240_v53 }
  0xbe   :  { %1103 = vmatpush1.bf16.msra.mxu0 %v3237_v50 }
  0xbf   :  { %1104 = vmatprep.subr.bf16.mxu0 %v3243_v54  ;;  %v4998_v54 = vld [vmem:[#allocation55_spill] sm:$0xff] }
  0xc0   :  { %1144 = vmatpush1.bf16.msra.mxu1 %v3246_v0  ;;  %v4999_v0 = vld [vmem:[#allocation57_spill] sm:$0xff] }
  0xc1   :  { %1145 = vmatprep.subr.bf16.mxu1 %v4990_v39  ;;  %v5000_v39 = vld [vmem:[#allocation59_spill] sm:$0xff] }
  0xc2   :  { %1105 = vmatpush1.bf16.msra.mxu0 %v4991_v3  ;;  %v5001_v3 = vld [vmem:[#allocation61_spill] sm:$0xff] }
  0xc3   :  { %1106 = vmatprep.subr.bf16.mxu0 %v4992_v2  ;;  %v5002_v2 = vld [vmem:[#allocation60_spill] sm:$0xff] }
  0xc4   :  { %1146 = vmatpush1.bf16.msra.mxu1 %v3258_v23  ;;  %v5003_v23 = vld [vmem:[#allocation62_spill] sm:$0xff] }
  0xc5   :  { %1147 = vmatprep.subr.bf16.mxu1 %v4993_v17  ;;  %v5004_v17 = vld [vmem:[#allocation63_spill] sm:$0xff] }
  0xc6   :  { %1107 = vmatpush1.bf16.msra.mxu0 %v4994_v4 }
  0xc7   :  { %1108 = vmatprep.subr.bf16.mxu0 %v4995_v12  ;;  %v5005_v12 = vld [vmem:[#allocation64_spill] sm:$0xff] }
  0xc8   :  { %1148 = vmatpush1.bf16.msra.mxu1 %v4996_v20  ;;  %v5006_v20 = vld [vmem:[#allocation66_spill] sm:$0xff] }
  0xc9   :  { %1149 = vmatprep.subr.bf16.mxu1 %v4997_v44  ;;  %v5007_v44 = vld [vmem:[#allocation67_spill] sm:$0xff] }
  0xca   :  { %1109 = vmatpush1.bf16.msra.mxu0 %v4998_v54  ;;  %v5008_v54 = vld [vmem:[#allocation69_spill] sm:$0xff] }
  0xcb   :  { %1110 = vmatprep.subr.bf16.mxu0 %v4999_v0  ;;  %v5009_v0 = vld [vmem:[#allocation68_spill] sm:$0xff] }
  0xcc   :  { %1150 = vmatpush1.bf16.msra.mxu1 %v5000_v39  ;;  %v5010_v39 = vld [vmem:[#allocation70_spill] sm:$0xff] }
  0xcd   :  { %1151 = vmatprep.subr.bf16.mxu1 %v5001_v3  ;;  %v5011_v3 = vld [vmem:[#allocation71_spill] sm:$0xff] }
  0xce   :  { %1111 = vmatpush1.bf16.msra.mxu0 %v5002_v2  ;;  %v5012_v2 = vld [vmem:[#allocation73_spill] sm:$0xff] }
  0xcf   :  { %1112 = vmatprep.subr.bf16.mxu0 %v5003_v23 }
  0xd0   :  { %1152 = vmatpush1.bf16.msra.mxu1 %v5004_v17 }
  0xd1   :  { %1153 = vmatprep.subr.bf16.mxu1 %v3303_v45  ;;  %v2707_v45 = vld [vmem:[%s4574_s0 + $0x20] sm:$0xff] }
  0xd2   :  { %1113 = vmatpush1.bf16.msra.mxu0 %v5005_v12 }
  0xd3   :  { %1114 = vmatprep.subr.bf16.mxu0 %v5006_v20  ;;  %v2708_v20 = vld [vmem:[%s4574_s0 + $0x28] sm:$0xff] }
  0xd4   :  { %1154 = vmatpush1.bf16.msra.mxu1 %v5007_v44 }
  0xd5   :  { %1155 = vmatprep.subr.bf16.mxu1 %v5008_v54 }
  0xd6   :  { %1115 = vmatpush1.bf16.msra.mxu0 %v5009_v0 }
  0xd7   :  { %1166 = vmatprep.subr.bf16.mxu0 %v5010_v39 }
  0xd8   :  { %1156 = vmatpush1.bf16.msra.mxu1 %v5011_v3 }
  0xd9   :  { %1207 = vmatprep.subr.bf16.mxu1 %v5012_v2 }
 0x12c   :  { %v891_v12 = vpop.f32.mrb[0].mxu0 }
 0x12d   :  { %v1026_v44 = vadd.f32 %v2707_v45, %v891_v12  ;;  %v893_v23 = vpop.f32.mrb[1].mxu0 }
 0x12e   :  { %v1027_v54 = vadd.f32 %v2708_v20, %v893_v23  ;;  %v895_v17 = vpop.f32.mrb[2].mxu0  ;;  %v932_v39 = vpop.f32.mrb[0].mxu1 }
 0x12f   :  { %v2711_v0 = vmul.f32 -1.442695, %v1026_v44  ;;  %v896_v4 = vpop.f32.mrb[3].mxu0  ;;  %v934_v3 = vpop.f32.mrb[1].mxu1  ;;  %v1028_v49 = vadd.f32 %v2709_v37, %v932_v39  ;;  %v36_v37 = vld [vmem:[%s4576_s2] sm:$0xf] }
 0x130   :  { %v2712_v50 = vmul.f32 -1.442695, %v1027_v54  ;;  %v936_v2 = vpop.f32.mrb[2].mxu1 }
 0x131   :  { %2802 = vpow2.f32 %v2711_v0  ;;  %v937_v53 = vpop.f32.mrb[3].mxu1  ;;  %v5013_v0 = vld [vmem:[#allocation58_spill] sm:$0xff] }
 0x132   :  { %2804 = vpow2.f32 %v2712_v50  ;;  %v38_v53 = vlaneseq }
 0x133   :  { %2806 = vtanh.f32 %v1028_v49 }
 0x134   :  { %v39_v20 = vshrl.u32 %v38_v53, 7 }
 0x136   :  { %v40_v44 = vsub.s32 0, %v39_v20  ;;  %v52_v39 = vsub.s32 3, %v39_v20 }
 0x138   :  { %v3605_v49 = vrot.slane %v36_v37, %v40_v44  ;;  %v3614_v16 = vrot.slane %v36_v37, %v52_v39 }
 0x13a   :  { %5014 = vst [vmem:[#allocation58_spill] sm:$0xff] %v3605_v49  ;;  %5016 = vst [vmem:[#allocation136_spill] sm:$0xff] %v3614_v16 }
 0x13b   :  { %v2803_v30 = vpop.eup %2802 }
 0x13c   :  { %v2805_v31 = vpop.eup %2804  ;;  %v1037_v45 = vadd.f32 1.0, %v2803_v30  ;;  %v44_v30 = vsub.s32 1, %v39_v20 }
 0x13d   :  { %v1043_v23 = vadd.f32 1.0, %v2805_v31  ;;  %v2807_v17 = vpop.eup %2806 }
 0x13e   :  { %2808 = vrcp.f32 %v1037_v45  ;;  %v3607_v31 = vrot.slane %v36_v37, %v44_v30  ;;  %v48_v30 = vsub.s32 2, %v39_v20 }
 0x13f   :  { %2810 = vrcp.f32 %v1043_v23 }
 0x140   :  { %5015 = vst [vmem:[#allocation135_spill] sm:$0xff] %v3607_v31  ;;  %v3617_v63 = vrot.slane %v36_v37, %v48_v30 }
 0x142   :  { %5017 = vst [vmem:[#allocation137_spill] sm:$0xff] %v3617_v63 }
 0x148   :  { %v2809_v4 = vpop.eup %2808 }
 0x149   :  { %v2811_v54 = vpop.eup %2810  ;;  %v1054_v12 = vmul.f32 %v2809_v4, %v2807_v17  ;;  %v2710_v4 = vld [vmem:[%s4574_s0 + $0x38] sm:$0xff] }
 0x14a   :  { %v1053_v2 = vmul.f32 %v2811_v54, %v5013_v0  ;;  %v1029_v10 = vadd.f32 %v2710_v4, %v934_v3 }
 0x14c   :  { %v3600_v50 = vadd.f32 %v1054_v12, %v1053_v2  ;;  %v2713_v9 = vmul.f32 -1.442695, %v1029_v10 }
 0x16c   :  { %v973_v45 = vpop.f32.mrb[4].mxu0 }
 0x16d   :  { %v1030_v23 = vadd.f32 %v973_v45, %v3605_v49  ;;  %v975_v17 = vpop.f32.mrb[5].mxu0 }
 0x16e   :  { %v1031_v54 = vadd.f32 %v975_v17, %v3607_v31  ;;  %v977_v12 = vpop.f32.mrb[6].mxu0  ;;  %v1014_v53 = vpop.f32.mrb[4].mxu1 }
 0x16f   :  { %v2714_v0 = vmul.f32 -1.442695, %v1030_v23  ;;  %v978_v2 = vpop.f32.mrb[7].mxu0  ;;  %v1016_v28 = vpop.f32.mrb[5].mxu1  ;;  %v1032_v23 = vadd.f32 %v1014_v53, %v3617_v63 }
 0x170   :  { %v2715_v44 = vmul.f32 -1.442695, %v1031_v54  ;;  %v1018_v11 = vpop.f32.mrb[6].mxu1  ;;  %v1033_v49 = vadd.f32 %v1016_v28, %v3614_v16 }
 0x171   :  { %2812 = vpow2.f32 %v2714_v0  ;;  %v1019_v45 = vpop.f32.mrb[7].mxu1 }
 0x172   :  { %2814 = vpow2.f32 %v2715_v44  ;;  %v2716_v17 = vmul.f32 -1.442695, %v1033_v49 }
 0x173   :  { %2816 = vpow2.f32 %v2713_v9 }
 0x174   :  { %2818 = vpow2.f32 %v2716_v17 }
 0x175   :  { %2820 = vtanh.f32 %v1032_v23 }
 0x17b   :  { %v2813_v12 = vpop.eup %2812 }
 0x17c   :  { %v2815_v39 = vpop.eup %2814  ;;  %v1061_v54 = vadd.f32 1.0, %v2813_v12 }
 0x17d   :  { %v1067_v20 = vadd.f32 1.0, %v2815_v39  ;;  %v2817_v11 = vpop.eup %2816 }
 0x17e   :  { %2822 = vrcp.f32 %v1061_v54  ;;  %v2819_v3 = vpop.eup %2818  ;;  %v1050_v0 = vadd.f32 1.0, %v2817_v11  ;;  %v5018_v54 = vld [vmem:[#allocation72_spill] sm:$0xff]  ;;  %v5020_v11 = vld [vmem:[#allocation74_spill] sm:$0xff] }
 0x17f   :  { %2824 = vrcp.f32 %v1067_v20  ;;  %v2821_v4 = vpop.eup %2820  ;;  %v1074_v37 = vadd.f32 1.0, %v2819_v3  ;;  %v5019_v20 = vld [vmem:[#allocation75_spill] sm:$0xff]  ;;  %v5021_v3 = vld [vmem:[#allocation77_spill] sm:$0xff] }
 0x180   :  { %2826 = vrcp.f32 %v1050_v0  ;;  %v5023_v0 = vld [vmem:[#allocation79_spill] sm:$0xff] }
 0x181   :  { %2828 = vtanh.f32 %v3600_v50 }
 0x182   :  { %2830 = vrcp.f32 %v1074_v37  ;;  %v5025_v37 = vld [vmem:[#allocation81_spill] sm:$0xff] }
 0x188   :  { %v2823_v28 = vpop.eup %2822 }
 0x189   :  { %v2825_v2 = vpop.eup %2824  ;;  %v1078_v10 = vmul.f32 %v2823_v28, %v2821_v4  ;;  %v5022_v4 = vld [vmem:[#allocation76_spill] sm:$0xff]  ;;  %v5024_v28 = vld [vmem:[#allocation78_spill] sm:$0xff] }
 0x18a   :  { %v1077_v49 = vmul.f32 0.0, %v2825_v2  ;;  %v2827_v53 = vpop.eup %2826  ;;  %v5026_v2 = vld [vmem:[#allocation80_spill] sm:$0xff] }
 0x18b   :  { %v2829_v44 = vpop.eup %2828 }
 0x18c   :  { %v3621_v9 = vadd.f32 %v1078_v10, %v1077_v49  ;;  %v2831_v30 = vpop.eup %2830  ;;  %v1057_v17 = vmul.f32 %v2829_v44, %v2827_v53  ;;  %v5027_v10 = vld [vmem:[#allocation83_spill] sm:$0xff]  ;;  %v5028_v49 = vld [vmem:[#allocation82_spill] sm:$0xff]  ;;  %v5029_v53 = vld [vmem:[#allocation85_spill] sm:$0xff] }
 0x18d   :  { %v5030_v44 = vld [vmem:[#allocation84_spill] sm:$0xff] }
 0x18e   :  { %2832 = vtanh.f32 %v3621_v9  ;;  %v3624_v39 = vpack.c.bf16 %v1057_v17, %v1057_v17  ;;  %v5033_v17 = vld [vmem:[#allocation89_spill] sm:$0xff] }
 0x198   :  { %v2833_v45 = vpop.eup %2832 }
 0x199   :  { %v1081_v23 = vmul.f32 %v2833_v45, %v2831_v30  ;;  %v5031_v30 = vld [vmem:[#allocation87_spill] sm:$0xff]  ;;  %v5032_v45 = vld [vmem:[#allocation86_spill] sm:$0xff] }
 0x19b   :  { %v1083_v12 = vpack.c.bf16 %v1081_v23, %v1081_v23  ;;  %v5034_v23 = vld [vmem:[#allocation88_spill] sm:$0xff] }
 0x19d   :  { %1116 = vmatprep.mubr.bf16.mxu0 %v1083_v12  ;;  %1157 = vmatprep.mubr.bf16.mxu1 %v1083_v12 }
 0x19e   :  { %1117 = vmatmul.mubr.bf16.vlgmr.msra.gmra.mrb[8].mxu0 %v3624_v39  ;;  %1158 = vmatmul.mubr.bf16.vlgmr.msra.gmra.mrb[8].mxu1 %v3624_v39 }
 0x19f   :  { %1167 = vmatpush1.bf16.msra.mxu0 %v5018_v54  ;;  %1208 = vmatpush1.bf16.msra.mxu1 %v5019_v20 }
 0x1a0   :  { %1198 = vmatprep.mubr.bf16.mxu0 %v1083_v12  ;;  %1239 = vmatprep.mubr.bf16.mxu1 %v1083_v12  ;;  %v5035_v12 = vld [vmem:[#allocation91_spill] sm:$0xff] }
 0x1a1   :  { %1168 = vmatprep.subr.bf16.mxu0 %v5020_v11  ;;  %1209 = vmatprep.subr.bf16.mxu1 %v5021_v3 }
 0x1a3   :  { %1169 = vmatpush1.bf16.msra.mxu0 %v5022_v4  ;;  %1210 = vmatpush1.bf16.msra.mxu1 %v5023_v0 }
 0x1a4   :  { %1170 = vmatprep.subr.bf16.mxu0 %v5024_v28  ;;  %1211 = vmatprep.subr.bf16.mxu1 %v5025_v37  ;;  %v5036_v37 = vld [vmem:[#allocation90_spill] sm:$0xff] }
 0x1a7   :  { %1171 = vmatpush1.bf16.msra.mxu0 %v5026_v2  ;;  %1212 = vmatpush1.bf16.msra.mxu1 %v5027_v10  ;;  %v5037_v2 = vld [vmem:[#allocation93_spill] sm:$0xff]  ;;  %v5038_v10 = vld [vmem:[#allocation92_spill] sm:$0xff] }
 0x1a8   :  { %1172 = vmatprep.subr.bf16.mxu0 %v5028_v49  ;;  %1213 = vmatprep.subr.bf16.mxu1 %v5029_v53  ;;  %v5039_v49 = vld [vmem:[#allocation95_spill] sm:$0xff]  ;;  %v5040_v53 = vld [vmem:[#allocation94_spill] sm:$0xff] }
 0x1ab   :  { %1173 = vmatpush1.bf16.msra.mxu0 %v5030_v44  ;;  %1214 = vmatpush1.bf16.msra.mxu1 %v5031_v30  ;;  %v5041_v44 = vld [vmem:[#allocation97_spill] sm:$0xff]  ;;  %v5042_v30 = vld [vmem:[#allocation96_spill] sm:$0xff] }
 0x1ac   :  { %1174 = vmatprep.subr.bf16.mxu0 %v5032_v45  ;;  %1215 = vmatprep.subr.bf16.mxu1 %v5033_v17  ;;  %v5043_v45 = vld [vmem:[#allocation99_spill] sm:$0xff]  ;;  %v5044_v17 = vld [vmem:[#allocation98_spill] sm:$0xff] }
 0x1af   :  { %1175 = vmatpush1.bf16.msra.mxu0 %v5034_v23  ;;  %1216 = vmatpush1.bf16.msra.mxu1 %v5035_v12  ;;  %v5045_v23 = vld [vmem:[#allocation101_spill] sm:$0xff]  ;;  %v5046_v12 = vld [vmem:[#allocation100_spill] sm:$0xff] }
 0x1b0   :  { %1176 = vmatprep.subr.bf16.mxu0 %v5036_v37  ;;  %1217 = vmatprep.subr.bf16.mxu1 %v5037_v2  ;;  %v5047_v37 = vld [vmem:[#allocation103_spill] sm:$0xff]  ;;  %v5048_v2 = vld [vmem:[#allocation102_spill] sm:$0xff] }
 0x1b3   :  { %1177 = vmatpush1.bf16.msra.mxu0 %v5038_v10  ;;  %1218 = vmatpush1.bf16.msra.mxu1 %v5039_v49  ;;  %v5049_v10 = vld [vmem:[#allocation105_spill] sm:$0xff]  ;;  %v5050_v49 = vld [vmem:[#allocation104_spill] sm:$0xff] }
 0x1b4   :  { %1178 = vmatprep.subr.bf16.mxu0 %v5040_v53  ;;  %1219 = vmatprep.subr.bf16.mxu1 %v5041_v44  ;;  %v5051_v53 = vld [vmem:[#allocation107_spill] sm:$0xff]  ;;  %v5052_v44 = vld [vmem:[#allocation106_spill] sm:$0xff] }
 0x1b7   :  { %1179 = vmatpush1.bf16.msra.mxu0 %v5042_v30  ;;  %1220 = vmatpush1.bf16.msra.mxu1 %v5043_v45  ;;  %v5053_v30 = vld [vmem:[#allocation109_spill] sm:$0xff]  ;;  %v5054_v45 = vld [vmem:[#allocation108_spill] sm:$0xff] }
 0x1b8   :  { %1180 = vmatprep.subr.bf16.mxu0 %v5044_v17  ;;  %1221 = vmatprep.subr.bf16.mxu1 %v5045_v23  ;;  %v5055_v17 = vld [vmem:[#allocation111_spill] sm:$0xff]  ;;  %v5056_v23 = vld [vmem:[#allocation110_spill] sm:$0xff] }
 0x1bb   :  { %1181 = vmatpush1.bf16.msra.mxu0 %v5046_v12  ;;  %1222 = vmatpush1.bf16.msra.mxu1 %v5047_v37  ;;  %v5057_v12 = vld [vmem:[#allocation113_spill] sm:$0xff]  ;;  %v5058_v37 = vld [vmem:[#allocation112_spill] sm:$0xff] }
 0x1bc   :  { %1182 = vmatprep.subr.bf16.mxu0 %v5048_v2  ;;  %1223 = vmatprep.subr.bf16.mxu1 %v5049_v10  ;;  %v5059_v2 = vld [vmem:[#allocation115_spill] sm:$0xff]  ;;  %v5060_v10 = vld [vmem:[#allocation114_spill] sm:$0xff] }
 0x1bf   :  { %1183 = vmatpush1.bf16.msra.mxu0 %v5050_v49  ;;  %1224 = vmatpush1.bf16.msra.mxu1 %v5051_v53  ;;  %v5061_v49 = vld [vmem:[#allocation117_spill] sm:$0xff]  ;;  %v5062_v53 = vld [vmem:[#allocation116_spill] sm:$0xff] }
 0x1c0   :  { %1184 = vmatprep.subr.bf16.mxu0 %v5052_v44  ;;  %1225 = vmatprep.subr.bf16.mxu1 %v5053_v30  ;;  %v5063_v30 = vld [vmem:[#allocation118_spill] sm:$0xff] }
 0x1c3   :  { %1185 = vmatpush1.bf16.msra.mxu0 %v5054_v45  ;;  %1226 = vmatpush1.bf16.msra.mxu1 %v5055_v17  ;;  %v5064_v45 = vld [vmem:[#allocation121_spill] sm:$0xff]  ;;  %v5065_v17 = vld [vmem:[#allocation120_spill] sm:$0xff] }
 0x1c4   :  { %1186 = vmatprep.subr.bf16.mxu0 %v5056_v23  ;;  %1227 = vmatprep.subr.bf16.mxu1 %v5057_v12  ;;  %v5066_v12 = vld [vmem:[#allocation122_spill] sm:$0xff] }
 0x1c7   :  { %1187 = vmatpush1.bf16.msra.mxu0 %v5058_v37  ;;  %1228 = vmatpush1.bf16.msra.mxu1 %v5059_v2 }
 0x1c8   :  { %1188 = vmatprep.subr.bf16.mxu0 %v5060_v10  ;;  %1229 = vmatprep.subr.bf16.mxu1 %v5061_v49 }
 0x1cb   :  { %1189 = vmatpush1.bf16.msra.mxu0 %v5062_v53  ;;  %1230 = vmatpush1.bf16.msra.mxu1 %v3471_v36 }
 0x1cc   :  { %1190 = vmatprep.subr.bf16.mxu0 %v5063_v30  ;;  %1231 = vmatprep.subr.bf16.mxu1 %v5064_v45 }
 0x1cf   :  { %1191 = vmatpush1.bf16.msra.mxu0 %v5065_v17  ;;  %1232 = vmatpush1.bf16.msra.mxu1 %v3483_v29 }
 0x1d0   :  { %1192 = vmatprep.subr.bf16.mxu0 %v5066_v12  ;;  %1233 = vmatprep.subr.bf16.mxu1 %v3489_v22 }
 0x1d3   :  { %1193 = vmatpush1.bf16.msra.mxu0 %v3486_v1  ;;  %1234 = vmatpush1.bf16.msra.mxu1 %v3495_v46 }
 0x1d4   :  { %1194 = vmatprep.subr.bf16.mxu0 %v3492_v38  ;;  %1235 = vmatprep.subr.bf16.mxu1 %v3501_v57 }
 0x1d7   :  { %1195 = vmatpush1.bf16.msra.mxu0 %v3498_v7  ;;  %1236 = vmatpush1.bf16.msra.mxu1 %v3507_v21 }
 0x1d8   :  { %1196 = vmatprep.subr.bf16.mxu0 %v3504_v47  ;;  %1237 = vmatprep.subr.bf16.mxu1 %v3513_v58 }
 0x1db   :  { %1197 = vmatpush1.bf16.msra.mxu0 %v3510_v56  ;;  %1238 = vmatpush1.bf16.msra.mxu1 %v3517_v59 }
 0x1dc   :  { %1311 = vmatprep.subr.bf16.mxu0 %v3117_v5  ;;  %1352 = vmatprep.subr.bf16.mxu1 %v3127_v14 }
 0x1de   :  { %1199 = vmatmul.mubr.bf16.vlgmr.msra.gmra.mrb[12].mxu0 %v3624_v39  ;;  %1240 = vmatmul.mubr.bf16.vlgmr.msra.gmra.mrb[12].mxu1 %v3624_v39  ;;  %v5067_v39 = vld [vmem:[#allocation34_spill] sm:$0xff] }
 0x1df   :  { %1312 = vmatpush1.bf16.msra.mxu0 %v3119_v6  ;;  %1353 = vmatpush1.bf16.msra.mxu1 %v3129_v15 }
 0x1e0   :  { %1313 = vmatprep.subr.bf16.mxu0 %v3121_v8  ;;  %1354 = vmatprep.subr.bf16.mxu1 %v3134_v19 }
 0x1e3   :  { %1314 = vmatpush1.bf16.msra.mxu0 %v3125_v13  ;;  %1355 = vmatpush1.bf16.msra.mxu1 %v3138_v24 }
 0x1e4   :  { %1315 = vmatprep.subr.bf16.mxu0 %v3132_v18  ;;  %1356 = vmatprep.subr.bf16.mxu1 %v3144_v26 }
 0x1e7   :  { %1316 = vmatpush1.bf16.msra.mxu0 %v3141_v25  ;;  %1357 = vmatpush1.bf16.msra.mxu1 %v3150_v32 }
 0x1e8   :  { %1317 = vmatprep.subr.bf16.mxu0 %v3147_v27  ;;  %1358 = vmatprep.subr.bf16.mxu1 %v3156_v34  ;;  %v2719_v34 = vld [vmem:[%s4574_s0 + $0x50] sm:$0xff] }
 0x1eb   :  { %1318 = vmatpush1.bf16.msra.mxu0 %v3153_v33  ;;  %1359 = vmatpush1.bf16.msra.mxu1 %v3162_v40 }
 0x1ec   :  { %1319 = vmatprep.subr.bf16.mxu0 %v3159_v35  ;;  %1360 = vmatprep.subr.bf16.mxu1 %v3168_v42  ;;  %v5068_v42 = vld [vmem:[#allocation33_spill] sm:$0xff] }
 0x1ef   :  { %1320 = vmatpush1.bf16.msra.mxu0 %v3165_v41  ;;  %1361 = vmatpush1.bf16.msra.mxu1 %v3174_v48  ;;  %v5069_v41 = vld [vmem:[#allocation36_spill] sm:$0xff]  ;;  %v5070_v48 = vld [vmem:[#allocation35_spill] sm:$0xff] }
 0x1f0   :  { %1321 = vmatprep.subr.bf16.mxu0 %v3171_v43  ;;  %1362 = vmatprep.subr.bf16.mxu1 %v3186_v52  ;;  %v5071_v43 = vld [vmem:[#allocation38_spill] sm:$0xff]  ;;  %v5072_v52 = vld [vmem:[#allocation37_spill] sm:$0xff] }
 0x1f3   :  { %1322 = vmatpush1.bf16.msra.mxu0 %v3183_v51  ;;  %1363 = vmatpush1.bf16.msra.mxu1 %v3192_v60  ;;  %v5073_v51 = vld [vmem:[#allocation40_spill] sm:$0xff]  ;;  %v5074_v60 = vld [vmem:[#allocation39_spill] sm:$0xff] }
 0x1f4   :  { %1323 = vmatprep.subr.bf16.mxu0 %v3189_v55  ;;  %1364 = vmatprep.subr.bf16.mxu1 %v3198_v62  ;;  %v5075_v55 = vld [vmem:[#allocation42_spill] sm:$0xff]  ;;  %v5076_v62 = vld [vmem:[#allocation41_spill] sm:$0xff] }
 0x1f7   :  { %1324 = vmatpush1.bf16.msra.mxu0 %v3195_v61  ;;  %1365 = vmatpush1.bf16.msra.mxu1 %v5067_v39  ;;  %v5077_v61 = vld [vmem:[#allocation44_spill] sm:$0xff]  ;;  %v5078_v39 = vld [vmem:[#allocation43_spill] sm:$0xff] }
 0x1f8   :  { %1325 = vmatprep.subr.bf16.mxu0 %v5068_v42  ;;  %1366 = vmatprep.subr.bf16.mxu1 %v5069_v41  ;;  %v5079_v42 = vld [vmem:[#allocation46_spill] sm:$0xff]  ;;  %v5080_v41 = vld [vmem:[#allocation45_spill] sm:$0xff] }
 0x1fb   :  { %1326 = vmatpush1.bf16.msra.mxu0 %v5070_v48  ;;  %1367 = vmatpush1.bf16.msra.mxu1 %v5071_v43  ;;  %v5081_v48 = vld [vmem:[#allocation48_spill] sm:$0xff]  ;;  %v5082_v43 = vld [vmem:[#allocation47_spill] sm:$0xff] }
 0x1fc   :  { %1327 = vmatprep.subr.bf16.mxu0 %v5072_v52  ;;  %1368 = vmatprep.subr.bf16.mxu1 %v5073_v51  ;;  %v5083_v52 = vld [vmem:[#allocation50_spill] sm:$0xff]  ;;  %v5084_v51 = vld [vmem:[#allocation49_spill] sm:$0xff] }
 0x1ff   :  { %1328 = vmatpush1.bf16.msra.mxu0 %v5074_v60  ;;  %1369 = vmatpush1.bf16.msra.mxu1 %v5075_v55  ;;  %v5085_v60 = vld [vmem:[#allocation52_spill] sm:$0xff]  ;;  %v5086_v55 = vld [vmem:[#allocation51_spill] sm:$0xff] }
 0x200   :  { %1329 = vmatprep.subr.bf16.mxu0 %v5076_v62  ;;  %1370 = vmatprep.subr.bf16.mxu1 %v5077_v61  ;;  %v5087_v62 = vld [vmem:[#allocation54_spill] sm:$0xff]  ;;  %v5088_v61 = vld [vmem:[#allocation53_spill] sm:$0xff] }
 0x203   :  { %1330 = vmatpush1.bf16.msra.mxu0 %v5078_v39  ;;  %1371 = vmatpush1.bf16.msra.mxu1 %v5079_v42  ;;  %v5089_v39 = vld [vmem:[#allocation56_spill] sm:$0xff]  ;;  %v5090_v42 = vld [vmem:[#allocation55_spill] sm:$0xff] }
 0x204   :  { %1331 = vmatprep.subr.bf16.mxu0 %v5080_v41  ;;  %1372 = vmatprep.subr.bf16.mxu1 %v5081_v48  ;;  %v5091_v41 = vld [vmem:[#allocation59_spill] sm:$0xff]  ;;  %v5092_v48 = vld [vmem:[#allocation57_spill] sm:$0xff] }
 0x207   :  { %1332 = vmatpush1.bf16.msra.mxu0 %v5082_v43  ;;  %1373 = vmatpush1.bf16.msra.mxu1 %v5083_v52  ;;  %v5093_v43 = vld [vmem:[#allocation61_spill] sm:$0xff]  ;;  %v5094_v52 = vld [vmem:[#allocation60_spill] sm:$0xff] }
 0x208   :  { %1333 = vmatprep.subr.bf16.mxu0 %v5084_v51  ;;  %1374 = vmatprep.subr.bf16.mxu1 %v5085_v60  ;;  %v5095_v51 = vld [vmem:[#allocation63_spill] sm:$0xff]  ;;  %v5096_v60 = vld [vmem:[#allocation62_spill] sm:$0xff] }
 0x20b   :  { %1334 = vmatpush1.bf16.msra.mxu0 %v5086_v55  ;;  %1375 = vmatpush1.bf16.msra.mxu1 %v5087_v62  ;;  %v5097_v55 = vld [vmem:[#allocation65_spill] sm:$0xff]  ;;  %v5098_v62 = vld [vmem:[#allocation64_spill] sm:$0xff] }
 0x20c   :  { %1335 = vmatprep.subr.bf16.mxu0 %v5088_v61  ;;  %1376 = vmatprep.subr.bf16.mxu1 %v5089_v39  ;;  %v5099_v61 = vld [vmem:[#allocation67_spill] sm:$0xff]  ;;  %v5100_v39 = vld [vmem:[#allocation66_spill] sm:$0xff] }
 0x20f   :  { %1336 = vmatpush1.bf16.msra.mxu0 %v5090_v42  ;;  %1377 = vmatpush1.bf16.msra.mxu1 %v5091_v41  ;;  %v5101_v42 = vld [vmem:[#allocation69_spill] sm:$0xff]  ;;  %v5102_v41 = vld [vmem:[#allocation68_spill] sm:$0xff] }
 0x210   :  { %1337 = vmatprep.subr.bf16.mxu0 %v5092_v48  ;;  %1378 = vmatprep.subr.bf16.mxu1 %v5093_v43  ;;  %v5103_v48 = vld [vmem:[#allocation71_spill] sm:$0xff]  ;;  %v5104_v43 = vld [vmem:[#allocation70_spill] sm:$0xff] }
 0x213   :  { %1338 = vmatpush1.bf16.msra.mxu0 %v5094_v52  ;;  %1379 = vmatpush1.bf16.msra.mxu1 %v5095_v51  ;;  %v5105_v52 = vld [vmem:[#allocation73_spill] sm:$0xff] }
 0x214   :  { %1339 = vmatprep.subr.bf16.mxu0 %v5096_v60  ;;  %1380 = vmatprep.subr.bf16.mxu1 %v5097_v55  ;;  %v2717_v55 = vld [vmem:[%s4574_s0 + $0x40] sm:$0xff] }
 0x217   :  { %1340 = vmatpush1.bf16.msra.mxu0 %v5098_v62  ;;  %1381 = vmatpush1.bf16.msra.mxu1 %v5099_v61  ;;  %v2718_v61 = vld [vmem:[%s4574_s0 + $0x48] sm:$0xff] }
 0x218   :  { %1341 = vmatprep.subr.bf16.mxu0 %v5100_v39  ;;  %1382 = vmatprep.subr.bf16.mxu1 %v5101_v42 }
 0x21b   :  { %1342 = vmatpush1.bf16.msra.mxu0 %v5102_v41  ;;  %1383 = vmatpush1.bf16.msra.mxu1 %v5103_v48 }
 0x21c   :  { %1393 = vmatprep.subr.bf16.mxu0 %v5104_v43  ;;  %1434 = vmatprep.subr.bf16.mxu1 %v5105_v52 }
 0x271   :  { %v1118_v62 = vpop.f32.mrb[8].mxu0  ;;  %v1159_v39 = vpop.f32.mrb[8].mxu1 }
 0x272   :  { %v1253_v60 = vadd.f32 %v2717_v55, %v1118_v62  ;;  %v1120_v42 = vpop.f32.mrb[9].mxu0  ;;  %v1161_v51 = vpop.f32.mrb[9].mxu1  ;;  %v1255_v27 = vadd.f32 %v2719_v34, %v1159_v39 }
 0x273   :  { %v1254_v41 = vadd.f32 %v2718_v61, %v1120_v42  ;;  %v1122_v35 = vpop.f32.mrb[10].mxu0  ;;  %v1163_v48 = vpop.f32.mrb[10].mxu1 }
 0x274   :  { %v2721_v40 = vmul.f32 -1.442695, %v1253_v60  ;;  %v1123_v43 = vpop.f32.mrb[11].mxu0  ;;  %v1164_v33 = vpop.f32.mrb[11].mxu1  ;;  %v5106_v60 = vld [vmem:[#allocation58_spill] sm:$0xff] }
 0x275   :  { %v2722_v52 = vmul.f32 -1.442695, %v1254_v41 }
 0x276   :  { %2834 = vpow2.f32 %v2721_v40 }
 0x277   :  { %2836 = vpow2.f32 %v2722_v52 }
 0x278   :  { %2838 = vtanh.f32 %v1255_v27 }
 0x280   :  { %v2835_v32 = vpop.eup %2834 }
 0x281   :  { %v2837_v25 = vpop.eup %2836  ;;  %v1264_v26 = vadd.f32 1.0, %v2835_v32 }
 0x282   :  { %v1270_v55 = vadd.f32 1.0, %v2837_v25  ;;  %v2839_v35 = vpop.eup %2838 }
 0x283   :  { %2840 = vrcp.f32 %v1264_v26 }
 0x284   :  { %2842 = vrcp.f32 %v1270_v55 }
 0x28d   :  { %v2841_v42 = vpop.eup %2840 }
 0x28e   :  { %v2843_v48 = vpop.eup %2842  ;;  %v1281_v43 = vmul.f32 %v2841_v42, %v2839_v35  ;;  %v2720_v35 = vld [vmem:[%s4574_s0 + $0x58] sm:$0xff] }
 0x28f   :  { %v1280_v33 = vmul.f32 %v2843_v48, %v3600_v50  ;;  %v1256_v42 = vadd.f32 %v2720_v35, %v1161_v51 }
 0x291   :  { %v3768_v40 = vadd.f32 %v1281_v43, %v1280_v33  ;;  %v2723_v43 = vmul.f32 -1.442695, %v1256_v42 }
 0x2b1   :  { %v1200_v41 = vpop.f32.mrb[12].mxu0  ;;  %v1241_v52 = vpop.f32.mrb[12].mxu1 }
 0x2b2   :  { %v1257_v61 = vadd.f32 %v1200_v41, %v5106_v60  ;;  %v1202_v34 = vpop.f32.mrb[13].mxu0  ;;  %v1243_v62 = vpop.f32.mrb[13].mxu1  ;;  %v1259_v41 = vadd.f32 %v1241_v52, %v3617_v63 }
 0x2b3   :  { %v1258_v32 = vadd.f32 %v1202_v34, %v3607_v31  ;;  %v1204_v27 = vpop.f32.mrb[14].mxu0  ;;  %v1245_v25 = vpop.f32.mrb[14].mxu1  ;;  %v1260_v48 = vadd.f32 %v1243_v62, %v3614_v16 }
 0x2b4   :  { %v2724_v26 = vmul.f32 -1.442695, %v1257_v61  ;;  %v1205_v39 = vpop.f32.mrb[15].mxu0  ;;  %v1246_v55 = vpop.f32.mrb[15].mxu1 }
 0x2b5   :  { %v2725_v50 = vmul.f32 -1.442695, %v1258_v32  ;;  %v2726_v33 = vmul.f32 -1.442695, %v1260_v48 }
 0x2b6   :  { %2844 = vpow2.f32 %v2724_v26 }
 0x2b7   :  { %2846 = vpow2.f32 %v2725_v50 }
 0x2b8   :  { %2848 = vpow2.f32 %v2723_v43 }
 0x2b9   :  { %2850 = vpow2.f32 %v2726_v33 }
 0x2ba   :  { %2852 = vtanh.f32 %v1259_v41 }
 0x2c0   :  { %v2845_v34 = vpop.eup %2844 }
 0x2c1   :  { %v2847_v27 = vpop.eup %2846  ;;  %v1288_v61 = vadd.f32 1.0, %v2845_v34 }
 0x2c2   :  { %v1294_v25 = vadd.f32 1.0, %v2847_v27  ;;  %v2849_v39 = vpop.eup %2848 }
 0x2c3   :  { %2854 = vrcp.f32 %v1288_v61  ;;  %v2851_v32 = vpop.eup %2850  ;;  %v1277_v51 = vadd.f32 1.0, %v2849_v39  ;;  %v5108_v39 = vld [vmem:[#allocation80_spill] sm:$0xff] }
 0x2c4   :  { %2856 = vrcp.f32 %v1294_v25  ;;  %v2853_v26 = vpop.eup %2852  ;;  %v1301_v50 = vadd.f32 1.0, %v2851_v32  ;;  %v5109_v32 = vld [vmem:[#allocation83_spill] sm:$0xff] }
 0x2c5   :  { %2858 = vtanh.f32 %v3768_v40 }
 0x2c6   :  { %2860 = vrcp.f32 %v1277_v51  ;;  %v5112_v51 = vld [vmem:[#allocation84_spill] sm:$0xff] }
 0x2c7   :  { %2862 = vrcp.f32 %v1301_v50  ;;  %v5115_v50 = vld [vmem:[#allocation89_spill] sm:$0xff] }
 0x2cd   :  { %v2855_v55 = vpop.eup %2854 }
 0x2ce   :  { %v2857_v35 = vpop.eup %2856  ;;  %v1305_v62 = vmul.f32 %v2855_v55, %v2853_v26  ;;  %v5110_v26 = vld [vmem:[#allocation82_spill] sm:$0xff]  ;;  %v5111_v55 = vld [vmem:[#allocation85_spill] sm:$0xff] }
 0x2cf   :  { %v1304_v42 = vmul.f32 %v2857_v35, %v3621_v9  ;;  %v2859_v48 = vpop.eup %2858  ;;  %v5107_v9 = vld [vmem:[#allocation81_spill] sm:$0xff]  ;;  %v5113_v35 = vld [vmem:[#allocation87_spill] sm:$0xff] }
 0x2d0   :  { %v2861_v43 = vpop.eup %2860 }
 0x2d1   :  { %v3779_v52 = vadd.f32 %v1305_v62, %v1304_v42  ;;  %v2863_v33 = vpop.eup %2862  ;;  %v1284_v34 = vmul.f32 %v2861_v43, %v2859_v48  ;;  %v5114_v62 = vld [vmem:[#allocation86_spill] sm:$0xff]  ;;  %v5116_v42 = vld [vmem:[#allocation88_spill] sm:$0xff]  ;;  %v5117_v48 = vld [vmem:[#allocation91_spill] sm:$0xff] }
 0x2d2   :  { %v5118_v43 = vld [vmem:[#allocation90_spill] sm:$0xff] }
 0x2d3   :  { %2864 = vtanh.f32 %v3779_v52  ;;  %v3782_v25 = vpack.c.bf16 %v1284_v34, %v1284_v34  ;;  %v5121_v34 = vld [vmem:[#allocation95_spill] sm:$0xff] }
 0x2dd   :  { %v2865_v41 = vpop.eup %2864 }
 0x2de   :  { %v1308_v27 = vmul.f32 %v2865_v41, %v2863_v33  ;;  %v5119_v33 = vld [vmem:[#allocation93_spill] sm:$0xff]  ;;  %v5120_v41 = vld [vmem:[#allocation92_spill] sm:$0xff] }
 0x2e0   :  { %v1310_v61 = vpack.c.bf16 %v1308_v27, %v1308_v27  ;;  %v5122_v27 = vld [vmem:[#allocation94_spill] sm:$0xff] }
 0x2e2   :  { %1343 = vmatprep.mubr.bf16.mxu0 %v1310_v61  ;;  %1384 = vmatprep.mubr.bf16.mxu1 %v1310_v61 }
 0x2e3   :  { %1344 = vmatmul.mubr.bf16.vlgmr.msra.gmra.mrb[16].mxu0 %v3782_v25  ;;  %1385 = vmatmul.mubr.bf16.vlgmr.msra.gmra.mrb[16].mxu1 %v3782_v25 }
 0x2e4   :  { %1394 = vmatpush1.bf16.msra.mxu0 %v5018_v54  ;;  %1435 = vmatpush1.bf16.msra.mxu1 %v5019_v20 }
 0x2e5   :  { %1425 = vmatprep.mubr.bf16.mxu0 %v1310_v61  ;;  %1466 = vmatprep.mubr.bf16.mxu1 %v1310_v61  ;;  %v5123_v61 = vld [vmem:[#allocation97_spill] sm:$0xff] }
 0x2e6   :  { %1395 = vmatprep.subr.bf16.mxu0 %v5020_v11  ;;  %1436 = vmatprep.subr.bf16.mxu1 %v5021_v3 }
 0x2e8   :  { %1396 = vmatpush1.bf16.msra.mxu0 %v5022_v4  ;;  %1437 = vmatpush1.bf16.msra.mxu1 %v5023_v0 }
 0x2e9   :  { %1397 = vmatprep.subr.bf16.mxu0 %v5024_v28  ;;  %1438 = vmatprep.subr.bf16.mxu1 %v5107_v9 }
 0x2ec   :  { %1398 = vmatpush1.bf16.msra.mxu0 %v5108_v39  ;;  %1439 = vmatpush1.bf16.msra.mxu1 %v5109_v32 }
 0x2ed   :  { %1399 = vmatprep.subr.bf16.mxu0 %v5110_v26  ;;  %1440 = vmatprep.subr.bf16.mxu1 %v5111_v55 }
 0x2f0   :  { %1400 = vmatpush1.bf16.msra.mxu0 %v5112_v51  ;;  %1441 = vmatpush1.bf16.msra.mxu1 %v5113_v35  ;;  %v5124_v35 = vld [vmem:[#allocation96_spill] sm:$0xff] }
 0x2f1   :  { %1401 = vmatprep.subr.bf16.mxu0 %v5114_v62  ;;  %1442 = vmatprep.subr.bf16.mxu1 %v5115_v50  ;;  %v5125_v62 = vld [vmem:[#allocation99_spill] sm:$0xff]  ;;  %v5126_v50 = vld [vmem:[#allocation98_spill] sm:$0xff] }
 0x2f4   :  { %1402 = vmatpush1.bf16.msra.mxu0 %v5116_v42  ;;  %1443 = vmatpush1.bf16.msra.mxu1 %v5117_v48  ;;  %v5127_v42 = vld [vmem:[#allocation101_spill] sm:$0xff]  ;;  %v5128_v48 = vld [vmem:[#allocation100_spill] sm:$0xff] }
 0x2f5   :  { %1403 = vmatprep.subr.bf16.mxu0 %v5118_v43  ;;  %1444 = vmatprep.subr.bf16.mxu1 %v5119_v33  ;;  %v5129_v43 = vld [vmem:[#allocation103_spill] sm:$0xff]  ;;  %v5130_v33 = vld [vmem:[#allocation102_spill] sm:$0xff] }
 0x2f8   :  { %1404 = vmatpush1.bf16.msra.mxu0 %v5120_v41  ;;  %1445 = vmatpush1.bf16.msra.mxu1 %v5121_v34  ;;  %v5131_v41 = vld [vmem:[#allocation105_spill] sm:$0xff]  ;;  %v5132_v34 = vld [vmem:[#allocation104_spill] sm:$0xff] }
 0x2f9   :  { %1405 = vmatprep.subr.bf16.mxu0 %v5122_v27  ;;  %1446 = vmatprep.subr.bf16.mxu1 %v5123_v61  ;;  %v5133_v27 = vld [vmem:[#allocation107_spill] sm:$0xff] }
 0x2fc   :  { %1406 = vmatpush1.bf16.msra.mxu0 %v5124_v35  ;;  %1447 = vmatpush1.bf16.msra.mxu1 %v5125_v62  ;;  %v5134_v35 = vld [vmem:[#allocation109_spill] sm:$0xff]  ;;  %v5135_v62 = vld [vmem:[#allocation108_spill] sm:$0xff] }
 0x2fd   :  { %1407 = vmatprep.subr.bf16.mxu0 %v5126_v50  ;;  %1448 = vmatprep.subr.bf16.mxu1 %v5127_v42  ;;  %v5136_v50 = vld [vmem:[#allocation111_spill] sm:$0xff] }
 0x300   :  { %1408 = vmatpush1.bf16.msra.mxu0 %v5128_v48  ;;  %1449 = vmatpush1.bf16.msra.mxu1 %v5129_v43  ;;  %v5137_v48 = vld [vmem:[#allocation113_spill] sm:$0xff] }
 0x301   :  { %1409 = vmatprep.subr.bf16.mxu0 %v5130_v33  ;;  %1450 = vmatprep.subr.bf16.mxu1 %v5131_v41 }
 0x304   :  { %1410 = vmatpush1.bf16.msra.mxu0 %v5132_v34  ;;  %1451 = vmatpush1.bf16.msra.mxu1 %v5133_v27 }
 0x305   :  { %1411 = vmatprep.subr.bf16.mxu0 %v5052_v44  ;;  %1452 = vmatprep.subr.bf16.mxu1 %v5134_v35 }
 0x308   :  { %1412 = vmatpush1.bf16.msra.mxu0 %v5135_v62  ;;  %1453 = vmatpush1.bf16.msra.mxu1 %v5136_v50 }
 0x309   :  { %1413 = vmatprep.subr.bf16.mxu0 %v5056_v23  ;;  %1454 = vmatprep.subr.bf16.mxu1 %v5137_v48 }
 0x30c   :  { %1414 = vmatpush1.bf16.msra.mxu0 %v5058_v37  ;;  %1455 = vmatpush1.bf16.msra.mxu1 %v5059_v2 }
 0x30d   :  { %1415 = vmatprep.subr.bf16.mxu0 %v5060_v10  ;;  %1456 = vmatprep.subr.bf16.mxu1 %v5061_v49 }
 0x310   :  { %1416 = vmatpush1.bf16.msra.mxu0 %v5062_v53  ;;  %1457 = vmatpush1.bf16.msra.mxu1 %v3471_v36 }
 0x311   :  { %1417 = vmatprep.subr.bf16.mxu0 %v5063_v30  ;;  %1458 = vmatprep.subr.bf16.mxu1 %v5064_v45 }
 0x314   :  { %1418 = vmatpush1.bf16.msra.mxu0 %v5065_v17  ;;  %1459 = vmatpush1.bf16.msra.mxu1 %v3483_v29 }
 0x315   :  { %1419 = vmatprep.subr.bf16.mxu0 %v5066_v12  ;;  %1460 = vmatprep.subr.bf16.mxu1 %v3489_v22 }
 0x318   :  { %1420 = vmatpush1.bf16.msra.mxu0 %v3486_v1  ;;  %1461 = vmatpush1.bf16.msra.mxu1 %v3495_v46 }
 0x319   :  { %1421 = vmatprep.subr.bf16.mxu0 %v3492_v38  ;;  %1462 = vmatprep.subr.bf16.mxu1 %v3501_v57 }
 0x31c   :  { %1422 = vmatpush1.bf16.msra.mxu0 %v3498_v7  ;;  %1463 = vmatpush1.bf16.msra.mxu1 %v3507_v21  ;;  %v2729_v21 = vld [vmem:[%s4574_s0 + $0x70] sm:$0xff] }
 0x31d   :  { %1423 = vmatprep.subr.bf16.mxu0 %v3504_v47  ;;  %1464 = vmatprep.subr.bf16.mxu1 %v3513_v58 }
 0x320   :  { %1424 = vmatpush1.bf16.msra.mxu0 %v3510_v56  ;;  %1465 = vmatpush1.bf16.msra.mxu1 %v3517_v59  ;;  %v5140_v59 = vld [vmem:[#allocation18_spill] sm:$0xff] }
 0x321   :  { %1538 = vmatprep.subr.bf16.mxu0 %v3117_v5  ;;  %1579 = vmatprep.subr.bf16.mxu1 %v3127_v14  ;;  %v5138_v5 = vld [vmem:[#allocation16_spill] sm:$0xff]  ;;  %v5139_v14 = vld [vmem:[#allocation15_spill] sm:$0xff] }
 0x323   :  { %1426 = vmatmul.mubr.bf16.vlgmr.msra.gmra.mrb[20].mxu0 %v3782_v25  ;;  %1467 = vmatmul.mubr.bf16.vlgmr.msra.gmra.mrb[20].mxu1 %v3782_v25  ;;  %v5141_v25 = vld [vmem:[#allocation17_spill] sm:$0xff] }
 0x324   :  { %1539 = vmatpush1.bf16.msra.mxu0 %v3119_v6  ;;  %1580 = vmatpush1.bf16.msra.mxu1 %v3129_v15  ;;  %v5142_v6 = vld [vmem:[#allocation20_spill] sm:$0xff]  ;;  %v5143_v15 = vld [vmem:[#allocation19_spill] sm:$0xff] }
 0x325   :  { %1540 = vmatprep.subr.bf16.mxu0 %v3121_v8  ;;  %1581 = vmatprep.subr.bf16.mxu1 %v3134_v19  ;;  %v5144_v8 = vld [vmem:[#allocation22_spill] sm:$0xff]  ;;  %v5145_v19 = vld [vmem:[#allocation21_spill] sm:$0xff] }
 0x328   :  { %1541 = vmatpush1.bf16.msra.mxu0 %v3125_v13  ;;  %1582 = vmatpush1.bf16.msra.mxu1 %v3138_v24  ;;  %v5146_v13 = vld [vmem:[#allocation24_spill] sm:$0xff]  ;;  %v5147_v24 = vld [vmem:[#allocation23_spill] sm:$0xff] }
 0x329   :  { %1542 = vmatprep.subr.bf16.mxu0 %v3132_v18  ;;  %1583 = vmatprep.subr.bf16.mxu1 %v5138_v5  ;;  %v5148_v18 = vld [vmem:[#allocation26_spill] sm:$0xff]  ;;  %v5149_v5 = vld [vmem:[#allocation25_spill] sm:$0xff] }
 0x32c   :  { %1543 = vmatpush1.bf16.msra.mxu0 %v5139_v14  ;;  %1584 = vmatpush1.bf16.msra.mxu1 %v5140_v59  ;;  %v5150_v14 = vld [vmem:[#allocation28_spill] sm:$0xff]  ;;  %v5151_v59 = vld [vmem:[#allocation27_spill] sm:$0xff] }
 0x32d   :  { %1544 = vmatprep.subr.bf16.mxu0 %v5141_v25  ;;  %1585 = vmatprep.subr.bf16.mxu1 %v5142_v6  ;;  %v5152_v25 = vld [vmem:[#allocation30_spill] sm:$0xff]  ;;  %v5153_v6 = vld [vmem:[#allocation29_spill] sm:$0xff] }
 0x330   :  { %1545 = vmatpush1.bf16.msra.mxu0 %v5143_v15  ;;  %1586 = vmatpush1.bf16.msra.mxu1 %v5144_v8  ;;  %v5154_v15 = vld [vmem:[#allocation32_spill] sm:$0xff]  ;;  %v5155_v8 = vld [vmem:[#allocation31_spill] sm:$0xff] }
 0x331   :  { %1546 = vmatprep.subr.bf16.mxu0 %v5145_v19  ;;  %1587 = vmatprep.subr.bf16.mxu1 %v5146_v13  ;;  %v5156_v19 = vld [vmem:[#allocation34_spill] sm:$0xff]  ;;  %v5157_v13 = vld [vmem:[#allocation33_spill] sm:$0xff] }
 0x334   :  { %1547 = vmatpush1.bf16.msra.mxu0 %v5147_v24  ;;  %1588 = vmatpush1.bf16.msra.mxu1 %v5148_v18  ;;  %v5158_v24 = vld [vmem:[#allocation36_spill] sm:$0xff]  ;;  %v5159_v18 = vld [vmem:[#allocation35_spill] sm:$0xff] }
 0x335   :  { %1548 = vmatprep.subr.bf16.mxu0 %v5149_v5  ;;  %1589 = vmatprep.subr.bf16.mxu1 %v5150_v14  ;;  %v5160_v5 = vld [vmem:[#allocation38_spill] sm:$0xff]  ;;  %v5161_v14 = vld [vmem:[#allocation37_spill] sm:$0xff] }
 0x338   :  { %1549 = vmatpush1.bf16.msra.mxu0 %v5151_v59  ;;  %1590 = vmatpush1.bf16.msra.mxu1 %v5152_v25  ;;  %v5162_v59 = vld [vmem:[#allocation40_spill] sm:$0xff]  ;;  %v5163_v25 = vld [vmem:[#allocation39_spill] sm:$0xff] }
 0x339   :  { %1550 = vmatprep.subr.bf16.mxu0 %v5153_v6  ;;  %1591 = vmatprep.subr.bf16.mxu1 %v5154_v15  ;;  %v5164_v6 = vld [vmem:[#allocation42_spill] sm:$0xff]  ;;  %v5165_v15 = vld [vmem:[#allocation41_spill] sm:$0xff] }
 0x33c   :  { %1551 = vmatpush1.bf16.msra.mxu0 %v5155_v8  ;;  %1592 = vmatpush1.bf16.msra.mxu1 %v5156_v19  ;;  %v5166_v8 = vld [vmem:[#allocation44_spill] sm:$0xff]  ;;  %v5167_v19 = vld [vmem:[#allocation43_spill] sm:$0xff] }
 0x33d   :  { %1552 = vmatprep.subr.bf16.mxu0 %v5157_v13  ;;  %1593 = vmatprep.subr.bf16.mxu1 %v5158_v24  ;;  %v5168_v13 = vld [vmem:[#allocation46_spill] sm:$0xff]  ;;  %v5169_v24 = vld [vmem:[#allocation45_spill] sm:$0xff] }
 0x340   :  { %1553 = vmatpush1.bf16.msra.mxu0 %v5159_v18  ;;  %1594 = vmatpush1.bf16.msra.mxu1 %v5160_v5  ;;  %v5170_v18 = vld [vmem:[#allocation48_spill] sm:$0xff]  ;;  %v5171_v5 = vld [vmem:[#allocation47_spill] sm:$0xff] }
 0x341   :  { %1554 = vmatprep.subr.bf16.mxu0 %v5161_v14  ;;  %1595 = vmatprep.subr.bf16.mxu1 %v5162_v59  ;;  %v5172_v14 = vld [vmem:[#allocation50_spill] sm:$0xff]  ;;  %v5173_v59 = vld [vmem:[#allocation49_spill] sm:$0xff] }
 0x344   :  { %1555 = vmatpush1.bf16.msra.mxu0 %v5163_v25  ;;  %1596 = vmatpush1.bf16.msra.mxu1 %v5164_v6  ;;  %v5174_v25 = vld [vmem:[#allocation52_spill] sm:$0xff]  ;;  %v5175_v6 = vld [vmem:[#allocation51_spill] sm:$0xff] }
 0x345   :  { %1556 = vmatprep.subr.bf16.mxu0 %v5165_v15  ;;  %1597 = vmatprep.subr.bf16.mxu1 %v5166_v8  ;;  %v5176_v15 = vld [vmem:[#allocation54_spill] sm:$0xff]  ;;  %v5177_v8 = vld [vmem:[#allocation53_spill] sm:$0xff] }
 0x348   :  { %1557 = vmatpush1.bf16.msra.mxu0 %v5167_v19  ;;  %1598 = vmatpush1.bf16.msra.mxu1 %v5168_v13  ;;  %v5178_v19 = vld [vmem:[#allocation56_spill] sm:$0xff]  ;;  %v5179_v13 = vld [vmem:[#allocation55_spill] sm:$0xff] }
 0x349   :  { %1558 = vmatprep.subr.bf16.mxu0 %v5169_v24  ;;  %1599 = vmatprep.subr.bf16.mxu1 %v5170_v18  ;;  %v5180_v24 = vld [vmem:[#allocation59_spill] sm:$0xff]  ;;  %v5181_v18 = vld [vmem:[#allocation57_spill] sm:$0xff] }
 0x34c   :  { %1559 = vmatpush1.bf16.msra.mxu0 %v5171_v5  ;;  %1600 = vmatpush1.bf16.msra.mxu1 %v5172_v14  ;;  %v5182_v5 = vld [vmem:[#allocation61_spill] sm:$0xff]  ;;  %v5183_v14 = vld [vmem:[#allocation60_spill] sm:$0xff] }
 0x34d   :  { %1560 = vmatprep.subr.bf16.mxu0 %v5173_v59  ;;  %1601 = vmatprep.subr.bf16.mxu1 %v5174_v25  ;;  %v5184_v59 = vld [vmem:[#allocation63_spill] sm:$0xff]  ;;  %v5185_v25 = vld [vmem:[#allocation62_spill] sm:$0xff] }
 0x350   :  { %1561 = vmatpush1.bf16.msra.mxu0 %v5175_v6  ;;  %1602 = vmatpush1.bf16.msra.mxu1 %v5176_v15  ;;  %v5186_v6 = vld [vmem:[#allocation65_spill] sm:$0xff]  ;;  %v5187_v15 = vld [vmem:[#allocation64_spill] sm:$0xff] }
 0x351   :  { %1562 = vmatprep.subr.bf16.mxu0 %v5177_v8  ;;  %1603 = vmatprep.subr.bf16.mxu1 %v5178_v19  ;;  %v5188_v8 = vld [vmem:[#allocation67_spill] sm:$0xff]  ;;  %v5189_v19 = vld [vmem:[#allocation66_spill] sm:$0xff] }
 0x354   :  { %1563 = vmatpush1.bf16.msra.mxu0 %v5179_v13  ;;  %1604 = vmatpush1.bf16.msra.mxu1 %v5180_v24  ;;  %v5190_v13 = vld [vmem:[#allocation69_spill] sm:$0xff]  ;;  %v5191_v24 = vld [vmem:[#allocation68_spill] sm:$0xff] }
 0x355   :  { %1564 = vmatprep.subr.bf16.mxu0 %v5181_v18  ;;  %1605 = vmatprep.subr.bf16.mxu1 %v5182_v5  ;;  %v5192_v18 = vld [vmem:[#allocation71_spill] sm:$0xff]  ;;  %v5193_v5 = vld [vmem:[#allocation70_spill] sm:$0xff] }
 0x358   :  { %1565 = vmatpush1.bf16.msra.mxu0 %v5183_v14  ;;  %1606 = vmatpush1.bf16.msra.mxu1 %v5184_v59  ;;  %v5194_v14 = vld [vmem:[#allocation73_spill] sm:$0xff] }
 0x359   :  { %1566 = vmatprep.subr.bf16.mxu0 %v5185_v25  ;;  %1607 = vmatprep.subr.bf16.mxu1 %v5186_v6  ;;  %v2727_v6 = vld [vmem:[%s4574_s0 + $0x60] sm:$0xff] }
 0x35c   :  { %1567 = vmatpush1.bf16.msra.mxu0 %v5187_v15  ;;  %1608 = vmatpush1.bf16.msra.mxu1 %v5188_v8  ;;  %v2728_v8 = vld [vmem:[%s4574_s0 + $0x68] sm:$0xff] }
 0x35d   :  { %1568 = vmatprep.subr.bf16.mxu0 %v5189_v19  ;;  %1609 = vmatprep.subr.bf16.mxu1 %v5190_v13 }
 0x360   :  { %1569 = vmatpush1.bf16.msra.mxu0 %v5191_v24  ;;  %1610 = vmatpush1.bf16.msra.mxu1 %v5192_v18 }
 0x361   :  { %1620 = vmatprep.subr.bf16.mxu0 %v5193_v5  ;;  %1661 = vmatprep.subr.bf16.mxu1 %v5194_v14 }
 0x3b6   :  { %v1345_v15 = vpop.f32.mrb[16].mxu0  ;;  %v1386_v19 = vpop.f32.mrb[16].mxu1 }
 0x3b7   :  { %v1480_v25 = vadd.f32 %v2727_v6, %v1345_v15  ;;  %v1347_v13 = vpop.f32.mrb[17].mxu0  ;;  %v1388_v59 = vpop.f32.mrb[17].mxu1  ;;  %v1482_v7 = vadd.f32 %v2729_v21, %v1386_v19 }
 0x3b8   :  { %v1481_v24 = vadd.f32 %v2728_v8, %v1347_v13  ;;  %v1349_v56 = vpop.f32.mrb[18].mxu0  ;;  %v1390_v18 = vpop.f32.mrb[18].mxu1 }
 0x3b9   :  { %v2731_v58 = vmul.f32 -1.442695, %v1480_v25  ;;  %v1350_v5 = vpop.f32.mrb[19].mxu0  ;;  %v1391_v47 = vpop.f32.mrb[19].mxu1 }
 0x3ba   :  { %v2732_v14 = vmul.f32 -1.442695, %v1481_v24 }
 0x3bb   :  { %2866 = vpow2.f32 %v2731_v58 }
 0x3bc   :  { %2868 = vpow2.f32 %v2732_v14 }
 0x3bd   :  { %2870 = vtanh.f32 %v1482_v7 }
 0x3c5   :  { %v2867_v57 = vpop.eup %2866 }
 0x3c6   :  { %v2869_v38 = vpop.eup %2868  ;;  %v1491_v46 = vadd.f32 1.0, %v2867_v57 }
 0x3c7   :  { %v1497_v6 = vadd.f32 1.0, %v2869_v38  ;;  %v2871_v8 = vpop.eup %2870 }
 0x3c8   :  { %2872 = vrcp.f32 %v1491_v46 }
 0x3c9   :  { %2874 = vrcp.f32 %v1497_v6  ;;  %v2730_v6 = vld [vmem:[%s4574_s0 + $0x78] sm:$0xff] }
 0x3d2   :  { %v2873_v13 = vpop.eup %2872 }
 0x3d3   :  { %v2875_v15 = vpop.eup %2874  ;;  %v1508_v5 = vmul.f32 %v2873_v13, %v2871_v8  ;;  %v1483_v8 = vadd.f32 %v2730_v6, %v1388_v59 }
 0x3d4   :  { %v1507_v18 = vmul.f32 %v2875_v15, %v3768_v40 }
 0x3d5   :  { %v2733_v15 = vmul.f32 -1.442695, %v1483_v8 }
 0x3d6   :  { %v3926_v24 = vadd.f32 %v1508_v5, %v1507_v18 }
 0x3f6   :  { %v1427_v14 = vpop.f32.mrb[20].mxu0  ;;  %v1468_v47 = vpop.f32.mrb[20].mxu1 }
 0x3f7   :  { %v1484_v56 = vadd.f32 %v1427_v14, %v5106_v60  ;;  %v1429_v19 = vpop.f32.mrb[21].mxu0  ;;  %v1470_v21 = vpop.f32.mrb[21].mxu1  ;;  %v1486_v18 = vadd.f32 %v1468_v47, %v3617_v63 }
 0x3f8   :  { %v1485_v57 = vadd.f32 %v1429_v19, %v3607_v31  ;;  %v1431_v7 = vpop.f32.mrb[22].mxu0  ;;  %v1472_v38 = vpop.f32.mrb[22].mxu1  ;;  %v1487_v13 = vadd.f32 %v1470_v21, %v3614_v16 }
 0x3f9   :  { %v2734_v46 = vmul.f32 -1.442695, %v1484_v56  ;;  %v1432_v58 = vpop.f32.mrb[23].mxu0  ;;  %v1473_v25 = vpop.f32.mrb[23].mxu1 }
 0x3fa   :  { %v2735_v40 = vmul.f32 -1.442695, %v1485_v57  ;;  %v2736_v5 = vmul.f32 -1.442695, %v1487_v13 }
 0x3fb   :  { %2876 = vpow2.f32 %v2734_v46 }
 0x3fc   :  { %2878 = vpow2.f32 %v2735_v40 }
 0x3fd   :  { %2880 = vpow2.f32 %v2733_v15 }
 0x3fe   :  { %2882 = vpow2.f32 %v2736_v5 }
 0x3ff   :  { %2884 = vtanh.f32 %v1486_v18 }
 0x405   :  { %v2877_v14 = vpop.eup %2876 }
 0x406   :  { %v2879_v19 = vpop.eup %2878  ;;  %v1515_v56 = vadd.f32 1.0, %v2877_v14 }
 0x407   :  { %v1521_v7 = vadd.f32 1.0, %v2879_v19  ;;  %v2881_v38 = vpop.eup %2880 }
 0x408   :  { %2886 = vrcp.f32 %v1515_v56  ;;  %v2883_v57 = vpop.eup %2882  ;;  %v1504_v59 = vadd.f32 1.0, %v2881_v38  ;;  %v5197_v38 = vld [vmem:[#allocation89_spill] sm:$0xff] }
 0x409   :  { %2888 = vrcp.f32 %v1521_v7  ;;  %v2885_v46 = vpop.eup %2884  ;;  %v1528_v6 = vadd.f32 1.0, %v2883_v57  ;;  %v5196_v7 = vld [vmem:[#allocation86_spill] sm:$0xff]  ;;  %v5198_v57 = vld [vmem:[#allocation88_spill] sm:$0xff] }
 0x40a   :  { %2890 = vtanh.f32 %v3926_v24 }
 0x40b   :  { %2892 = vrcp.f32 %v1504_v59  ;;  %v5201_v59 = vld [vmem:[#allocation93_spill] sm:$0xff] }
 0x40c   :  { %2894 = vrcp.f32 %v1528_v6  ;;  %v5204_v6 = vld [vmem:[#allocation94_spill] sm:$0xff] }
 0x412   :  { %v2887_v58 = vpop.eup %2886 }
 0x413   :  { %v2889_v25 = vpop.eup %2888  ;;  %v1532_v21 = vmul.f32 %v2887_v58, %v2885_v46  ;;  %v5199_v46 = vld [vmem:[#allocation91_spill] sm:$0xff]  ;;  %v5200_v58 = vld [vmem:[#allocation90_spill] sm:$0xff] }
 0x414   :  { %v1531_v40 = vmul.f32 %v2889_v25, %v3779_v52  ;;  %v2891_v8 = vpop.eup %2890  ;;  %v5195_v52 = vld [vmem:[#allocation87_spill] sm:$0xff]  ;;  %v5202_v25 = vld [vmem:[#allocation92_spill] sm:$0xff] }
 0x415   :  { %v2893_v13 = vpop.eup %2892 }
 0x416   :  { %v3937_v47 = vadd.f32 %v1532_v21, %v1531_v40  ;;  %v2895_v15 = vpop.eup %2894  ;;  %v1511_v18 = vmul.f32 %v2893_v13, %v2891_v8  ;;  %v5203_v21 = vld [vmem:[#allocation95_spill] sm:$0xff]  ;;  %v5205_v40 = vld [vmem:[#allocation96_spill] sm:$0xff]  ;;  %v5207_v13 = vld [vmem:[#allocation98_spill] sm:$0xff] }
 0x417   :  { %v5206_v8 = vld [vmem:[#allocation99_spill] sm:$0xff] }
 0x418   :  { %2896 = vtanh.f32 %v3937_v47  ;;  %v3940_v56 = vpack.c.bf16 %v1511_v18, %v1511_v18  ;;  %v5210_v18 = vld [vmem:[#allocation126_spill] sm:$0xff] }
 0x422   :  { %v2897_v5 = vpop.eup %2896 }
 0x423   :  { %v1535_v14 = vmul.f32 %v2897_v5, %v2895_v15  ;;  %v5208_v15 = vld [vmem:[#allocation100_spill] sm:$0xff]  ;;  %v5209_v5 = vld [vmem:[#allocation127_spill] sm:$0xff] }
 0x425   :  { %v1537_v19 = vpack.c.bf16 %v1535_v14, %v1535_v14  ;;  %v5211_v14 = vld [vmem:[#allocation129_spill] sm:$0xff] }
 0x427   :  { %1570 = vmatprep.mubr.bf16.mxu0 %v1537_v19  ;;  %1611 = vmatprep.mubr.bf16.mxu1 %v1537_v19 }
 0x428   :  { %1571 = vmatmul.mubr.bf16.vlgmr.msra.gmra.mrb[24].mxu0 %v3940_v56  ;;  %1612 = vmatmul.mubr.bf16.vlgmr.msra.gmra.mrb[24].mxu1 %v3940_v56 }
 0x429   :  { %1621 = vmatpush1.bf16.msra.mxu0 %v5018_v54  ;;  %1662 = vmatpush1.bf16.msra.mxu1 %v5019_v20 }
 0x42a   :  { %1652 = vmatprep.mubr.bf16.mxu0 %v1537_v19  ;;  %1693 = vmatprep.mubr.bf16.mxu1 %v1537_v19  ;;  %v5212_v19 = vld [vmem:[#allocation128_spill] sm:$0xff] }
 0x42b   :  { %1622 = vmatprep.subr.bf16.mxu0 %v5020_v11  ;;  %1663 = vmatprep.subr.bf16.mxu1 %v5021_v3 }
 0x42d   :  { %1623 = vmatpush1.bf16.msra.mxu0 %v5022_v4  ;;  %1664 = vmatpush1.bf16.msra.mxu1 %v5023_v0 }
 0x42e   :  { %1624 = vmatprep.subr.bf16.mxu0 %v5024_v28  ;;  %1665 = vmatprep.subr.bf16.mxu1 %v5107_v9 }
 0x431   :  { %1625 = vmatpush1.bf16.msra.mxu0 %v5108_v39  ;;  %1666 = vmatpush1.bf16.msra.mxu1 %v5109_v32 }
 0x432   :  { %1626 = vmatprep.subr.bf16.mxu0 %v5110_v26  ;;  %1667 = vmatprep.subr.bf16.mxu1 %v5111_v55 }
 0x435   :  { %1627 = vmatpush1.bf16.msra.mxu0 %v5112_v51  ;;  %1668 = vmatpush1.bf16.msra.mxu1 %v5195_v52 }
 0x436   :  { %1628 = vmatprep.subr.bf16.mxu0 %v5196_v7  ;;  %1669 = vmatprep.subr.bf16.mxu1 %v5197_v38 }
 0x439   :  { %1629 = vmatpush1.bf16.msra.mxu0 %v5198_v57  ;;  %1670 = vmatpush1.bf16.msra.mxu1 %v5199_v46 }
 0x43a   :  { %1630 = vmatprep.subr.bf16.mxu0 %v5200_v58  ;;  %1671 = vmatprep.subr.bf16.mxu1 %v5201_v59 }
 0x43d   :  { %1631 = vmatpush1.bf16.msra.mxu0 %v5202_v25  ;;  %1672 = vmatpush1.bf16.msra.mxu1 %v5203_v21 }
 0x43e   :  { %1632 = vmatprep.subr.bf16.mxu0 %v5204_v6  ;;  %1673 = vmatprep.subr.bf16.mxu1 %v5123_v61 }
 0x441   :  { %1633 = vmatpush1.bf16.msra.mxu0 %v5205_v40  ;;  %1674 = vmatpush1.bf16.msra.mxu1 %v5206_v8 }
 0x442   :  { %1634 = vmatprep.subr.bf16.mxu0 %v5207_v13  ;;  %1675 = vmatprep.subr.bf16.mxu1 %v5127_v42 }
 0x445   :  { %1635 = vmatpush1.bf16.msra.mxu0 %v5208_v15  ;;  %1676 = vmatpush1.bf16.msra.mxu1 %v5129_v43 }
 0x446   :  { %1636 = vmatprep.subr.bf16.mxu0 %v5130_v33  ;;  %1677 = vmatprep.subr.bf16.mxu1 %v5131_v41 }
 0x449   :  { %1637 = vmatpush1.bf16.msra.mxu0 %v5132_v34  ;;  %1678 = vmatpush1.bf16.msra.mxu1 %v5133_v27 }
 0x44a   :  { %1638 = vmatprep.subr.bf16.mxu0 %v5052_v44  ;;  %1679 = vmatprep.subr.bf16.mxu1 %v5134_v35 }
 0x44d   :  { %1639 = vmatpush1.bf16.msra.mxu0 %v5135_v62  ;;  %1680 = vmatpush1.bf16.msra.mxu1 %v5136_v50 }
 0x44e   :  { %1640 = vmatprep.subr.bf16.mxu0 %v5056_v23  ;;  %1681 = vmatprep.subr.bf16.mxu1 %v5137_v48 }
 0x451   :  { %1641 = vmatpush1.bf16.msra.mxu0 %v5058_v37  ;;  %1682 = vmatpush1.bf16.msra.mxu1 %v5059_v2 }
 0x452   :  { %1642 = vmatprep.subr.bf16.mxu0 %v5060_v10  ;;  %1683 = vmatprep.subr.bf16.mxu1 %v5061_v49  ;;  %v2739_v49 = vld [vmem:[%s4574_s0 + $0x90] sm:$0xff] }
 0x455   :  { %1643 = vmatpush1.bf16.msra.mxu0 %v5062_v53  ;;  %1684 = vmatpush1.bf16.msra.mxu1 %v3471_v36 }
 0x456   :  { %1644 = vmatprep.subr.bf16.mxu0 %v5063_v30  ;;  %1685 = vmatprep.subr.bf16.mxu1 %v5064_v45  ;;  %v5213_v30 = vld [vmem:[#allocation131_spill] sm:$0xff]  ;;  %v5214_v45 = vld [vmem:[#allocation130_spill] sm:$0xff] }
 0x459   :  { %1645 = vmatpush1.bf16.msra.mxu0 %v5065_v17  ;;  %1686 = vmatpush1.bf16.msra.mxu1 %v3483_v29  ;;  %v5215_v17 = vld [vmem:[#allocation133_spill] sm:$0xff]  ;;  %v5216_v29 = vld [vmem:[#allocation132_spill] sm:$0xff] }
 0x45a   :  { %1646 = vmatprep.subr.bf16.mxu0 %v5066_v12  ;;  %1687 = vmatprep.subr.bf16.mxu1 %v3489_v22  ;;  %v5217_v12 = vld [vmem:[#allocation134_spill] sm:$0xff] }
 0x45b   :  { %v5218_v22 = vld [vmem:[#allocation6_spill] sm:$0xff] }
 0x45d   :  { %1647 = vmatpush1.bf16.msra.mxu0 %v3486_v1  ;;  %1688 = vmatpush1.bf16.msra.mxu1 %v5209_v5  ;;  %v5219_v1 = vld [vmem:[#allocation10_spill] sm:$0xff] }
 0x45e   :  { %1648 = vmatprep.subr.bf16.mxu0 %v5210_v18  ;;  %1689 = vmatprep.subr.bf16.mxu1 %v5211_v14  ;;  %v5220_v14 = vld [vmem:[#allocation7_spill] sm:$0xff]  ;;  %v5229_v18 = vld [vmem:[#allocation18_spill] sm:$0xff] }
 0x461   :  { %1649 = vmatpush1.bf16.msra.mxu0 %v5212_v19  ;;  %1690 = vmatpush1.bf16.msra.mxu1 %v5213_v30  ;;  %v5221_v19 = vld [vmem:[#allocation11_spill] sm:$0xff]  ;;  %v5222_v30 = vld [vmem:[#allocation8_spill] sm:$0xff] }
 0x462   :  { %1650 = vmatprep.subr.bf16.mxu0 %v5214_v45  ;;  %1691 = vmatprep.subr.bf16.mxu1 %v5215_v17  ;;  %v5223_v45 = vld [vmem:[#allocation13_spill] sm:$0xff] }
 0x463   :  { %v5224_v17 = vld [vmem:[#allocation9_spill] sm:$0xff] }
 0x465   :  { %1651 = vmatpush1.bf16.msra.mxu0 %v5216_v29  ;;  %1692 = vmatpush1.bf16.msra.mxu1 %v5217_v12  ;;  %v5225_v29 = vld [vmem:[#allocation14_spill] sm:$0xff]  ;;  %v5226_v12 = vld [vmem:[#allocation12_spill] sm:$0xff] }
 0x466   :  { %1765 = vmatprep.subr.bf16.mxu0 %v5218_v22  ;;  %1806 = vmatprep.subr.bf16.mxu1 %v5219_v1  ;;  %v5227_v22 = vld [vmem:[#allocation16_spill] sm:$0xff]  ;;  %v5228_v1 = vld [vmem:[#allocation15_spill] sm:$0xff] }
 0x468   :  { %1653 = vmatmul.mubr.bf16.vlgmr.msra.gmra.mrb[28].mxu0 %v3940_v56  ;;  %1694 = vmatmul.mubr.bf16.vlgmr.msra.gmra.mrb[28].mxu1 %v3940_v56  ;;  %v5230_v56 = vld [vmem:[#allocation17_spill] sm:$0xff] }
 0x469   :  { %1766 = vmatpush1.bf16.msra.mxu0 %v5220_v14  ;;  %1807 = vmatpush1.bf16.msra.mxu1 %v5221_v19  ;;  %v5231_v14 = vld [vmem:[#allocation20_spill] sm:$0xff]  ;;  %v5232_v19 = vld [vmem:[#allocation19_spill] sm:$0xff] }
 0x46a   :  { %1767 = vmatprep.subr.bf16.mxu0 %v5222_v30  ;;  %1808 = vmatprep.subr.bf16.mxu1 %v5223_v45  ;;  %v5233_v30 = vld [vmem:[#allocation22_spill] sm:$0xff]  ;;  %v5234_v45 = vld [vmem:[#allocation21_spill] sm:$0xff] }
 0x46d   :  { %1768 = vmatpush1.bf16.msra.mxu0 %v5224_v17  ;;  %1809 = vmatpush1.bf16.msra.mxu1 %v5225_v29  ;;  %v5235_v17 = vld [vmem:[#allocation24_spill] sm:$0xff]  ;;  %v5236_v29 = vld [vmem:[#allocation23_spill] sm:$0xff] }
 0x46e   :  { %1769 = vmatprep.subr.bf16.mxu0 %v5226_v12  ;;  %1810 = vmatprep.subr.bf16.mxu1 %v5227_v22  ;;  %v5237_v12 = vld [vmem:[#allocation26_spill] sm:$0xff]  ;;  %v5238_v22 = vld [vmem:[#allocation25_spill] sm:$0xff] }
 0x471   :  { %1770 = vmatpush1.bf16.msra.mxu0 %v5228_v1  ;;  %1811 = vmatpush1.bf16.msra.mxu1 %v5229_v18  ;;  %v5239_v1 = vld [vmem:[#allocation28_spill] sm:$0xff]  ;;  %v5240_v18 = vld [vmem:[#allocation27_spill] sm:$0xff] }
 0x472   :  { %1771 = vmatprep.subr.bf16.mxu0 %v5230_v56  ;;  %1812 = vmatprep.subr.bf16.mxu1 %v5231_v14  ;;  %v5241_v56 = vld [vmem:[#allocation30_spill] sm:$0xff]  ;;  %v5242_v14 = vld [vmem:[#allocation29_spill] sm:$0xff] }
 0x475   :  { %1772 = vmatpush1.bf16.msra.mxu0 %v5232_v19  ;;  %1813 = vmatpush1.bf16.msra.mxu1 %v5233_v30  ;;  %v5243_v19 = vld [vmem:[#allocation32_spill] sm:$0xff]  ;;  %v5244_v30 = vld [vmem:[#allocation31_spill] sm:$0xff] }
 0x476   :  { %1773 = vmatprep.subr.bf16.mxu0 %v5234_v45  ;;  %1814 = vmatprep.subr.bf16.mxu1 %v5235_v17  ;;  %v5245_v45 = vld [vmem:[#allocation34_spill] sm:$0xff]  ;;  %v5246_v17 = vld [vmem:[#allocation33_spill] sm:$0xff] }
 0x479   :  { %1774 = vmatpush1.bf16.msra.mxu0 %v5236_v29  ;;  %1815 = vmatpush1.bf16.msra.mxu1 %v5237_v12  ;;  %v5247_v29 = vld [vmem:[#allocation36_spill] sm:$0xff]  ;;  %v5248_v12 = vld [vmem:[#allocation35_spill] sm:$0xff] }
 0x47a   :  { %1775 = vmatprep.subr.bf16.mxu0 %v5238_v22  ;;  %1816 = vmatprep.subr.bf16.mxu1 %v5239_v1  ;;  %v5249_v22 = vld [vmem:[#allocation38_spill] sm:$0xff]  ;;  %v5250_v1 = vld [vmem:[#allocation37_spill] sm:$0xff] }
 0x47d   :  { %1776 = vmatpush1.bf16.msra.mxu0 %v5240_v18  ;;  %1817 = vmatpush1.bf16.msra.mxu1 %v5241_v56  ;;  %v5251_v18 = vld [vmem:[#allocation40_spill] sm:$0xff]  ;;  %v5252_v56 = vld [vmem:[#allocation39_spill] sm:$0xff] }
 0x47e   :  { %1777 = vmatprep.subr.bf16.mxu0 %v5242_v14  ;;  %1818 = vmatprep.subr.bf16.mxu1 %v5243_v19  ;;  %v5253_v14 = vld [vmem:[#allocation42_spill] sm:$0xff]  ;;  %v5254_v19 = vld [vmem:[#allocation41_spill] sm:$0xff] }
 0x481   :  { %1778 = vmatpush1.bf16.msra.mxu0 %v5244_v30  ;;  %1819 = vmatpush1.bf16.msra.mxu1 %v5245_v45  ;;  %v5255_v30 = vld [vmem:[#allocation44_spill] sm:$0xff]  ;;  %v5256_v45 = vld [vmem:[#allocation43_spill] sm:$0xff] }
 0x482   :  { %1779 = vmatprep.subr.bf16.mxu0 %v5246_v17  ;;  %1820 = vmatprep.subr.bf16.mxu1 %v5247_v29  ;;  %v5257_v17 = vld [vmem:[#allocation46_spill] sm:$0xff]  ;;  %v5258_v29 = vld [vmem:[#allocation45_spill] sm:$0xff] }
 0x485   :  { %1780 = vmatpush1.bf16.msra.mxu0 %v5248_v12  ;;  %1821 = vmatpush1.bf16.msra.mxu1 %v5249_v22  ;;  %v5259_v12 = vld [vmem:[#allocation48_spill] sm:$0xff]  ;;  %v5260_v22 = vld [vmem:[#allocation47_spill] sm:$0xff] }
 0x486   :  { %1781 = vmatprep.subr.bf16.mxu0 %v5250_v1  ;;  %1822 = vmatprep.subr.bf16.mxu1 %v5251_v18  ;;  %v5261_v1 = vld [vmem:[#allocation50_spill] sm:$0xff]  ;;  %v5262_v18 = vld [vmem:[#allocation49_spill] sm:$0xff] }
 0x489   :  { %1782 = vmatpush1.bf16.msra.mxu0 %v5252_v56  ;;  %1823 = vmatpush1.bf16.msra.mxu1 %v5253_v14  ;;  %v5263_v56 = vld [vmem:[#allocation52_spill] sm:$0xff]  ;;  %v5264_v14 = vld [vmem:[#allocation51_spill] sm:$0xff] }
 0x48a   :  { %1783 = vmatprep.subr.bf16.mxu0 %v5254_v19  ;;  %1824 = vmatprep.subr.bf16.mxu1 %v5255_v30  ;;  %v5265_v19 = vld [vmem:[#allocation54_spill] sm:$0xff]  ;;  %v5266_v30 = vld [vmem:[#allocation53_spill] sm:$0xff] }
 0x48d   :  { %1784 = vmatpush1.bf16.msra.mxu0 %v5256_v45  ;;  %1825 = vmatpush1.bf16.msra.mxu1 %v5257_v17  ;;  %v5267_v45 = vld [vmem:[#allocation56_spill] sm:$0xff]  ;;  %v5268_v17 = vld [vmem:[#allocation55_spill] sm:$0xff] }
 0x48e   :  { %1785 = vmatprep.subr.bf16.mxu0 %v5258_v29  ;;  %1826 = vmatprep.subr.bf16.mxu1 %v5259_v12  ;;  %v5269_v29 = vld [vmem:[#allocation59_spill] sm:$0xff]  ;;  %v5270_v12 = vld [vmem:[#allocation57_spill] sm:$0xff] }
 0x491   :  { %1786 = vmatpush1.bf16.msra.mxu0 %v5260_v22  ;;  %1827 = vmatpush1.bf16.msra.mxu1 %v5261_v1  ;;  %v5271_v22 = vld [vmem:[#allocation61_spill] sm:$0xff]  ;;  %v5272_v1 = vld [vmem:[#allocation60_spill] sm:$0xff] }
 0x492   :  { %1787 = vmatprep.subr.bf16.mxu0 %v5262_v18  ;;  %1828 = vmatprep.subr.bf16.mxu1 %v5263_v56  ;;  %v5273_v18 = vld [vmem:[#allocation63_spill] sm:$0xff]  ;;  %v5274_v56 = vld [vmem:[#allocation62_spill] sm:$0xff] }
 0x495   :  { %1788 = vmatpush1.bf16.msra.mxu0 %v5264_v14  ;;  %1829 = vmatpush1.bf16.msra.mxu1 %v5265_v19  ;;  %v5275_v14 = vld [vmem:[#allocation65_spill] sm:$0xff]  ;;  %v5276_v19 = vld [vmem:[#allocation64_spill] sm:$0xff] }
 0x496   :  { %1789 = vmatprep.subr.bf16.mxu0 %v5266_v30  ;;  %1830 = vmatprep.subr.bf16.mxu1 %v5267_v45  ;;  %v5277_v30 = vld [vmem:[#allocation67_spill] sm:$0xff]  ;;  %v5278_v45 = vld [vmem:[#allocation66_spill] sm:$0xff] }
 0x499   :  { %1790 = vmatpush1.bf16.msra.mxu0 %v5268_v17  ;;  %1831 = vmatpush1.bf16.msra.mxu1 %v5269_v29  ;;  %v5279_v17 = vld [vmem:[#allocation69_spill] sm:$0xff]  ;;  %v5280_v29 = vld [vmem:[#allocation68_spill] sm:$0xff] }
 0x49a   :  { %1791 = vmatprep.subr.bf16.mxu0 %v5270_v12  ;;  %1832 = vmatprep.subr.bf16.mxu1 %v5271_v22  ;;  %v5281_v12 = vld [vmem:[#allocation71_spill] sm:$0xff]  ;;  %v5282_v22 = vld [vmem:[#allocation70_spill] sm:$0xff] }
 0x49d   :  { %1792 = vmatpush1.bf16.msra.mxu0 %v5272_v1  ;;  %1833 = vmatpush1.bf16.msra.mxu1 %v5273_v18  ;;  %v5283_v1 = vld [vmem:[#allocation73_spill] sm:$0xff] }
 0x49e   :  { %1793 = vmatprep.subr.bf16.mxu0 %v5274_v56  ;;  %1834 = vmatprep.subr.bf16.mxu1 %v5275_v14  ;;  %v2737_v14 = vld [vmem:[%s4574_s0 + $0x80] sm:$0xff] }
 0x4a1   :  { %1794 = vmatpush1.bf16.msra.mxu0 %v5276_v19  ;;  %1835 = vmatpush1.bf16.msra.mxu1 %v5277_v30  ;;  %v2738_v30 = vld [vmem:[%s4574_s0 + $0x88] sm:$0xff] }
 0x4a2   :  { %1795 = vmatprep.subr.bf16.mxu0 %v5278_v45  ;;  %1836 = vmatprep.subr.bf16.mxu1 %v5279_v17 }
 0x4a5   :  { %1796 = vmatpush1.bf16.msra.mxu0 %v5280_v29  ;;  %1837 = vmatpush1.bf16.msra.mxu1 %v5281_v12 }
 0x4a6   :  { %1847 = vmatprep.subr.bf16.mxu0 %v5282_v22  ;;  %1888 = vmatprep.subr.bf16.mxu1 %v5283_v1 }
 0x4fb   :  { %v1572_v19 = vpop.f32.mrb[24].mxu0  ;;  %v1613_v45 = vpop.f32.mrb[24].mxu1 }
 0x4fc   :  { %v1707_v56 = vadd.f32 %v2737_v14, %v1572_v19  ;;  %v1574_v17 = vpop.f32.mrb[25].mxu0  ;;  %v1615_v18 = vpop.f32.mrb[25].mxu1  ;;  %v1709_v10 = vadd.f32 %v2739_v49, %v1613_v45 }
 0x4fd   :  { %v1708_v29 = vadd.f32 %v2738_v30, %v1574_v17  ;;  %v1576_v5 = vpop.f32.mrb[26].mxu0  ;;  %v1617_v12 = vpop.f32.mrb[26].mxu1 }
 0x4fe   :  { %v2741_v36 = vmul.f32 -1.442695, %v1707_v56  ;;  %v1577_v22 = vpop.f32.mrb[27].mxu0  ;;  %v1618_v53 = vpop.f32.mrb[27].mxu1 }
 0x4ff   :  { %v2742_v1 = vmul.f32 -1.442695, %v1708_v29 }
 0x500   :  { %2898 = vpow2.f32 %v2741_v36 }
 0x501   :  { %2900 = vpow2.f32 %v2742_v1 }
 0x502   :  { %2902 = vtanh.f32 %v1709_v10 }
 0x50a   :  { %v2899_v2 = vpop.eup %2898 }
 0x50b   :  { %v2901_v37 = vpop.eup %2900  ;;  %v1718_v48 = vadd.f32 1.0, %v2899_v2 }
 0x50c   :  { %v1724_v14 = vadd.f32 1.0, %v2901_v37  ;;  %v2903_v30 = vpop.eup %2902 }
 0x50d   :  { %2904 = vrcp.f32 %v1718_v48 }
 0x50e   :  { %2906 = vrcp.f32 %v1724_v14  ;;  %v2740_v14 = vld [vmem:[%s4574_s0 + $0x98] sm:$0xff] }
 0x517   :  { %v2905_v17 = vpop.eup %2904 }
 0x518   :  { %v2907_v12 = vpop.eup %2906  ;;  %v1735_v22 = vmul.f32 %v2905_v17, %v2903_v30  ;;  %v1710_v30 = vadd.f32 %v2740_v14, %v1615_v18 }
 0x519   :  { %v1734_v29 = vmul.f32 %v2907_v12, %v3926_v24 }
 0x51a   :  { %v2743_v12 = vmul.f32 -1.442695, %v1710_v30 }
 0x51b   :  { %v4084_v36 = vadd.f32 %v1735_v22, %v1734_v29 }
 0x53b   :  { %v1654_v1 = vpop.f32.mrb[28].mxu0  ;;  %v1695_v53 = vpop.f32.mrb[28].mxu1 }
 0x53c   :  { %v1711_v5 = vadd.f32 %v1654_v1, %v5106_v60  ;;  %v1656_v49 = vpop.f32.mrb[29].mxu0  ;;  %v1697_v45 = vpop.f32.mrb[29].mxu1  ;;  %v1713_v29 = vadd.f32 %v1695_v53, %v3617_v63 }
 0x53d   :  { %v1712_v2 = vadd.f32 %v1656_v49, %v3607_v31  ;;  %v1658_v10 = vpop.f32.mrb[30].mxu0  ;;  %v1699_v37 = vpop.f32.mrb[30].mxu1  ;;  %v1714_v17 = vadd.f32 %v1697_v45, %v3614_v16 }
 0x53e   :  { %v2744_v48 = vmul.f32 -1.442695, %v1711_v5  ;;  %v1659_v19 = vpop.f32.mrb[31].mxu0  ;;  %v1700_v56 = vpop.f32.mrb[31].mxu1 }
 0x53f   :  { %v2745_v24 = vmul.f32 -1.442695, %v1712_v2  ;;  %v2746_v22 = vmul.f32 -1.442695, %v1714_v17 }
 0x540   :  { %2908 = vpow2.f32 %v2744_v48 }
 0x541   :  { %2910 = vpow2.f32 %v2745_v24 }
 0x542   :  { %2912 = vpow2.f32 %v2743_v12 }
 0x543   :  { %2914 = vpow2.f32 %v2746_v22 }
 0x544   :  { %2916 = vtanh.f32 %v1713_v29 }
 0x54a   :  { %v2909_v1 = vpop.eup %2908 }
 0x54b   :  { %v2911_v49 = vpop.eup %2910  ;;  %v1742_v5 = vadd.f32 1.0, %v2909_v1 }
 0x54c   :  { %v1748_v10 = vadd.f32 1.0, %v2911_v49  ;;  %v2913_v37 = vpop.eup %2912 }
 0x54d   :  { %2918 = vrcp.f32 %v1742_v5  ;;  %v2915_v2 = vpop.eup %2914  ;;  %v1731_v18 = vadd.f32 1.0, %v2913_v37  ;;  %v5286_v37 = vld [vmem:[#allocation115_spill] sm:$0xff] }
 0x54e   :  { %2920 = vrcp.f32 %v1748_v10  ;;  %v2917_v48 = vpop.eup %2916  ;;  %v1755_v14 = vadd.f32 1.0, %v2915_v2  ;;  %v5285_v10 = vld [vmem:[#allocation112_spill] sm:$0xff]  ;;  %v5287_v2 = vld [vmem:[#allocation114_spill] sm:$0xff] }
 0x54f   :  { %2922 = vtanh.f32 %v4084_v36 }
 0x550   :  { %2924 = vrcp.f32 %v1731_v18  ;;  %v5290_v18 = vld [vmem:[#allocation119_spill] sm:$0xff] }
 0x551   :  { %2926 = vrcp.f32 %v1755_v14  ;;  %v5293_v14 = vld [vmem:[#allocation120_spill] sm:$0xff] }
 0x557   :  { %v2919_v19 = vpop.eup %2918 }
 0x558   :  { %v2921_v56 = vpop.eup %2920  ;;  %v1759_v45 = vmul.f32 %v2919_v19, %v2917_v48  ;;  %v5288_v48 = vld [vmem:[#allocation117_spill] sm:$0xff]  ;;  %v5289_v19 = vld [vmem:[#allocation116_spill] sm:$0xff] }
 0x559   :  { %v1758_v24 = vmul.f32 %v2921_v56, %v3937_v47  ;;  %v2923_v30 = vpop.eup %2922  ;;  %v5284_v47 = vld [vmem:[#allocation113_spill] sm:$0xff]  ;;  %v5291_v56 = vld [vmem:[#allocation118_spill] sm:$0xff] }
 0x55a   :  { %v2925_v17 = vpop.eup %2924 }
 0x55b   :  { %v4095_v53 = vadd.f32 %v1759_v45, %v1758_v24  ;;  %v2927_v12 = vpop.eup %2926  ;;  %v1738_v29 = vmul.f32 %v2925_v17, %v2923_v30  ;;  %v5292_v45 = vld [vmem:[#allocation121_spill] sm:$0xff]  ;;  %v5294_v24 = vld [vmem:[#allocation123_spill] sm:$0xff]  ;;  %v5295_v30 = vld [vmem:[#allocation122_spill] sm:$0xff] }
 0x55c   :  { %v5296_v17 = vld [vmem:[#allocation125_spill] sm:$0xff] }
 0x55d   :  { %2928 = vtanh.f32 %v4095_v53  ;;  %v4098_v5 = vpack.c.bf16 %v1738_v29, %v1738_v29  ;;  %v5299_v29 = vld [vmem:[#allocation126_spill] sm:$0xff] }
 0x567   :  { %v2929_v22 = vpop.eup %2928 }
 0x568   :  { %v1762_v1 = vmul.f32 %v2929_v22, %v2927_v12  ;;  %v5297_v12 = vld [vmem:[#allocation124_spill] sm:$0xff]  ;;  %v5298_v22 = vld [vmem:[#allocation127_spill] sm:$0xff] }
 0x56a   :  { %v1764_v49 = vpack.c.bf16 %v1762_v1, %v1762_v1  ;;  %v5300_v1 = vld [vmem:[#allocation129_spill] sm:$0xff] }
 0x56c   :  { %1797 = vmatprep.mubr.bf16.mxu0 %v1764_v49  ;;  %1838 = vmatprep.mubr.bf16.mxu1 %v1764_v49 }
 0x56d   :  { %1798 = vmatmul.mubr.bf16.vlgmr.msra.gmra.mrb[32].mxu0 %v4098_v5  ;;  %1839 = vmatmul.mubr.bf16.vlgmr.msra.gmra.mrb[32].mxu1 %v4098_v5 }
 0x56e   :  { %1848 = vmatpush1.bf16.msra.mxu0 %v5018_v54  ;;  %1889 = vmatpush1.bf16.msra.mxu1 %v5019_v20 }
 0x56f   :  { %1879 = vmatprep.mubr.bf16.mxu0 %v1764_v49  ;;  %1920 = vmatprep.mubr.bf16.mxu1 %v1764_v49  ;;  %v5301_v49 = vld [vmem:[#allocation128_spill] sm:$0xff] }
 0x570   :  { %1849 = vmatprep.subr.bf16.mxu0 %v5020_v11  ;;  %1890 = vmatprep.subr.bf16.mxu1 %v5021_v3 }
 0x572   :  { %1850 = vmatpush1.bf16.msra.mxu0 %v5022_v4  ;;  %1891 = vmatpush1.bf16.msra.mxu1 %v5023_v0 }
 0x573   :  { %1851 = vmatprep.subr.bf16.mxu0 %v5024_v28  ;;  %1892 = vmatprep.subr.bf16.mxu1 %v5107_v9 }
 0x576   :  { %1852 = vmatpush1.bf16.msra.mxu0 %v5108_v39  ;;  %1893 = vmatpush1.bf16.msra.mxu1 %v5109_v32 }
 0x577   :  { %1853 = vmatprep.subr.bf16.mxu0 %v5110_v26  ;;  %1894 = vmatprep.subr.bf16.mxu1 %v5111_v55 }
 0x57a   :  { %1854 = vmatpush1.bf16.msra.mxu0 %v5112_v51  ;;  %1895 = vmatpush1.bf16.msra.mxu1 %v5195_v52 }
 0x57b   :  { %1855 = vmatprep.subr.bf16.mxu0 %v5196_v7  ;;  %1896 = vmatprep.subr.bf16.mxu1 %v5197_v38 }
 0x57e   :  { %1856 = vmatpush1.bf16.msra.mxu0 %v5198_v57  ;;  %1897 = vmatpush1.bf16.msra.mxu1 %v5199_v46 }
 0x57f   :  { %1857 = vmatprep.subr.bf16.mxu0 %v5200_v58  ;;  %1898 = vmatprep.subr.bf16.mxu1 %v5201_v59 }
 0x582   :  { %1858 = vmatpush1.bf16.msra.mxu0 %v5202_v25  ;;  %1899 = vmatpush1.bf16.msra.mxu1 %v5203_v21 }
 0x583   :  { %1859 = vmatprep.subr.bf16.mxu0 %v5204_v6  ;;  %1900 = vmatprep.subr.bf16.mxu1 %v5123_v61 }
 0x586   :  { %1860 = vmatpush1.bf16.msra.mxu0 %v5205_v40  ;;  %1901 = vmatpush1.bf16.msra.mxu1 %v5206_v8 }
 0x587   :  { %1861 = vmatprep.subr.bf16.mxu0 %v5207_v13  ;;  %1902 = vmatprep.subr.bf16.mxu1 %v5127_v42 }
 0x58a   :  { %1862 = vmatpush1.bf16.msra.mxu0 %v5208_v15  ;;  %1903 = vmatpush1.bf16.msra.mxu1 %v5129_v43 }
 0x58b   :  { %1863 = vmatprep.subr.bf16.mxu0 %v5130_v33  ;;  %1904 = vmatprep.subr.bf16.mxu1 %v5131_v41 }
 0x58e   :  { %1864 = vmatpush1.bf16.msra.mxu0 %v5132_v34  ;;  %1905 = vmatpush1.bf16.msra.mxu1 %v5133_v27 }
 0x58f   :  { %1865 = vmatprep.subr.bf16.mxu0 %v5052_v44  ;;  %1906 = vmatprep.subr.bf16.mxu1 %v5134_v35 }
 0x592   :  { %1866 = vmatpush1.bf16.msra.mxu0 %v5135_v62  ;;  %1907 = vmatpush1.bf16.msra.mxu1 %v5136_v50 }
 0x593   :  { %1867 = vmatprep.subr.bf16.mxu0 %v5056_v23  ;;  %1908 = vmatprep.subr.bf16.mxu1 %v5284_v47 }
 0x596   :  { %1868 = vmatpush1.bf16.msra.mxu0 %v5285_v10  ;;  %1909 = vmatpush1.bf16.msra.mxu1 %v5286_v37 }
 0x597   :  { %1869 = vmatprep.subr.bf16.mxu0 %v5287_v2  ;;  %1910 = vmatprep.subr.bf16.mxu1 %v5288_v48  ;;  %v2749_v48 = vld [vmem:[%s4574_s0 + $0xb0] sm:$0xff] }
 0x59a   :  { %1870 = vmatpush1.bf16.msra.mxu0 %v5289_v19  ;;  %1911 = vmatpush1.bf16.msra.mxu1 %v5290_v18 }
 0x59b   :  { %1871 = vmatprep.subr.bf16.mxu0 %v5291_v56  ;;  %1912 = vmatprep.subr.bf16.mxu1 %v5292_v45  ;;  %v5302_v56 = vld [vmem:[#allocation131_spill] sm:$0xff]  ;;  %v5303_v45 = vld [vmem:[#allocation130_spill] sm:$0xff] }
 0x59e   :  { %1872 = vmatpush1.bf16.msra.mxu0 %v5293_v14  ;;  %1913 = vmatpush1.bf16.msra.mxu1 %v5294_v24  ;;  %v5304_v14 = vld [vmem:[#allocation133_spill] sm:$0xff]  ;;  %v5305_v24 = vld [vmem:[#allocation132_spill] sm:$0xff] }
 0x59f   :  { %1873 = vmatprep.subr.bf16.mxu0 %v5295_v30  ;;  %1914 = vmatprep.subr.bf16.mxu1 %v5296_v17  ;;  %v5306_v30 = vld [vmem:[#allocation134_spill] sm:$0xff] }
 0x5a0   :  { %v5307_v17 = vld [vmem:[#allocation6_spill] sm:$0xff] }
 0x5a2   :  { %1874 = vmatpush1.bf16.msra.mxu0 %v5297_v12  ;;  %1915 = vmatpush1.bf16.msra.mxu1 %v5298_v22  ;;  %v5308_v12 = vld [vmem:[#allocation10_spill] sm:$0xff] }
 0x5a3   :  { %1875 = vmatprep.subr.bf16.mxu0 %v5299_v29  ;;  %1916 = vmatprep.subr.bf16.mxu1 %v5300_v1  ;;  %v5309_v1 = vld [vmem:[#allocation7_spill] sm:$0xff]  ;;  %v5318_v29 = vld [vmem:[#allocation18_spill] sm:$0xff] }
 0x5a6   :  { %1876 = vmatpush1.bf16.msra.mxu0 %v5301_v49  ;;  %1917 = vmatpush1.bf16.msra.mxu1 %v5302_v56  ;;  %v5310_v49 = vld [vmem:[#allocation11_spill] sm:$0xff]  ;;  %v5311_v56 = vld [vmem:[#allocation8_spill] sm:$0xff] }
 0x5a7   :  { %1877 = vmatprep.subr.bf16.mxu0 %v5303_v45  ;;  %1918 = vmatprep.subr.bf16.mxu1 %v5304_v14  ;;  %v5312_v45 = vld [vmem:[#allocation13_spill] sm:$0xff] }
 0x5a8   :  { %v5313_v14 = vld [vmem:[#allocation9_spill] sm:$0xff] }
 0x5aa   :  { %1878 = vmatpush1.bf16.msra.mxu0 %v5305_v24  ;;  %1919 = vmatpush1.bf16.msra.mxu1 %v5306_v30  ;;  %v5314_v24 = vld [vmem:[#allocation14_spill] sm:$0xff]  ;;  %v5315_v30 = vld [vmem:[#allocation12_spill] sm:$0xff] }
 0x5ab   :  { %1992 = vmatprep.subr.bf16.mxu0 %v5307_v17  ;;  %2033 = vmatprep.subr.bf16.mxu1 %v5308_v12  ;;  %v5316_v17 = vld [vmem:[#allocation16_spill] sm:$0xff]  ;;  %v5317_v12 = vld [vmem:[#allocation15_spill] sm:$0xff] }
 0x5ad   :  { %1880 = vmatmul.mubr.bf16.vlgmr.msra.gmra.mrb[36].mxu0 %v4098_v5  ;;  %1921 = vmatmul.mubr.bf16.vlgmr.msra.gmra.mrb[36].mxu1 %v4098_v5  ;;  %v5319_v5 = vld [vmem:[#allocation17_spill] sm:$0xff] }
 0x5ae   :  { %1993 = vmatpush1.bf16.msra.mxu0 %v5309_v1  ;;  %2034 = vmatpush1.bf16.msra.mxu1 %v5310_v49  ;;  %v5320_v1 = vld [vmem:[#allocation20_spill] sm:$0xff]  ;;  %v5321_v49 = vld [vmem:[#allocation19_spill] sm:$0xff] }
 0x5af   :  { %1994 = vmatprep.subr.bf16.mxu0 %v5311_v56  ;;  %2035 = vmatprep.subr.bf16.mxu1 %v5312_v45  ;;  %v5322_v56 = vld [vmem:[#allocation22_spill] sm:$0xff]  ;;  %v5323_v45 = vld [vmem:[#allocation21_spill] sm:$0xff] }
 0x5b2   :  { %1995 = vmatpush1.bf16.msra.mxu0 %v5313_v14  ;;  %2036 = vmatpush1.bf16.msra.mxu1 %v5314_v24  ;;  %v5324_v14 = vld [vmem:[#allocation24_spill] sm:$0xff]  ;;  %v5325_v24 = vld [vmem:[#allocation23_spill] sm:$0xff] }
 0x5b3   :  { %1996 = vmatprep.subr.bf16.mxu0 %v5315_v30  ;;  %2037 = vmatprep.subr.bf16.mxu1 %v5316_v17  ;;  %v5326_v30 = vld [vmem:[#allocation26_spill] sm:$0xff]  ;;  %v5327_v17 = vld [vmem:[#allocation25_spill] sm:$0xff] }
 0x5b6   :  { %1997 = vmatpush1.bf16.msra.mxu0 %v5317_v12  ;;  %2038 = vmatpush1.bf16.msra.mxu1 %v5318_v29  ;;  %v5328_v12 = vld [vmem:[#allocation28_spill] sm:$0xff]  ;;  %v5329_v29 = vld [vmem:[#allocation27_spill] sm:$0xff] }
 0x5b7   :  { %1998 = vmatprep.subr.bf16.mxu0 %v5319_v5  ;;  %2039 = vmatprep.subr.bf16.mxu1 %v5320_v1  ;;  %v5330_v5 = vld [vmem:[#allocation30_spill] sm:$0xff]  ;;  %v5331_v1 = vld [vmem:[#allocation29_spill] sm:$0xff] }
 0x5ba   :  { %1999 = vmatpush1.bf16.msra.mxu0 %v5321_v49  ;;  %2040 = vmatpush1.bf16.msra.mxu1 %v5322_v56  ;;  %v5332_v49 = vld [vmem:[#allocation32_spill] sm:$0xff]  ;;  %v5333_v56 = vld [vmem:[#allocation31_spill] sm:$0xff] }
 0x5bb   :  { %2000 = vmatprep.subr.bf16.mxu0 %v5323_v45  ;;  %2041 = vmatprep.subr.bf16.mxu1 %v5324_v14  ;;  %v5334_v45 = vld [vmem:[#allocation34_spill] sm:$0xff]  ;;  %v5335_v14 = vld [vmem:[#allocation33_spill] sm:$0xff] }
 0x5be   :  { %2001 = vmatpush1.bf16.msra.mxu0 %v5325_v24  ;;  %2042 = vmatpush1.bf16.msra.mxu1 %v5326_v30  ;;  %v5336_v24 = vld [vmem:[#allocation36_spill] sm:$0xff]  ;;  %v5337_v30 = vld [vmem:[#allocation35_spill] sm:$0xff] }
 0x5bf   :  { %2002 = vmatprep.subr.bf16.mxu0 %v5327_v17  ;;  %2043 = vmatprep.subr.bf16.mxu1 %v5328_v12  ;;  %v5338_v17 = vld [vmem:[#allocation38_spill] sm:$0xff]  ;;  %v5339_v12 = vld [vmem:[#allocation37_spill] sm:$0xff] }
 0x5c2   :  { %2003 = vmatpush1.bf16.msra.mxu0 %v5329_v29  ;;  %2044 = vmatpush1.bf16.msra.mxu1 %v5330_v5  ;;  %v5340_v29 = vld [vmem:[#allocation40_spill] sm:$0xff]  ;;  %v5341_v5 = vld [vmem:[#allocation39_spill] sm:$0xff] }
 0x5c3   :  { %2004 = vmatprep.subr.bf16.mxu0 %v5331_v1  ;;  %2045 = vmatprep.subr.bf16.mxu1 %v5332_v49  ;;  %v5342_v1 = vld [vmem:[#allocation42_spill] sm:$0xff]  ;;  %v5343_v49 = vld [vmem:[#allocation41_spill] sm:$0xff] }
 0x5c6   :  { %2005 = vmatpush1.bf16.msra.mxu0 %v5333_v56  ;;  %2046 = vmatpush1.bf16.msra.mxu1 %v5334_v45  ;;  %v5344_v56 = vld [vmem:[#allocation44_spill] sm:$0xff]  ;;  %v5345_v45 = vld [vmem:[#allocation43_spill] sm:$0xff] }
 0x5c7   :  { %2006 = vmatprep.subr.bf16.mxu0 %v5335_v14  ;;  %2047 = vmatprep.subr.bf16.mxu1 %v5336_v24  ;;  %v5346_v14 = vld [vmem:[#allocation46_spill] sm:$0xff]  ;;  %v5347_v24 = vld [vmem:[#allocation45_spill] sm:$0xff] }
 0x5ca   :  { %2007 = vmatpush1.bf16.msra.mxu0 %v5337_v30  ;;  %2048 = vmatpush1.bf16.msra.mxu1 %v5338_v17  ;;  %v5348_v30 = vld [vmem:[#allocation48_spill] sm:$0xff]  ;;  %v5349_v17 = vld [vmem:[#allocation47_spill] sm:$0xff] }
 0x5cb   :  { %2008 = vmatprep.subr.bf16.mxu0 %v5339_v12  ;;  %2049 = vmatprep.subr.bf16.mxu1 %v5340_v29  ;;  %v5350_v12 = vld [vmem:[#allocation50_spill] sm:$0xff]  ;;  %v5351_v29 = vld [vmem:[#allocation49_spill] sm:$0xff] }
 0x5ce   :  { %2009 = vmatpush1.bf16.msra.mxu0 %v5341_v5  ;;  %2050 = vmatpush1.bf16.msra.mxu1 %v5342_v1  ;;  %v5352_v5 = vld [vmem:[#allocation52_spill] sm:$0xff]  ;;  %v5353_v1 = vld [vmem:[#allocation51_spill] sm:$0xff] }
 0x5cf   :  { %2010 = vmatprep.subr.bf16.mxu0 %v5343_v49  ;;  %2051 = vmatprep.subr.bf16.mxu1 %v5344_v56  ;;  %v5354_v49 = vld [vmem:[#allocation54_spill] sm:$0xff]  ;;  %v5355_v56 = vld [vmem:[#allocation53_spill] sm:$0xff] }
 0x5d2   :  { %2011 = vmatpush1.bf16.msra.mxu0 %v5345_v45  ;;  %2052 = vmatpush1.bf16.msra.mxu1 %v5346_v14  ;;  %v5356_v45 = vld [vmem:[#allocation56_spill] sm:$0xff]  ;;  %v5357_v14 = vld [vmem:[#allocation55_spill] sm:$0xff] }
 0x5d3   :  { %2012 = vmatprep.subr.bf16.mxu0 %v5347_v24  ;;  %2053 = vmatprep.subr.bf16.mxu1 %v5348_v30  ;;  %v5358_v24 = vld [vmem:[#allocation59_spill] sm:$0xff]  ;;  %v5359_v30 = vld [vmem:[#allocation57_spill] sm:$0xff] }
 0x5d6   :  { %2013 = vmatpush1.bf16.msra.mxu0 %v5349_v17  ;;  %2054 = vmatpush1.bf16.msra.mxu1 %v5350_v12  ;;  %v5360_v17 = vld [vmem:[#allocation61_spill] sm:$0xff]  ;;  %v5361_v12 = vld [vmem:[#allocation60_spill] sm:$0xff] }
 0x5d7   :  { %2014 = vmatprep.subr.bf16.mxu0 %v5351_v29  ;;  %2055 = vmatprep.subr.bf16.mxu1 %v5352_v5  ;;  %v5362_v29 = vld [vmem:[#allocation63_spill] sm:$0xff]  ;;  %v5363_v5 = vld [vmem:[#allocation62_spill] sm:$0xff] }
 0x5da   :  { %2015 = vmatpush1.bf16.msra.mxu0 %v5353_v1  ;;  %2056 = vmatpush1.bf16.msra.mxu1 %v5354_v49  ;;  %v5364_v1 = vld [vmem:[#allocation65_spill] sm:$0xff]  ;;  %v5365_v49 = vld [vmem:[#allocation64_spill] sm:$0xff] }
 0x5db   :  { %2016 = vmatprep.subr.bf16.mxu0 %v5355_v56  ;;  %2057 = vmatprep.subr.bf16.mxu1 %v5356_v45  ;;  %v5366_v56 = vld [vmem:[#allocation67_spill] sm:$0xff]  ;;  %v5367_v45 = vld [vmem:[#allocation66_spill] sm:$0xff] }
 0x5de   :  { %2017 = vmatpush1.bf16.msra.mxu0 %v5357_v14  ;;  %2058 = vmatpush1.bf16.msra.mxu1 %v5358_v24  ;;  %v5368_v14 = vld [vmem:[#allocation69_spill] sm:$0xff]  ;;  %v5369_v24 = vld [vmem:[#allocation68_spill] sm:$0xff] }
 0x5df   :  { %2018 = vmatprep.subr.bf16.mxu0 %v5359_v30  ;;  %2059 = vmatprep.subr.bf16.mxu1 %v5360_v17  ;;  %v5370_v30 = vld [vmem:[#allocation71_spill] sm:$0xff]  ;;  %v5371_v17 = vld [vmem:[#allocation70_spill] sm:$0xff] }
 0x5e2   :  { %2019 = vmatpush1.bf16.msra.mxu0 %v5361_v12  ;;  %2060 = vmatpush1.bf16.msra.mxu1 %v5362_v29  ;;  %v5372_v12 = vld [vmem:[#allocation73_spill] sm:$0xff] }
 0x5e3   :  { %2020 = vmatprep.subr.bf16.mxu0 %v5363_v5  ;;  %2061 = vmatprep.subr.bf16.mxu1 %v5364_v1  ;;  %v2747_v1 = vld [vmem:[%s4574_s0 + $0xa0] sm:$0xff] }
 0x5e6   :  { %2021 = vmatpush1.bf16.msra.mxu0 %v5365_v49  ;;  %2062 = vmatpush1.bf16.msra.mxu1 %v5366_v56  ;;  %v2748_v56 = vld [vmem:[%s4574_s0 + $0xa8] sm:$0xff] }
 0x5e7   :  { %2022 = vmatprep.subr.bf16.mxu0 %v5367_v45  ;;  %2063 = vmatprep.subr.bf16.mxu1 %v5368_v14 }
 0x5ea   :  { %2023 = vmatpush1.bf16.msra.mxu0 %v5369_v24  ;;  %2064 = vmatpush1.bf16.msra.mxu1 %v5370_v30 }
 0x5eb   :  { %2074 = vmatprep.subr.bf16.mxu0 %v5371_v17  ;;  %2115 = vmatprep.subr.bf16.mxu1 %v5372_v12 }
 0x640   :  { %v1799_v49 = vpop.f32.mrb[32].mxu0  ;;  %v1840_v45 = vpop.f32.mrb[32].mxu1 }
 0x641   :  { %v1934_v5 = vadd.f32 %v2747_v1, %v1799_v49  ;;  %v1801_v14 = vpop.f32.mrb[33].mxu0  ;;  %v1842_v29 = vpop.f32.mrb[33].mxu1  ;;  %v1936_v2 = vadd.f32 %v2749_v48, %v1840_v45 }
 0x642   :  { %v1935_v24 = vadd.f32 %v2748_v56, %v1801_v14  ;;  %v1803_v22 = vpop.f32.mrb[34].mxu0  ;;  %v1844_v30 = vpop.f32.mrb[34].mxu1 }
 0x643   :  { %v2751_v18 = vmul.f32 -1.442695, %v1934_v5  ;;  %v1804_v17 = vpop.f32.mrb[35].mxu0  ;;  %v1845_v19 = vpop.f32.mrb[35].mxu1 }
 0x644   :  { %v2752_v12 = vmul.f32 -1.442695, %v1935_v24 }
 0x645   :  { %2930 = vpow2.f32 %v2751_v18 }
 0x646   :  { %2932 = vpow2.f32 %v2752_v12 }
 0x647   :  { %2934 = vtanh.f32 %v1936_v2 }
 0x64f   :  { %v2931_v37 = vpop.eup %2930 }
 0x650   :  { %v2933_v10 = vpop.eup %2932  ;;  %v1945_v47 = vadd.f32 1.0, %v2931_v37 }
 0x651   :  { %v1951_v1 = vadd.f32 1.0, %v2933_v10  ;;  %v2935_v56 = vpop.eup %2934 }
 0x652   :  { %2936 = vrcp.f32 %v1945_v47 }
 0x653   :  { %2938 = vrcp.f32 %v1951_v1  ;;  %v2750_v1 = vld [vmem:[%s4574_s0 + $0xb8] sm:$0xff] }
 0x65c   :  { %v2937_v14 = vpop.eup %2936 }
 0x65d   :  { %v2939_v30 = vpop.eup %2938  ;;  %v1962_v17 = vmul.f32 %v2937_v14, %v2935_v56  ;;  %v1937_v56 = vadd.f32 %v2750_v1, %v1842_v29 }
 0x65e   :  { %v1961_v19 = vmul.f32 %v2939_v30, %v4084_v36 }
 0x65f   :  { %v2753_v30 = vmul.f32 -1.442695, %v1937_v56 }
 0x660   :  { %v4242_v18 = vadd.f32 %v1962_v17, %v1961_v19 }
 0x680   :  { %v1881_v24 = vpop.f32.mrb[36].mxu0  ;;  %v1922_v12 = vpop.f32.mrb[36].mxu1 }
 0x681   :  { %v1938_v22 = vadd.f32 %v1881_v24, %v5106_v60  ;;  %v1883_v48 = vpop.f32.mrb[37].mxu0  ;;  %v1924_v45 = vpop.f32.mrb[37].mxu1  ;;  %v1940_v19 = vadd.f32 %v1922_v12, %v3617_v63 }
 0x682   :  { %v1939_v37 = vadd.f32 %v1883_v48, %v3607_v31  ;;  %v1885_v2 = vpop.f32.mrb[38].mxu0  ;;  %v1926_v10 = vpop.f32.mrb[38].mxu1  ;;  %v1941_v14 = vadd.f32 %v1924_v45, %v3614_v16 }
 0x683   :  { %v2754_v47 = vmul.f32 -1.442695, %v1938_v22  ;;  %v1886_v49 = vpop.f32.mrb[39].mxu0  ;;  %v1927_v5 = vpop.f32.mrb[39].mxu1 }
 0x684   :  { %v2755_v36 = vmul.f32 -1.442695, %v1939_v37  ;;  %v2756_v17 = vmul.f32 -1.442695, %v1941_v14 }
 0x685   :  { %2940 = vpow2.f32 %v2754_v47 }
 0x686   :  { %2942 = vpow2.f32 %v2755_v36 }
 0x687   :  { %2944 = vpow2.f32 %v2753_v30 }
 0x688   :  { %2946 = vpow2.f32 %v2756_v17 }
 0x689   :  { %2948 = vtanh.f32 %v1940_v19 }
 0x68f   :  { %v2941_v24 = vpop.eup %2940 }
 0x690   :  { %v2943_v48 = vpop.eup %2942  ;;  %v1969_v22 = vadd.f32 1.0, %v2941_v24 }
 0x691   :  { %v1975_v2 = vadd.f32 1.0, %v2943_v48  ;;  %v2945_v10 = vpop.eup %2944 }
 0x692   :  { %2950 = vrcp.f32 %v1969_v22  ;;  %v2947_v37 = vpop.eup %2946  ;;  %v1958_v29 = vadd.f32 1.0, %v2945_v10  ;;  %v5375_v10 = vld [vmem:[#allocation115_spill] sm:$0xff] }
 0x693   :  { %2952 = vrcp.f32 %v1975_v2  ;;  %v2949_v47 = vpop.eup %2948  ;;  %v1982_v1 = vadd.f32 1.0, %v2947_v37  ;;  %v5374_v2 = vld [vmem:[#allocation112_spill] sm:$0xff]  ;;  %v5376_v37 = vld [vmem:[#allocation114_spill] sm:$0xff] }
 0x694   :  { %2954 = vtanh.f32 %v4242_v18 }
 0x695   :  { %2956 = vrcp.f32 %v1958_v29  ;;  %v5379_v29 = vld [vmem:[#allocation119_spill] sm:$0xff] }
 0x696   :  { %2958 = vrcp.f32 %v1982_v1  ;;  %v5382_v1 = vld [vmem:[#allocation120_spill] sm:$0xff] }
 0x69c   :  { %v2951_v49 = vpop.eup %2950 }
 0x69d   :  { %v2953_v5 = vpop.eup %2952  ;;  %v1986_v45 = vmul.f32 %v2951_v49, %v2949_v47  ;;  %v5377_v47 = vld [vmem:[#allocation117_spill] sm:$0xff]  ;;  %v5378_v49 = vld [vmem:[#allocation116_spill] sm:$0xff] }
 0x69e   :  { %v1985_v36 = vmul.f32 %v2953_v5, %v4095_v53  ;;  %v2955_v56 = vpop.eup %2954  ;;  %v5373_v53 = vld [vmem:[#allocation113_spill] sm:$0xff]  ;;  %v5380_v5 = vld [vmem:[#allocation118_spill] sm:$0xff] }
 0x69f   :  { %v2957_v14 = vpop.eup %2956 }
 0x6a0   :  { %v4253_v12 = vadd.f32 %v1986_v45, %v1985_v36  ;;  %v2959_v30 = vpop.eup %2958  ;;  %v1965_v19 = vmul.f32 %v2957_v14, %v2955_v56  ;;  %v5381_v45 = vld [vmem:[#allocation121_spill] sm:$0xff]  ;;  %v5383_v36 = vld [vmem:[#allocation123_spill] sm:$0xff]  ;;  %v5384_v56 = vld [vmem:[#allocation122_spill] sm:$0xff] }
 0x6a1   :  { %v5385_v14 = vld [vmem:[#allocation125_spill] sm:$0xff] }
 0x6a2   :  { %2960 = vtanh.f32 %v4253_v12  ;;  %v4256_v22 = vpack.c.bf16 %v1965_v19, %v1965_v19  ;;  %v5388_v19 = vld [vmem:[#allocation126_spill] sm:$0xff] }
 0x6ac   :  { %v2961_v17 = vpop.eup %2960 }
 0x6ad   :  { %v1989_v24 = vmul.f32 %v2961_v17, %v2959_v30  ;;  %v5386_v30 = vld [vmem:[#allocation124_spill] sm:$0xff]  ;;  %v5387_v17 = vld [vmem:[#allocation127_spill] sm:$0xff] }
 0x6af   :  { %v1991_v48 = vpack.c.bf16 %v1989_v24, %v1989_v24  ;;  %v5389_v24 = vld [vmem:[#allocation129_spill] sm:$0xff] }
 0x6b1   :  { %2024 = vmatprep.mubr.bf16.mxu0 %v1991_v48  ;;  %2065 = vmatprep.mubr.bf16.mxu1 %v1991_v48 }
 0x6b2   :  { %2025 = vmatmul.mubr.bf16.vlgmr.msra.gmra.mrb[40].mxu0 %v4256_v22  ;;  %2066 = vmatmul.mubr.bf16.vlgmr.msra.gmra.mrb[40].mxu1 %v4256_v22 }
 0x6b3   :  { %2075 = vmatpush1.bf16.msra.mxu0 %v5018_v54  ;;  %2116 = vmatpush1.bf16.msra.mxu1 %v5019_v20 }
 0x6b4   :  { %2106 = vmatprep.mubr.bf16.mxu0 %v1991_v48  ;;  %2147 = vmatprep.mubr.bf16.mxu1 %v1991_v48  ;;  %v5390_v48 = vld [vmem:[#allocation128_spill] sm:$0xff] }
 0x6b5   :  { %2076 = vmatprep.subr.bf16.mxu0 %v5020_v11  ;;  %2117 = vmatprep.subr.bf16.mxu1 %v5021_v3 }
 0x6b7   :  { %2077 = vmatpush1.bf16.msra.mxu0 %v5022_v4  ;;  %2118 = vmatpush1.bf16.msra.mxu1 %v5023_v0 }
 0x6b8   :  { %2078 = vmatprep.subr.bf16.mxu0 %v5024_v28  ;;  %2119 = vmatprep.subr.bf16.mxu1 %v5107_v9 }
 0x6bb   :  { %2079 = vmatpush1.bf16.msra.mxu0 %v5108_v39  ;;  %2120 = vmatpush1.bf16.msra.mxu1 %v5109_v32 }
 0x6bc   :  { %2080 = vmatprep.subr.bf16.mxu0 %v5110_v26  ;;  %2121 = vmatprep.subr.bf16.mxu1 %v5111_v55 }
 0x6bf   :  { %2081 = vmatpush1.bf16.msra.mxu0 %v5112_v51  ;;  %2122 = vmatpush1.bf16.msra.mxu1 %v5195_v52 }
 0x6c0   :  { %2082 = vmatprep.subr.bf16.mxu0 %v5196_v7  ;;  %2123 = vmatprep.subr.bf16.mxu1 %v5197_v38 }
 0x6c3   :  { %2083 = vmatpush1.bf16.msra.mxu0 %v5198_v57  ;;  %2124 = vmatpush1.bf16.msra.mxu1 %v5199_v46 }
 0x6c4   :  { %2084 = vmatprep.subr.bf16.mxu0 %v5200_v58  ;;  %2125 = vmatprep.subr.bf16.mxu1 %v5201_v59 }
 0x6c7   :  { %2085 = vmatpush1.bf16.msra.mxu0 %v5202_v25  ;;  %2126 = vmatpush1.bf16.msra.mxu1 %v5203_v21 }
 0x6c8   :  { %2086 = vmatprep.subr.bf16.mxu0 %v5204_v6  ;;  %2127 = vmatprep.subr.bf16.mxu1 %v5123_v61 }
 0x6cb   :  { %2087 = vmatpush1.bf16.msra.mxu0 %v5205_v40  ;;  %2128 = vmatpush1.bf16.msra.mxu1 %v5206_v8 }
 0x6cc   :  { %2088 = vmatprep.subr.bf16.mxu0 %v5207_v13  ;;  %2129 = vmatprep.subr.bf16.mxu1 %v5127_v42 }
 0x6cf   :  { %2089 = vmatpush1.bf16.msra.mxu0 %v5208_v15  ;;  %2130 = vmatpush1.bf16.msra.mxu1 %v5129_v43 }
 0x6d0   :  { %2090 = vmatprep.subr.bf16.mxu0 %v5130_v33  ;;  %2131 = vmatprep.subr.bf16.mxu1 %v5131_v41 }
 0x6d3   :  { %2091 = vmatpush1.bf16.msra.mxu0 %v5132_v34  ;;  %2132 = vmatpush1.bf16.msra.mxu1 %v5133_v27 }
 0x6d4   :  { %2092 = vmatprep.subr.bf16.mxu0 %v5052_v44  ;;  %2133 = vmatprep.subr.bf16.mxu1 %v5134_v35 }
 0x6d7   :  { %2093 = vmatpush1.bf16.msra.mxu0 %v5135_v62  ;;  %2134 = vmatpush1.bf16.msra.mxu1 %v5136_v50 }
 0x6d8   :  { %2094 = vmatprep.subr.bf16.mxu0 %v5056_v23  ;;  %2135 = vmatprep.subr.bf16.mxu1 %v5373_v53 }
 0x6db   :  { %2095 = vmatpush1.bf16.msra.mxu0 %v5374_v2  ;;  %2136 = vmatpush1.bf16.msra.mxu1 %v5375_v10 }
 0x6dc   :  { %2096 = vmatprep.subr.bf16.mxu0 %v5376_v37  ;;  %2137 = vmatprep.subr.bf16.mxu1 %v5377_v47  ;;  %v2759_v47 = vld [vmem:[%s4574_s0 + $0xd0] sm:$0xff] }
 0x6df   :  { %2097 = vmatpush1.bf16.msra.mxu0 %v5378_v49  ;;  %2138 = vmatpush1.bf16.msra.mxu1 %v5379_v29 }
 0x6e0   :  { %2098 = vmatprep.subr.bf16.mxu0 %v5380_v5  ;;  %2139 = vmatprep.subr.bf16.mxu1 %v5381_v45  ;;  %v5391_v5 = vld [vmem:[#allocation131_spill] sm:$0xff]  ;;  %v5392_v45 = vld [vmem:[#allocation130_spill] sm:$0xff] }
 0x6e3   :  { %2099 = vmatpush1.bf16.msra.mxu0 %v5382_v1  ;;  %2140 = vmatpush1.bf16.msra.mxu1 %v5383_v36  ;;  %v5393_v1 = vld [vmem:[#allocation133_spill] sm:$0xff]  ;;  %v5394_v36 = vld [vmem:[#allocation132_spill] sm:$0xff] }
 0x6e4   :  { %2100 = vmatprep.subr.bf16.mxu0 %v5384_v56  ;;  %2141 = vmatprep.subr.bf16.mxu1 %v5385_v14  ;;  %v5395_v56 = vld [vmem:[#allocation134_spill] sm:$0xff] }
 0x6e5   :  { %v5396_v14 = vld [vmem:[#allocation6_spill] sm:$0xff] }
 0x6e7   :  { %2101 = vmatpush1.bf16.msra.mxu0 %v5386_v30  ;;  %2142 = vmatpush1.bf16.msra.mxu1 %v5387_v17  ;;  %v5397_v30 = vld [vmem:[#allocation10_spill] sm:$0xff] }
 0x6e8   :  { %2102 = vmatprep.subr.bf16.mxu0 %v5388_v19  ;;  %2143 = vmatprep.subr.bf16.mxu1 %v5389_v24  ;;  %v5398_v24 = vld [vmem:[#allocation7_spill] sm:$0xff]  ;;  %v5407_v19 = vld [vmem:[#allocation18_spill] sm:$0xff] }
 0x6eb   :  { %2103 = vmatpush1.bf16.msra.mxu0 %v5390_v48  ;;  %2144 = vmatpush1.bf16.msra.mxu1 %v5391_v5  ;;  %v5399_v48 = vld [vmem:[#allocation11_spill] sm:$0xff]  ;;  %v5400_v5 = vld [vmem:[#allocation8_spill] sm:$0xff] }
 0x6ec   :  { %2104 = vmatprep.subr.bf16.mxu0 %v5392_v45  ;;  %2145 = vmatprep.subr.bf16.mxu1 %v5393_v1  ;;  %v5401_v45 = vld [vmem:[#allocation13_spill] sm:$0xff] }
 0x6ed   :  { %v5402_v1 = vld [vmem:[#allocation9_spill] sm:$0xff] }
 0x6ef   :  { %2105 = vmatpush1.bf16.msra.mxu0 %v5394_v36  ;;  %2146 = vmatpush1.bf16.msra.mxu1 %v5395_v56  ;;  %v5403_v36 = vld [vmem:[#allocation14_spill] sm:$0xff]  ;;  %v5404_v56 = vld [vmem:[#allocation12_spill] sm:$0xff] }
 0x6f0   :  { %2219 = vmatprep.subr.bf16.mxu0 %v5396_v14  ;;  %2260 = vmatprep.subr.bf16.mxu1 %v5397_v30  ;;  %v5405_v14 = vld [vmem:[#allocation16_spill] sm:$0xff]  ;;  %v5406_v30 = vld [vmem:[#allocation15_spill] sm:$0xff] }
 0x6f2   :  { %2107 = vmatmul.mubr.bf16.vlgmr.msra.gmra.mrb[44].mxu0 %v4256_v22  ;;  %2148 = vmatmul.mubr.bf16.vlgmr.msra.gmra.mrb[44].mxu1 %v4256_v22  ;;  %v5408_v22 = vld [vmem:[#allocation17_spill] sm:$0xff] }
 0x6f3   :  { %2220 = vmatpush1.bf16.msra.mxu0 %v5398_v24  ;;  %2261 = vmatpush1.bf16.msra.mxu1 %v5399_v48  ;;  %v5409_v24 = vld [vmem:[#allocation20_spill] sm:$0xff]  ;;  %v5410_v48 = vld [vmem:[#allocation19_spill] sm:$0xff] }
 0x6f4   :  { %2221 = vmatprep.subr.bf16.mxu0 %v5400_v5  ;;  %2262 = vmatprep.subr.bf16.mxu1 %v5401_v45  ;;  %v5411_v5 = vld [vmem:[#allocation22_spill] sm:$0xff]  ;;  %v5412_v45 = vld [vmem:[#allocation21_spill] sm:$0xff] }
 0x6f7   :  { %2222 = vmatpush1.bf16.msra.mxu0 %v5402_v1  ;;  %2263 = vmatpush1.bf16.msra.mxu1 %v5403_v36  ;;  %v5413_v1 = vld [vmem:[#allocation24_spill] sm:$0xff]  ;;  %v5414_v36 = vld [vmem:[#allocation23_spill] sm:$0xff] }
 0x6f8   :  { %2223 = vmatprep.subr.bf16.mxu0 %v5404_v56  ;;  %2264 = vmatprep.subr.bf16.mxu1 %v5405_v14  ;;  %v5415_v56 = vld [vmem:[#allocation26_spill] sm:$0xff]  ;;  %v5416_v14 = vld [vmem:[#allocation25_spill] sm:$0xff] }
 0x6fb   :  { %2224 = vmatpush1.bf16.msra.mxu0 %v5406_v30  ;;  %2265 = vmatpush1.bf16.msra.mxu1 %v5407_v19  ;;  %v5417_v30 = vld [vmem:[#allocation28_spill] sm:$0xff]  ;;  %v5418_v19 = vld [vmem:[#allocation27_spill] sm:$0xff] }
 0x6fc   :  { %2225 = vmatprep.subr.bf16.mxu0 %v5408_v22  ;;  %2266 = vmatprep.subr.bf16.mxu1 %v5409_v24  ;;  %v5419_v22 = vld [vmem:[#allocation30_spill] sm:$0xff]  ;;  %v5420_v24 = vld [vmem:[#allocation29_spill] sm:$0xff] }
 0x6ff   :  { %2226 = vmatpush1.bf16.msra.mxu0 %v5410_v48  ;;  %2267 = vmatpush1.bf16.msra.mxu1 %v5411_v5  ;;  %v5421_v48 = vld [vmem:[#allocation32_spill] sm:$0xff]  ;;  %v5422_v5 = vld [vmem:[#allocation31_spill] sm:$0xff] }
 0x700   :  { %2227 = vmatprep.subr.bf16.mxu0 %v5412_v45  ;;  %2268 = vmatprep.subr.bf16.mxu1 %v5413_v1  ;;  %v5423_v45 = vld [vmem:[#allocation34_spill] sm:$0xff]  ;;  %v5424_v1 = vld [vmem:[#allocation33_spill] sm:$0xff] }
 0x703   :  { %2228 = vmatpush1.bf16.msra.mxu0 %v5414_v36  ;;  %2269 = vmatpush1.bf16.msra.mxu1 %v5415_v56  ;;  %v5425_v36 = vld [vmem:[#allocation36_spill] sm:$0xff]  ;;  %v5426_v56 = vld [vmem:[#allocation35_spill] sm:$0xff] }
 0x704   :  { %2229 = vmatprep.subr.bf16.mxu0 %v5416_v14  ;;  %2270 = vmatprep.subr.bf16.mxu1 %v5417_v30  ;;  %v5427_v14 = vld [vmem:[#allocation38_spill] sm:$0xff]  ;;  %v5428_v30 = vld [vmem:[#allocation37_spill] sm:$0xff] }
 0x707   :  { %2230 = vmatpush1.bf16.msra.mxu0 %v5418_v19  ;;  %2271 = vmatpush1.bf16.msra.mxu1 %v5419_v22  ;;  %v5429_v19 = vld [vmem:[#allocation40_spill] sm:$0xff]  ;;  %v5430_v22 = vld [vmem:[#allocation39_spill] sm:$0xff] }
 0x708   :  { %2231 = vmatprep.subr.bf16.mxu0 %v5420_v24  ;;  %2272 = vmatprep.subr.bf16.mxu1 %v5421_v48  ;;  %v5431_v24 = vld [vmem:[#allocation42_spill] sm:$0xff]  ;;  %v5432_v48 = vld [vmem:[#allocation41_spill] sm:$0xff] }
 0x70b   :  { %2232 = vmatpush1.bf16.msra.mxu0 %v5422_v5  ;;  %2273 = vmatpush1.bf16.msra.mxu1 %v5423_v45  ;;  %v5433_v5 = vld [vmem:[#allocation44_spill] sm:$0xff]  ;;  %v5434_v45 = vld [vmem:[#allocation43_spill] sm:$0xff] }
 0x70c   :  { %2233 = vmatprep.subr.bf16.mxu0 %v5424_v1  ;;  %2274 = vmatprep.subr.bf16.mxu1 %v5425_v36  ;;  %v5435_v1 = vld [vmem:[#allocation46_spill] sm:$0xff]  ;;  %v5436_v36 = vld [vmem:[#allocation45_spill] sm:$0xff] }
 0x70f   :  { %2234 = vmatpush1.bf16.msra.mxu0 %v5426_v56  ;;  %2275 = vmatpush1.bf16.msra.mxu1 %v5427_v14  ;;  %v5437_v56 = vld [vmem:[#allocation48_spill] sm:$0xff]  ;;  %v5438_v14 = vld [vmem:[#allocation47_spill] sm:$0xff] }
 0x710   :  { %2235 = vmatprep.subr.bf16.mxu0 %v5428_v30  ;;  %2276 = vmatprep.subr.bf16.mxu1 %v5429_v19  ;;  %v5439_v30 = vld [vmem:[#allocation50_spill] sm:$0xff]  ;;  %v5440_v19 = vld [vmem:[#allocation49_spill] sm:$0xff] }
 0x713   :  { %2236 = vmatpush1.bf16.msra.mxu0 %v5430_v22  ;;  %2277 = vmatpush1.bf16.msra.mxu1 %v5431_v24  ;;  %v5441_v22 = vld [vmem:[#allocation52_spill] sm:$0xff]  ;;  %v5442_v24 = vld [vmem:[#allocation51_spill] sm:$0xff] }
 0x714   :  { %2237 = vmatprep.subr.bf16.mxu0 %v5432_v48  ;;  %2278 = vmatprep.subr.bf16.mxu1 %v5433_v5  ;;  %v5443_v48 = vld [vmem:[#allocation54_spill] sm:$0xff]  ;;  %v5444_v5 = vld [vmem:[#allocation53_spill] sm:$0xff] }
 0x717   :  { %2238 = vmatpush1.bf16.msra.mxu0 %v5434_v45  ;;  %2279 = vmatpush1.bf16.msra.mxu1 %v5435_v1  ;;  %v5445_v45 = vld [vmem:[#allocation56_spill] sm:$0xff]  ;;  %v5446_v1 = vld [vmem:[#allocation55_spill] sm:$0xff] }
 0x718   :  { %2239 = vmatprep.subr.bf16.mxu0 %v5436_v36  ;;  %2280 = vmatprep.subr.bf16.mxu1 %v5437_v56  ;;  %v5447_v36 = vld [vmem:[#allocation59_spill] sm:$0xff]  ;;  %v5448_v56 = vld [vmem:[#allocation57_spill] sm:$0xff] }
 0x71b   :  { %2240 = vmatpush1.bf16.msra.mxu0 %v5438_v14  ;;  %2281 = vmatpush1.bf16.msra.mxu1 %v5439_v30  ;;  %v5449_v14 = vld [vmem:[#allocation61_spill] sm:$0xff]  ;;  %v5450_v30 = vld [vmem:[#allocation60_spill] sm:$0xff] }
 0x71c   :  { %2241 = vmatprep.subr.bf16.mxu0 %v5440_v19  ;;  %2282 = vmatprep.subr.bf16.mxu1 %v5441_v22  ;;  %v5451_v19 = vld [vmem:[#allocation63_spill] sm:$0xff]  ;;  %v5452_v22 = vld [vmem:[#allocation62_spill] sm:$0xff] }
 0x71f   :  { %2242 = vmatpush1.bf16.msra.mxu0 %v5442_v24  ;;  %2283 = vmatpush1.bf16.msra.mxu1 %v5443_v48  ;;  %v5453_v24 = vld [vmem:[#allocation65_spill] sm:$0xff]  ;;  %v5454_v48 = vld [vmem:[#allocation64_spill] sm:$0xff] }
 0x720   :  { %2243 = vmatprep.subr.bf16.mxu0 %v5444_v5  ;;  %2284 = vmatprep.subr.bf16.mxu1 %v5445_v45  ;;  %v5455_v5 = vld [vmem:[#allocation67_spill] sm:$0xff]  ;;  %v5456_v45 = vld [vmem:[#allocation66_spill] sm:$0xff] }
 0x723   :  { %2244 = vmatpush1.bf16.msra.mxu0 %v5446_v1  ;;  %2285 = vmatpush1.bf16.msra.mxu1 %v5447_v36  ;;  %v5457_v1 = vld [vmem:[#allocation69_spill] sm:$0xff]  ;;  %v5458_v36 = vld [vmem:[#allocation68_spill] sm:$0xff] }
 0x724   :  { %2245 = vmatprep.subr.bf16.mxu0 %v5448_v56  ;;  %2286 = vmatprep.subr.bf16.mxu1 %v5449_v14  ;;  %v5459_v56 = vld [vmem:[#allocation71_spill] sm:$0xff]  ;;  %v5460_v14 = vld [vmem:[#allocation70_spill] sm:$0xff] }
 0x727   :  { %2246 = vmatpush1.bf16.msra.mxu0 %v5450_v30  ;;  %2287 = vmatpush1.bf16.msra.mxu1 %v5451_v19  ;;  %v5461_v30 = vld [vmem:[#allocation73_spill] sm:$0xff] }
 0x728   :  { %2247 = vmatprep.subr.bf16.mxu0 %v5452_v22  ;;  %2288 = vmatprep.subr.bf16.mxu1 %v5453_v24  ;;  %v2757_v19 = vld [vmem:[%s4574_s0 + $0xc0] sm:$0xff]  ;;  %v2758_v22 = vld [vmem:[%s4574_s0 + $0xc8] sm:$0xff] }
 0x72b   :  { %2248 = vmatpush1.bf16.msra.mxu0 %v5454_v48  ;;  %2289 = vmatpush1.bf16.msra.mxu1 %v5455_v5 }
 0x72c   :  { %2249 = vmatprep.subr.bf16.mxu0 %v5456_v45  ;;  %2290 = vmatprep.subr.bf16.mxu1 %v5457_v1 }
 0x72f   :  { %2250 = vmatpush1.bf16.msra.mxu0 %v5458_v36  ;;  %2291 = vmatpush1.bf16.msra.mxu1 %v5459_v56 }
 0x730   :  { %2301 = vmatprep.subr.bf16.mxu0 %v5460_v14  ;;  %2342 = vmatprep.subr.bf16.mxu1 %v5461_v30 }
 0x785   :  { %v2026_v24 = vpop.f32.mrb[40].mxu0  ;;  %v2067_v48 = vpop.f32.mrb[40].mxu1 }
 0x786   :  { %v2161_v5 = vadd.f32 %v2757_v19, %v2026_v24  ;;  %v2028_v45 = vpop.f32.mrb[41].mxu0  ;;  %v2069_v1 = vpop.f32.mrb[41].mxu1  ;;  %v2163_v37 = vadd.f32 %v2759_v47, %v2067_v48 }
 0x787   :  { %v2162_v36 = vadd.f32 %v2758_v22, %v2028_v45  ;;  %v2030_v17 = vpop.f32.mrb[42].mxu0  ;;  %v2071_v56 = vpop.f32.mrb[42].mxu1 }
 0x788   :  { %v2761_v29 = vmul.f32 -1.442695, %v2161_v5  ;;  %v2031_v14 = vpop.f32.mrb[43].mxu0  ;;  %v2072_v49 = vpop.f32.mrb[43].mxu1 }
 0x789   :  { %v2762_v30 = vmul.f32 -1.442695, %v2162_v36 }
 0x78a   :  { %2962 = vpow2.f32 %v2761_v29 }
 0x78b   :  { %2964 = vpow2.f32 %v2762_v30 }
 0x78c   :  { %2966 = vtanh.f32 %v2163_v37 }
 0x794   :  { %v2963_v10 = vpop.eup %2962 }
 0x795   :  { %v2965_v2 = vpop.eup %2964  ;;  %v2172_v53 = vadd.f32 1.0, %v2963_v10 }
 0x796   :  { %v2178_v19 = vadd.f32 1.0, %v2965_v2  ;;  %v2967_v17 = vpop.eup %2966 }
 0x797   :  { %2968 = vrcp.f32 %v2172_v53 }
 0x798   :  { %2970 = vrcp.f32 %v2178_v19  ;;  %v2760_v19 = vld [vmem:[%s4574_s0 + $0xd8] sm:$0xff] }
 0x7a1   :  { %v2969_v22 = vpop.eup %2968 }
 0x7a2   :  { %v2971_v24 = vpop.eup %2970  ;;  %v2189_v14 = vmul.f32 %v2969_v22, %v2967_v17  ;;  %v2164_v17 = vadd.f32 %v2760_v19, %v2069_v1 }
 0x7a3   :  { %v2188_v49 = vmul.f32 %v2971_v24, %v4242_v18 }
 0x7a4   :  { %v2763_v24 = vmul.f32 -1.442695, %v2164_v17 }
 0x7a5   :  { %v4400_v29 = vadd.f32 %v2189_v14, %v2188_v49 }
 0x7a7   :  { %5462 = vst [vmem:[#allocation72_spill] sm:$0xff] %v4400_v29 }
 0x7c5   :  { %v2108_v30 = vpop.f32.mrb[44].mxu0  ;;  %v2149_v5 = vpop.f32.mrb[44].mxu1 }
 0x7c6   :  { %v2165_v45 = vadd.f32 %v2108_v30, %v5106_v60  ;;  %v2110_v47 = vpop.f32.mrb[45].mxu0  ;;  %v2151_v48 = vpop.f32.mrb[45].mxu1  ;;  %v2167_v49 = vadd.f32 %v2149_v5, %v3617_v63  ;;  %v5483_v63 = vld [vmem:[#allocation130_spill] sm:$0xff] }
 0x7c7   :  { %v2166_v10 = vadd.f32 %v2110_v47, %v3607_v31  ;;  %v2112_v37 = vpop.f32.mrb[46].mxu0  ;;  %v2153_v2 = vpop.f32.mrb[46].mxu1  ;;  %v2168_v22 = vadd.f32 %v2151_v48, %v3614_v16  ;;  %v5484_v16 = vld [vmem:[#allocation133_spill] sm:$0xff]  ;;  %v5485_v31 = vld [vmem:[#allocation132_spill] sm:$0xff]  ;;  %v5486_v60 = vld [vmem:[#allocation134_spill] sm:$0xff] }
 0x7c8   :  { %v2764_v53 = vmul.f32 -1.442695, %v2165_v45  ;;  %v2113_v36 = vpop.f32.mrb[47].mxu0  ;;  %v2154_v56 = vpop.f32.mrb[47].mxu1 }
 0x7c9   :  { %v2765_v18 = vmul.f32 -1.442695, %v2166_v10  ;;  %v2766_v14 = vmul.f32 -1.442695, %v2168_v22 }
 0x7ca   :  { %2972 = vpow2.f32 %v2764_v53 }
 0x7cb   :  { %2974 = vpow2.f32 %v2765_v18 }
 0x7cc   :  { %2976 = vpow2.f32 %v2763_v24 }
 0x7cd   :  { %2978 = vpow2.f32 %v2766_v14 }
 0x7ce   :  { %2980 = vtanh.f32 %v2167_v49 }
 0x7d4   :  { %v2973_v30 = vpop.eup %2972 }
 0x7d5   :  { %v2975_v47 = vpop.eup %2974  ;;  %v2196_v45 = vadd.f32 1.0, %v2973_v30 }
 0x7d6   :  { %v2202_v37 = vadd.f32 1.0, %v2975_v47  ;;  %v2977_v2 = vpop.eup %2976 }
 0x7d7   :  { %2982 = vrcp.f32 %v2196_v45  ;;  %v2979_v10 = vpop.eup %2978  ;;  %v2185_v1 = vadd.f32 1.0, %v2977_v2  ;;  %v5466_v2 = vld [vmem:[#allocation115_spill] sm:$0xff] }
 0x7d8   :  { %2984 = vrcp.f32 %v2202_v37  ;;  %v2981_v53 = vpop.eup %2980  ;;  %v2209_v19 = vadd.f32 1.0, %v2979_v10  ;;  %v5465_v37 = vld [vmem:[#allocation112_spill] sm:$0xff]  ;;  %v5467_v10 = vld [vmem:[#allocation114_spill] sm:$0xff] }
 0x7d9   :  { %2986 = vtanh.f32 %v4400_v29  ;;  %v5487_v29 = vld [vmem:[#allocation70_spill] sm:$0xff] }
 0x7da   :  { %2988 = vrcp.f32 %v2185_v1  ;;  %v5470_v1 = vld [vmem:[#allocation119_spill] sm:$0xff] }
 0x7db   :  { %2990 = vrcp.f32 %v2209_v19  ;;  %v5473_v19 = vld [vmem:[#allocation120_spill] sm:$0xff] }
 0x7e1   :  { %v2983_v36 = vpop.eup %2982 }
 0x7e2   :  { %v2985_v56 = vpop.eup %2984  ;;  %v2213_v48 = vmul.f32 %v2983_v36, %v2981_v53  ;;  %v5468_v53 = vld [vmem:[#allocation117_spill] sm:$0xff]  ;;  %v5469_v36 = vld [vmem:[#allocation116_spill] sm:$0xff] }
 0x7e3   :  { %v2212_v18 = vmul.f32 %v2985_v56, %v4253_v12  ;;  %v2987_v17 = vpop.eup %2986  ;;  %v5464_v12 = vld [vmem:[#allocation113_spill] sm:$0xff]  ;;  %v5471_v56 = vld [vmem:[#allocation118_spill] sm:$0xff] }
 0x7e4   :  { %v2989_v22 = vpop.eup %2988 }
 0x7e5   :  { %v4411_v5 = vadd.f32 %v2213_v48, %v2212_v18  ;;  %v2991_v24 = vpop.eup %2990  ;;  %v2192_v49 = vmul.f32 %v2989_v22, %v2987_v17  ;;  %v5472_v48 = vld [vmem:[#allocation121_spill] sm:$0xff]  ;;  %v5474_v18 = vld [vmem:[#allocation123_spill] sm:$0xff]  ;;  %v5475_v17 = vld [vmem:[#allocation122_spill] sm:$0xff] }
 0x7e6   :  { %v5476_v22 = vld [vmem:[#allocation125_spill] sm:$0xff] }
 0x7e7   :  { %5463 = vst [vmem:[#allocation75_spill] sm:$0xff] %v4411_v5  ;;  %2992 = vtanh.f32 %v4411_v5  ;;  %v4414_v45 = vpack.c.bf16 %v2192_v49, %v2192_v49  ;;  %v5479_v49 = vld [vmem:[#allocation126_spill] sm:$0xff]  ;;  %v5482_v5 = vld [vmem:[#allocation131_spill] sm:$0xff] }
 0x7f1   :  { %v2993_v14 = vpop.eup %2992 }
 0x7f2   :  { %v2216_v30 = vmul.f32 %v2993_v14, %v2991_v24  ;;  %v5477_v24 = vld [vmem:[#allocation124_spill] sm:$0xff]  ;;  %v5478_v14 = vld [vmem:[#allocation127_spill] sm:$0xff] }
 0x7f4   :  { %v2218_v47 = vpack.c.bf16 %v2216_v30, %v2216_v30  ;;  %v5480_v30 = vld [vmem:[#allocation129_spill] sm:$0xff] }
 0x7f6   :  { %2251 = vmatprep.mubr.bf16.mxu0 %v2218_v47  ;;  %2292 = vmatprep.mubr.bf16.mxu1 %v2218_v47 }
 0x7f7   :  { %2252 = vmatmul.mubr.bf16.vlgmr.msra.gmra.mrb[48].mxu0 %v4414_v45  ;;  %2293 = vmatmul.mubr.bf16.vlgmr.msra.gmra.mrb[48].mxu1 %v4414_v45 }
 0x7f8   :  { %2302 = vmatpush1.bf16.msra.mxu0 %v5018_v54  ;;  %2343 = vmatpush1.bf16.msra.mxu1 %v5019_v20 }
 0x7f9   :  { %2333 = vmatprep.mubr.bf16.mxu0 %v2218_v47  ;;  %2374 = vmatprep.mubr.bf16.mxu1 %v2218_v47  ;;  %v5481_v47 = vld [vmem:[#allocation128_spill] sm:$0xff] }
 0x7fa   :  { %2303 = vmatprep.subr.bf16.mxu0 %v5020_v11  ;;  %2344 = vmatprep.subr.bf16.mxu1 %v5021_v3 }
 0x7fc   :  { %2304 = vmatpush1.bf16.msra.mxu0 %v5022_v4  ;;  %2345 = vmatpush1.bf16.msra.mxu1 %v5023_v0 }
 0x7fd   :  { %2305 = vmatprep.subr.bf16.mxu0 %v5024_v28  ;;  %2346 = vmatprep.subr.bf16.mxu1 %v5107_v9 }
 0x800   :  { %2306 = vmatpush1.bf16.msra.mxu0 %v5108_v39  ;;  %2347 = vmatpush1.bf16.msra.mxu1 %v5109_v32 }
 0x801   :  { %2307 = vmatprep.subr.bf16.mxu0 %v5110_v26  ;;  %2348 = vmatprep.subr.bf16.mxu1 %v5111_v55 }
 0x804   :  { %2308 = vmatpush1.bf16.msra.mxu0 %v5112_v51  ;;  %2349 = vmatpush1.bf16.msra.mxu1 %v5195_v52 }
 0x805   :  { %2309 = vmatprep.subr.bf16.mxu0 %v5196_v7  ;;  %2350 = vmatprep.subr.bf16.mxu1 %v5197_v38 }
 0x808   :  { %2310 = vmatpush1.bf16.msra.mxu0 %v5198_v57  ;;  %2351 = vmatpush1.bf16.msra.mxu1 %v5199_v46 }
 0x809   :  { %2311 = vmatprep.subr.bf16.mxu0 %v5200_v58  ;;  %2352 = vmatprep.subr.bf16.mxu1 %v5201_v59 }
 0x80c   :  { %2312 = vmatpush1.bf16.msra.mxu0 %v5202_v25  ;;  %2353 = vmatpush1.bf16.msra.mxu1 %v5203_v21 }
 0x80d   :  { %2313 = vmatprep.subr.bf16.mxu0 %v5204_v6  ;;  %2354 = vmatprep.subr.bf16.mxu1 %v5123_v61 }
 0x810   :  { %2314 = vmatpush1.bf16.msra.mxu0 %v5205_v40  ;;  %2355 = vmatpush1.bf16.msra.mxu1 %v5206_v8 }
 0x811   :  { %2315 = vmatprep.subr.bf16.mxu0 %v5207_v13  ;;  %2356 = vmatprep.subr.bf16.mxu1 %v5127_v42 }
 0x814   :  { %2316 = vmatpush1.bf16.msra.mxu0 %v5208_v15  ;;  %2357 = vmatpush1.bf16.msra.mxu1 %v5129_v43 }
 0x815   :  { %2317 = vmatprep.subr.bf16.mxu0 %v5130_v33  ;;  %2358 = vmatprep.subr.bf16.mxu1 %v5131_v41 }
 0x818   :  { %2318 = vmatpush1.bf16.msra.mxu0 %v5132_v34  ;;  %2359 = vmatpush1.bf16.msra.mxu1 %v5133_v27 }
 0x819   :  { %2319 = vmatprep.subr.bf16.mxu0 %v5052_v44  ;;  %2360 = vmatprep.subr.bf16.mxu1 %v5134_v35 }
 0x81c   :  { %2320 = vmatpush1.bf16.msra.mxu0 %v5135_v62  ;;  %2361 = vmatpush1.bf16.msra.mxu1 %v5136_v50 }
 0x81d   :  { %2321 = vmatprep.subr.bf16.mxu0 %v5056_v23  ;;  %2362 = vmatprep.subr.bf16.mxu1 %v5464_v12 }
 0x820   :  { %2322 = vmatpush1.bf16.msra.mxu0 %v5465_v37  ;;  %2363 = vmatpush1.bf16.msra.mxu1 %v5466_v2 }
 0x821   :  { %2323 = vmatprep.subr.bf16.mxu0 %v5467_v10  ;;  %2364 = vmatprep.subr.bf16.mxu1 %v5468_v53 }
 0x824   :  { %2324 = vmatpush1.bf16.msra.mxu0 %v5469_v36  ;;  %2365 = vmatpush1.bf16.msra.mxu1 %v5470_v1 }
 0x825   :  { %2325 = vmatprep.subr.bf16.mxu0 %v5471_v56  ;;  %2366 = vmatprep.subr.bf16.mxu1 %v5472_v48 }
 0x828   :  { %2326 = vmatpush1.bf16.msra.mxu0 %v5473_v19  ;;  %2367 = vmatpush1.bf16.msra.mxu1 %v5474_v18 }
 0x829   :  { %2327 = vmatprep.subr.bf16.mxu0 %v5475_v17  ;;  %2368 = vmatprep.subr.bf16.mxu1 %v5476_v22 }
 0x82c   :  { %2328 = vmatpush1.bf16.msra.mxu0 %v5477_v24  ;;  %2369 = vmatpush1.bf16.msra.mxu1 %v5478_v14  ;;  %v5488_v24 = vld [vmem:[#allocation73_spill] sm:$0xff] }
 0x82d   :  { %2329 = vmatprep.subr.bf16.mxu0 %v5479_v49  ;;  %2370 = vmatprep.subr.bf16.mxu1 %v5480_v30 }
 0x830   :  { %2330 = vmatpush1.bf16.msra.mxu0 %v5481_v47  ;;  %2371 = vmatpush1.bf16.msra.mxu1 %v5482_v5 }
 0x831   :  { %2331 = vmatprep.subr.bf16.mxu0 %v5483_v63  ;;  %2372 = vmatprep.subr.bf16.mxu1 %v5484_v16 }
 0x834   :  { %2332 = vmatpush1.bf16.msra.mxu0 %v5485_v31  ;;  %2373 = vmatpush1.bf16.msra.mxu1 %v5486_v60 }
 0x835   :  { %2446 = vmatprep.subr.bf16.mxu0 %v5487_v29  ;;  %2487 = vmatprep.subr.bf16.mxu1 %v5488_v24 }
 0x837   :  { %2334 = vmatmul.mubr.bf16.vlgmr.msra.gmra.mrb[52].mxu0 %v4414_v45  ;;  %2375 = vmatmul.mubr.bf16.vlgmr.msra.gmra.mrb[52].mxu1 %v4414_v45 }
 0x838   :  { %2447 = vmatpush1.bf16.msra.mxu0 %v5018_v54  ;;  %2488 = vmatpush1.bf16.msra.mxu1 %v5019_v20  ;;  %v5489_v54 = vld [vmem:[#allocation124_spill] sm:$0xff]  ;;  %v2767_v20 = vld [vmem:[%s4574_s0 + $0xe0] sm:$0xff] }
 0x839   :  { %2448 = vmatprep.subr.bf16.mxu0 %v5020_v11  ;;  %2489 = vmatprep.subr.bf16.mxu1 %v5021_v3  ;;  %v2768_v11 = vld [vmem:[%s4574_s0 + $0xe8] sm:$0xff] }
 0x83c   :  { %2449 = vmatpush1.bf16.msra.mxu0 %v5022_v4  ;;  %2490 = vmatpush1.bf16.msra.mxu1 %v5023_v0 }
 0x83d   :  { %2450 = vmatprep.subr.bf16.mxu0 %v5024_v28  ;;  %2491 = vmatprep.subr.bf16.mxu1 %v5107_v9 }
 0x840   :  { %2451 = vmatpush1.bf16.msra.mxu0 %v5108_v39  ;;  %2492 = vmatpush1.bf16.msra.mxu1 %v5109_v32  ;;  %v2770_v32 = vld [vmem:[%s4574_s0 + $0xf8] sm:$0xff] }
 0x841   :  { %2452 = vmatprep.subr.bf16.mxu0 %v5110_v26  ;;  %2493 = vmatprep.subr.bf16.mxu1 %v5111_v55  ;;  %v2769_v55 = vld [vmem:[%s4574_s0 + $0xf0] sm:$0xff] }
 0x844   :  { %2453 = vmatpush1.bf16.msra.mxu0 %v5112_v51  ;;  %2494 = vmatpush1.bf16.msra.mxu1 %v5195_v52 }
 0x845   :  { %2454 = vmatprep.subr.bf16.mxu0 %v5196_v7  ;;  %2495 = vmatprep.subr.bf16.mxu1 %v5197_v38  ;;  %v5490_v7 = vld [vmem:[#allocation72_spill] sm:$0xff] }
 0x848   :  { %2455 = vmatpush1.bf16.msra.mxu0 %v5198_v57  ;;  %2496 = vmatpush1.bf16.msra.mxu1 %v5199_v46 }
 0x849   :  { %2456 = vmatprep.subr.bf16.mxu0 %v5200_v58  ;;  %2497 = vmatprep.subr.bf16.mxu1 %v5201_v59 }
 0x84c   :  { %2457 = vmatpush1.bf16.msra.mxu0 %v5202_v25  ;;  %2498 = vmatpush1.bf16.msra.mxu1 %v5203_v21 }
 0x84d   :  { %2458 = vmatprep.subr.bf16.mxu0 %v5204_v6  ;;  %2499 = vmatprep.subr.bf16.mxu1 %v5123_v61  ;;  %v5491_v6 = vld [vmem:[#allocation58_spill] sm:$0xff] }
 0x850   :  { %2459 = vmatpush1.bf16.msra.mxu0 %v5205_v40  ;;  %2500 = vmatpush1.bf16.msra.mxu1 %v5206_v8 }
 0x851   :  { %2460 = vmatprep.subr.bf16.mxu0 %v5207_v13  ;;  %2501 = vmatprep.subr.bf16.mxu1 %v5127_v42 }
 0x854   :  { %2461 = vmatpush1.bf16.msra.mxu0 %v5208_v15  ;;  %2502 = vmatpush1.bf16.msra.mxu1 %v5129_v43  ;;  %v5492_v15 = vld [vmem:[#allocation135_spill] sm:$0xff] }
 0x855   :  { %2462 = vmatprep.subr.bf16.mxu0 %v5130_v33  ;;  %2503 = vmatprep.subr.bf16.mxu1 %v5131_v41 }
 0x858   :  { %2463 = vmatpush1.bf16.msra.mxu0 %v5132_v34  ;;  %2504 = vmatpush1.bf16.msra.mxu1 %v5133_v27 }
 0x859   :  { %2464 = vmatprep.subr.bf16.mxu0 %v5052_v44  ;;  %2505 = vmatprep.subr.bf16.mxu1 %v5134_v35 }
 0x85c   :  { %2465 = vmatpush1.bf16.msra.mxu0 %v5135_v62  ;;  %2506 = vmatpush1.bf16.msra.mxu1 %v5136_v50 }
 0x85d   :  { %2466 = vmatprep.subr.bf16.mxu0 %v5056_v23  ;;  %2507 = vmatprep.subr.bf16.mxu1 %v5464_v12 }
 0x860   :  { %2467 = vmatpush1.bf16.msra.mxu0 %v5465_v37  ;;  %2508 = vmatpush1.bf16.msra.mxu1 %v5466_v2 }
 0x861   :  { %2468 = vmatprep.subr.bf16.mxu0 %v5467_v10  ;;  %2509 = vmatprep.subr.bf16.mxu1 %v5468_v53  ;;  %v5493_v53 = vld [vmem:[#allocation136_spill] sm:$0xff] }
 0x864   :  { %2469 = vmatpush1.bf16.msra.mxu0 %v5469_v36  ;;  %2510 = vmatpush1.bf16.msra.mxu1 %v5470_v1 }
 0x865   :  { %2470 = vmatprep.subr.bf16.mxu0 %v5471_v56  ;;  %2511 = vmatprep.subr.bf16.mxu1 %v5472_v48  ;;  %v5494_v56 = vld [vmem:[#allocation137_spill] sm:$0xff] }
 0x868   :  { %2471 = vmatpush1.bf16.msra.mxu0 %v5473_v19  ;;  %2512 = vmatpush1.bf16.msra.mxu1 %v5474_v18 }
 0x869   :  { %2472 = vmatprep.subr.bf16.mxu0 %v5475_v17  ;;  %2513 = vmatprep.subr.bf16.mxu1 %v5476_v22 }
 0x86c   :  { %2473 = vmatpush1.bf16.msra.mxu0 %v5489_v54  ;;  %2514 = vmatpush1.bf16.msra.mxu1 %v5478_v14 }
 0x86d   :  { %2474 = vmatprep.subr.bf16.mxu0 %v5479_v49  ;;  %2515 = vmatprep.subr.bf16.mxu1 %v5480_v30 }
 0x870   :  { %2475 = vmatpush1.bf16.msra.mxu0 %v5481_v47  ;;  %2516 = vmatpush1.bf16.msra.mxu1 %v5482_v5 }
 0x871   :  { %2476 = vmatprep.subr.bf16.mxu0 %v5483_v63  ;;  %2517 = vmatprep.subr.bf16.mxu1 %v5484_v16 }
 0x874   :  { %2477 = vmatpush1.bf16.msra.mxu0 %v5485_v31  ;;  %2518 = vmatpush1.bf16.msra.mxu1 %v5486_v60 }
 0x8ca   :  { %v2253_v3 = vpop.f32.mrb[48].mxu0  ;;  %v2294_v4 = vpop.f32.mrb[48].mxu1 }
 0x8cb   :  { %v2388_v0 = vadd.f32 %v2767_v20, %v2253_v3  ;;  %v2255_v28 = vpop.f32.mrb[49].mxu0  ;;  %v2296_v44 = vpop.f32.mrb[49].mxu1  ;;  %v2390_v35 = vadd.f32 %v2769_v55, %v2294_v4  ;;  %v5495_v20 = vld [vmem:[#allocation75_spill] sm:$0xff] }
 0x8cc   :  { %v2389_v63 = vadd.f32 %v2768_v11, %v2255_v28  ;;  %v2257_v23 = vpop.f32.mrb[50].mxu0  ;;  %v2298_v16 = vpop.f32.mrb[50].mxu1  ;;  %v2391_v26 = vadd.f32 %v2770_v32, %v2296_v44 }
 0x8cd   :  { %v2771_v9 = vmul.f32 -1.442695, %v2388_v0  ;;  %v2258_v31 = vpop.f32.mrb[51].mxu0  ;;  %v2299_v39 = vpop.f32.mrb[51].mxu1 }
 0x8ce   :  { %v2772_v60 = vmul.f32 -1.442695, %v2389_v63  ;;  %v2773_v51 = vmul.f32 -1.442695, %v2391_v26 }
 0x8cf   :  { %2994 = vpow2.f32 %v2771_v9 }
 0x8d0   :  { %2996 = vpow2.f32 %v2772_v60 }
 0x8d1   :  { %2998 = vpow2.f32 %v2773_v51 }
 0x8d2   :  { %3000 = vtanh.f32 %v2390_v35 }
 0x8d9   :  { %v2995_v62 = vpop.eup %2994 }
 0x8da   :  { %v2997_v50 = vpop.eup %2996  ;;  %v2399_v42 = vadd.f32 1.0, %v2995_v62 }
 0x8db   :  { %v2405_v43 = vadd.f32 1.0, %v2997_v50  ;;  %v2999_v33 = vpop.eup %2998 }
 0x8dc   :  { %3002 = vrcp.f32 %v2399_v42  ;;  %v3001_v41 = vpop.eup %3000  ;;  %v2412_v52 = vadd.f32 1.0, %v2999_v33 }
 0x8dd   :  { %3004 = vrcp.f32 %v2405_v43 }
 0x8de   :  { %3006 = vrcp.f32 %v2412_v52 }
 0x8e6   :  { %v3003_v34 = vpop.eup %3002 }
 0x8e7   :  { %v3005_v27 = vpop.eup %3004  ;;  %v2416_v61 = vmul.f32 %v3003_v34, %v3001_v41 }
 0x8e8   :  { %v2415_v38 = vmul.f32 %v3005_v27, %v5490_v7  ;;  %v3007_v46 = vpop.eup %3006 }
 0x8ea   :  { %v2417_v57 = vadd.f32 %v2416_v61, %v2415_v38 }
 0x8ec   :  { %3008 = vtanh.f32 %v2417_v57 }
 0x8f6   :  { %v3009_v58 = vpop.eup %3008 }
 0x8f7   :  { %v2419_v59 = vmul.f32 %v3009_v58, %v3007_v46 }
 0x8f9   :  { %v2444_v63 = vpack.c.bf16 %v2419_v59, %v2419_v59 }
 0x90a   :  { %v2335_v25 = vpop.f32.mrb[52].mxu0  ;;  %v2376_v21 = vpop.f32.mrb[52].mxu1 }
 0x90b   :  { %v2392_v40 = vadd.f32 %v2335_v25, %v5491_v6  ;;  %v2337_v8 = vpop.f32.mrb[53].mxu0  ;;  %v2378_v13 = vpop.f32.mrb[53].mxu1  ;;  %v2394_v48 = vadd.f32 %v2376_v21, %v5494_v56 }
 0x90c   :  { %v2393_v29 = vadd.f32 %v2337_v8, %v5492_v15  ;;  %v2339_v5 = vpop.f32.mrb[54].mxu0  ;;  %v2380_v45 = vpop.f32.mrb[54].mxu1  ;;  %v2395_v36 = vadd.f32 %v2378_v13, %v5493_v53  ;;  %v2781_v13 = vld [vmem:[#allocation2] ss:$0 sm:$0xff] }
 0x90d   :  { %v2774_v12 = vmul.f32 -1.442695, %v2392_v40  ;;  %v2340_v37 = vpop.f32.mrb[55].mxu0  ;;  %v2381_v2 = vpop.f32.mrb[55].mxu1 }
 0x90e   :  { %v2775_v10 = vmul.f32 -1.442695, %v2393_v29  ;;  %v2776_v1 = vmul.f32 -1.442695, %v2395_v36 }
 0x90f   :  { %3010 = vpow2.f32 %v2774_v12 }
 0x910   :  { %3012 = vpow2.f32 %v2775_v10 }
 0x911   :  { %3014 = vpow2.f32 %v2776_v1 }
 0x912   :  { %3016 = vtanh.f32 %v2394_v48 }
 0x919   :  { %v3011_v19 = vpop.eup %3010 }
 0x91a   :  { %v3013_v18 = vpop.eup %3012  ;;  %v2423_v17 = vadd.f32 1.0, %v3011_v19 }
 0x91b   :  { %v2429_v22 = vadd.f32 1.0, %v3013_v18  ;;  %v3015_v24 = vpop.eup %3014 }
 0x91c   :  { %3018 = vrcp.f32 %v2423_v17  ;;  %v3017_v14 = vpop.eup %3016  ;;  %v2436_v54 = vadd.f32 1.0, %v3015_v24 }
 0x91d   :  { %3020 = vrcp.f32 %v2429_v22 }
 0x91e   :  { %3022 = vrcp.f32 %v2436_v54 }
 0x926   :  { %v3019_v49 = vpop.eup %3018 }
 0x927   :  { %v3021_v30 = vpop.eup %3020  ;;  %v2440_v47 = vmul.f32 %v3019_v49, %v3017_v14 }
 0x928   :  { %v2439_v11 = vmul.f32 %v3021_v30, %v5495_v20  ;;  %v3023_v4 = vpop.eup %3022 }
 0x92a   :  { %v2441_v3 = vadd.f32 %v2440_v47, %v2439_v11 }
 0x92c   :  { %3024 = vtanh.f32 %v2441_v3 }
 0x936   :  { %v3025_v0 = vpop.eup %3024 }
 0x937   :  { %v2443_v28 = vmul.f32 %v3025_v0, %v3023_v4 }
 0x939   :  { %v2445_v44 = vpack.c.bf16 %v2443_v28, %v2443_v28 }
 0x93b   :  { %2478 = vmatprep.mubr.bf16.mxu0 %v2445_v44  ;;  %2519 = vmatprep.mubr.bf16.mxu1 %v2445_v44 }
 0x93c   :  { %2479 = vmatmul.mubr.bf16.vlgmr.msra.gmra.mrb[56].mxu0 %v2444_v63  ;;  %2520 = vmatmul.mubr.bf16.vlgmr.msra.gmra.mrb[56].mxu1 %v2444_v63 }
 0xa0f   :  { %v2480_v23 = vpop.f32.mrb[56].mxu0  ;;  %v2521_v16 = vpop.f32.mrb[56].mxu1 }
 0xa10   :  { %v2481_v9 = vadd.f32 %v2480_v23, %v5491_v6  ;;  %v2482_v31 = vpop.f32.mrb[57].mxu0  ;;  %v2523_v39 = vpop.f32.mrb[57].mxu1  ;;  %v2522_v43 = vadd.f32 %v2521_v16, %v5494_v56  ;;  %v2780_v6 = vld [vmem:[%s4577_s3] ss:$0 sm:$0xff] }
 0xa11   :  { %v2483_v60 = vadd.f32 %v2482_v31, %v5492_v15  ;;  %v2484_v32 = vpop.f32.mrb[58].mxu0  ;;  %v2525_v26 = vpop.f32.mrb[58].mxu1  ;;  %v2524_v50 = vadd.f32 %v2523_v39, %v5493_v53 }
 0xa12   :  { %v2777_v55 = vmul.f32 -1.442695, %v2481_v9  ;;  %v2485_v51 = vpop.f32.mrb[59].mxu0  ;;  %v2526_v35 = vpop.f32.mrb[59].mxu1 }
 0xa13   :  { %v2778_v62 = vmul.f32 -1.442695, %v2483_v60  ;;  %v2779_v42 = vmul.f32 -1.442695, %v2524_v50 }
 0xa14   :  { %3026 = vpow2.f32 %v2777_v55 }
 0xa15   :  { %3028 = vpow2.f32 %v2778_v62 }
 0xa16   :  { %3030 = vpow2.f32 %v2779_v42 }
 0xa17   :  { %3032 = vtanh.f32 %v2522_v43 }
 0xa1e   :  { %v3027_v33 = vpop.eup %3026 }
 0xa1f   :  { %v3029_v41 = vpop.eup %3028  ;;  %v2531_v34 = vadd.f32 1.0, %v3027_v33 }
 0xa20   :  { %v2537_v27 = vadd.f32 1.0, %v3029_v41  ;;  %v3031_v61 = vpop.eup %3030 }
 0xa21   :  { %3034 = vrcp.f32 %v2531_v34  ;;  %v3033_v52 = vpop.eup %3032  ;;  %v2544_v46 = vadd.f32 1.0, %v3031_v61 }
 0xa22   :  { %3036 = vrcp.f32 %v2537_v27 }
 0xa23   :  { %3038 = vrcp.f32 %v2544_v46 }
 0xa2b   :  { %v3035_v7 = vpop.eup %3034 }
 0xa2c   :  { %v3037_v38 = vpop.eup %3036  ;;  %v2548_v57 = vmul.f32 %v3035_v7, %v3033_v52 }
 0xa2d   :  { %v2547_v58 = vmul.f32 %v3037_v38, %v2441_v3  ;;  %v3039_v25 = vpop.eup %3038 }
 0xa2f   :  { %v2549_v59 = vadd.f32 %v2548_v57, %v2547_v58 }
 0xa31   :  { %3040 = vtanh.f32 %v2549_v59 }
 0xa3b   :  { %v3041_v21 = vpop.eup %3040 }
 0xa3c   :  { %v2551_v40 = vmul.f32 %v3041_v21, %v3039_v25 }
 0xa3e   :  { %v2558_v8 = vmul.f32 %v2780_v6, %v2551_v40 }
 0xa40   :  { %2559 = vadd.xlane.f32.xlu0 %v2558_v8 }
 0xacd   :  { %v2560_v15 = vpop.xlane.xlu0 %2559 }
 0xace   :  { %v2568_v29 = vadd.f32 %v2781_v13, %v2560_v15 }
 0xad0   :  { %2570 = vst.msk [vmem:[%s4579_s5] sm:$0xff] %vm2569_vm0, %v2568_v29 }
 0xad1   :  { %2575 = vsyncpa [#allocation4], 1 }

</bundles_post_ra>
